<compile_context>
chip_gen: v7x
topology: tpu7x:2x2x1
jax: 0.10.0
libtpu: 0.0.40
codegen_flags: <defaults>
</compile_context>

<pallas_src>
import functools

import jax
import jax.numpy as jnp
import numpy as np
from jax.experimental import pallas as pl
from jax.experimental.pallas import tpu as pltpu


def _l2norm_last(a):
    # a * rsqrt(sum(a^2)): rsqrt lowers to the EUP (own VLIW slot), no divide.
    return a * jax.lax.rsqrt(jnp.sum(a * a, axis=-1, keepdims=True))


def _softmax_last(s):
    m = jnp.max(s, axis=-1, keepdims=True)
    e = jnp.exp(s - m)
    return e * pl.reciprocal(jnp.sum(e, axis=-1, keepdims=True), approx=True)


def attention_msa_kernel(
    x_cls_ref,   # (B*N, C) f32
    x_reg_ref,   # (B*N, C) f32
    w_c_ref,     # (C, 3C) bf16, columns [q | k | v], heads contiguous inside each
    w_r_ref,     # (C, 2C) bf16, columns [q | k]     (v_reg is never used)
    out_ref,     # (B*N, C) f32 -> x_output = concat_h(attn_h @ v_cls_h) + x_cls
    sim_ref,     # (N, N)  f32 -> sim_round2 (depends on batch 0 only)
    *,
    batch: int,
    num_heads: int,
    sim_thresh: float,
):
    BN, C = x_cls_ref.shape
    B = batch
    N = BN // B
    H = num_heads
    D = C // H
    inv_h = 1.0 / float(H)

    x_cls = x_cls_ref[...]                                    # (B*N, C) f32 (residual)

    # Fused, fattened bf16 projections with f32 accumulation (Linear, bias=False).
    qkv_c = jnp.dot(x_cls.astype(jnp.bfloat16), w_c_ref[...],
                    preferred_element_type=jnp.float32)        # (B*N, 3C) f32
    qk_r = jnp.dot(x_reg_ref[...].astype(jnp.bfloat16), w_r_ref[...],
                   preferred_element_type=jnp.float32)         # (B*N, 2C) f32

    def split_heads(y2d, base):
        # (rows, *) -> (H, rows, D): pay the lane relayout once per tensor, then
        # all per-head matmuls are leading-batch einsums on aligned tiles.
        return jnp.stack(
            [y2d[:, base + h * D:base + (h + 1) * D] for h in range(H)], axis=0)

    # B is small and static -> unrolled Python loop, one iteration per batch.
    for b in range(B):
        qkv_b = qkv_c[b * N:(b + 1) * N]                       # (N, 3C)
        qkr_b = qk_r[b * N:(b + 1) * N]                        # (N, 2C)

        q_c = _l2norm_last(split_heads(qkv_b, 0))              # (H, N, D) f32
        k_c = _l2norm_last(split_heads(qkv_b, C))
        v_c = split_heads(qkv_b, 2 * C)                        # (H, N, D) f32
        q_r = _l2norm_last(split_heads(qkr_b, 0))
        k_r = _l2norm_last(split_heads(qkr_b, C))

        # Head-batched score matmuls: bf16 operands, f32 accumulation.
        s_cls = jnp.einsum('hnd,hmd->hnm',
                           q_c.astype(jnp.bfloat16), k_c.astype(jnp.bfloat16),
                           preferred_element_type=jnp.float32)  # (H, N, N)
        s_reg = jnp.einsum('hnd,hmd->hnm',
                           q_r.astype(jnp.bfloat16), k_r.astype(jnp.bfloat16),
                           preferred_element_type=jnp.float32)
        attn = (_softmax_last(s_cls) + _softmax_last(s_reg)) * 0.5   # (H, N, N) f32

        # Head-batched attn @ v, then one lane-dense relayout back to (N, C)
        # with the residual add fused in-kernel.
        o_h = jnp.einsum('hnm,hmd->hnd',
                         attn.astype(jnp.bfloat16), v_c.astype(jnp.bfloat16),
                         preferred_element_type=jnp.float32)         # (H, N, D)
        out = jnp.concatenate([o_h[h] for h in range(H)], axis=-1)   # (N, C)
        out_ref[pl.ds(b * N, N), :] = (
            out + x_cls[b * N:(b + 1) * N]).astype(out_ref.dtype)

        # sim_round2 depends on batch 0 only: fold it into the b == 0 iteration
        # so the head-mean attention is consumed immediately and nothing stays
        # alive across batches.
        if b == 0:
            v_cn = _l2norm_last(v_c)                                  # f32
            # Keep this contraction in f32: `raw_avg > sim_thresh` is a hard
            # threshold and must not flip under bf16 rounding.
            raw = jnp.einsum('hnd,hmd->hnm', v_cn, v_cn,
                             preferred_element_type=jnp.float32)      # (H, N, N)
            raw_avg = jnp.sum(raw, axis=0) * inv_h                    # (N, N)
            attn_mean = jnp.sum(attn, axis=0) * inv_h                 # (N, N)
            sim_mask = jnp.where(raw_avg > sim_thresh, 1.0, 0.0).astype(jnp.float32)
            sr2 = _softmax_last(attn_mean)
            masked = sim_mask * sr2
            # NOTE: all-zero mask rows divide by zero; matches the PyTorch
            # reference (the diagonal of raw_avg is 1.0, so it cannot happen).
            sim_ref[...] = masked * pl.reciprocal(
                jnp.sum(masked, axis=-1, keepdims=True), approx=True)


def attention_msa(x_cls, x_reg, w_cls, w_reg, *, num_heads, sim_thresh=0.75):
    """Forward pass of Attention_msa with ave=True, cls_score=None, fg_score=None.

    Args:
      x_cls, x_reg: (B, N, C) float32
      w_cls, w_reg: (3C, C) float32 (PyTorch nn.Linear weight layout, bias=False)
    Returns:
      (x_output, None, sim_round2) matching the PyTorch module.
    """
    B, N, C = x_cls.shape
    H = num_heads
    assert C % H == 0

    # Flatten (B, N, C) -> (B*N, C) in the wrapper (free metadata reshape) so
    # the kernel sees fattened, lane-dense 2-D operands.
    x_cls2 = x_cls.reshape(B * N, C)
    x_reg2 = x_reg.reshape(B * N, C)

    # Lane-dense bf16 weight slabs.  w.T is (C, 3C) with columns ordered
    # [q_h0..q_hH-1 | k_h0.. | v_h0..], exactly the reshape(B,N,3,H,D) layout.
    w_c = w_cls.T.astype(jnp.bfloat16)              # (C, 3C)
    w_r = w_reg.T[:, :2 * C].astype(jnp.bfloat16)   # (C, 2C); v_reg unused by the module.

    kernel = functools.partial(
        attention_msa_kernel, batch=B, num_heads=H, sim_thresh=float(sim_thresh))

    out2, sim_round2 = pl.pallas_call(
        kernel,
        out_shape=(
            jax.ShapeDtypeStruct((B * N, C), jnp.float32),
            jax.ShapeDtypeStruct((N, N), jnp.float32),
        ),
        grid_spec=pltpu.PrefetchScalarGridSpec(
            num_scalar_prefetch=0,
            grid=(1,),
            in_specs=[
                pl.BlockSpec((B * N, C), lambda i: (0, 0)),
                pl.BlockSpec((B * N, C), lambda i: (0, 0)),
                pl.BlockSpec((C, 3 * C), lambda i: (0, 0)),
                pl.BlockSpec((C, 2 * C), lambda i: (0, 0)),
            ],
            out_specs=[
                pl.BlockSpec((B * N, C), lambda i: (0, 0)),
                pl.BlockSpec((N, N), lambda i: (0, 0)),
            ],
        ),
        compiler_params=pltpu.CompilerParams(
            dimension_semantics=("arbitrary",),
        ),
    )(x_cls2, x_reg2, w_c, w_r)

    return out2.reshape(B, N, C), None, sim_round2


def attention_msa_reference(x_cls, x_reg, w_cls, w_reg, *, num_heads, sim_thresh=0.75):
    """Pure-JAX f32 transcription of the PyTorch forward (ave=True path)."""
    B, N, C = x_cls.shape
    H = num_heads
    D = C // H

    def qkv(x, w):
        y = (x @ w.T).reshape(B, N, 3, H, D).transpose(2, 0, 3, 1, 4)
        return y[0], y[1], y[2]

    q_c, k_c, v_c = qkv(x_cls, w_cls)
    q_r, k_r, _ = qkv(x_reg, w_reg)

    nrm = lambda a: a / jnp.linalg.norm(a, axis=-1, keepdims=True)
    q_c, k_c, q_r, k_r = nrm(q_c), nrm(k_c), nrm(q_r), nrm(k_r)
    v_cn = nrm(v_c)

    attn_cls_raw = v_cn @ jnp.swapaxes(v_cn, -2, -1)
    attn_cls = jax.nn.softmax(q_c @ jnp.swapaxes(k_c, -2, -1), axis=-1)
    attn_reg = jax.nn.softmax(q_r @ jnp.swapaxes(k_r, -2, -1), axis=-1)
    attn = (attn_reg + attn_cls) / 2

    x = (attn @ v_c).transpose(0, 2, 1, 3).reshape(B, N, C)
    x_output = x + x_cls

    raw = jnp.sum(attn_cls_raw, axis=1)[0] / H
    sim_mask = jnp.where(raw > sim_thresh, 1.0, 0.0)
    sim_attn = jnp.sum(attn, axis=1)[0] / H
    sr2 = jax.nn.softmax(sim_attn, axis=-1)
    sr2 = sim_mask * sr2 / jnp.sum(sim_mask * sr2, axis=-1, keepdims=True)
    return x_output, sr2


if __name__ == "__main__":
    # Small shapes consistent with the module: dim divisible by num_heads.
    B, N, C = 2, 16, 64
    num_heads = 4

    key = jax.random.PRNGKey(0)
    k1, k2, k3, k4 = jax.random.split(key, 4)
    x_cls = jax.random.normal(k1, (B, N, C), dtype=jnp.float32)
    x_reg = jax.random.normal(k2, (B, N, C), dtype=jnp.float32)
    # Deterministic "Linear(dim, 3*dim, bias=False)" weights, PyTorch layout (3C, C).
    w_cls = jax.random.normal(k3, (3 * C, C), dtype=jnp.float32) / np.sqrt(C)
    w_reg = jax.random.normal(k4, (3 * C, C), dtype=jnp.float32) / np.sqrt(C)

    x_output, _, sim_round2 = attention_msa(
        x_cls, x_reg, w_cls, w_reg, num_heads=num_heads, sim_thresh=0.75
    )
    jax.block_until_ready((x_output, sim_round2))

    # Correctness check against a pure-JAX f32 transcription of the PyTorch forward.
    x_ref, sim_ref = attention_msa_reference(
        x_cls, x_reg, w_cls, w_reg, num_heads=num_heads, sim_thresh=0.75
    )
    np.testing.assert_allclose(np.asarray(x_output), np.asarray(x_ref), rtol=2e-2, atol=2e-2)
    np.testing.assert_allclose(np.asarray(sim_round2), np.asarray(sim_ref), rtol=2e-2, atol=2e-2)

    print("KERNEL_OK")
</pallas_src>

<mosaic_0001>
module attributes {stable_mosaic.version = 11 : i64} {
  func.func @attention_msa_kernel(%arg0: i32, %arg1: memref<32x64xf32, #tpu.memory_space<vmem>>, %arg2: memref<32x64xf32, #tpu.memory_space<vmem>>, %arg3: memref<64x192xbf16, #tpu.memory_space<vmem>>, %arg4: memref<64x128xbf16, #tpu.memory_space<vmem>>, %arg5: memref<32x64xf32, #tpu.memory_space<vmem>>, %arg6: memref<16x16xf32, #tpu.memory_space<vmem>>) attributes {dimension_semantics = [#tpu.dimension_semantics<arbitrary>], iteration_bounds = array<i64: 1>, scalar_prefetch = 0 : i64, scratch_operands = 0 : i64, tpu.core_type = #tpu.core_type<tc>, window_params = [{pipeline_mode = #tpu.pipeline_mode<synchronous>, transform_indices = @transform_0, window_bounds = array<i64: 32, 64>}, {pipeline_mode = #tpu.pipeline_mode<synchronous>, transform_indices = @transform_1, window_bounds = array<i64: 32, 64>}, {pipeline_mode = #tpu.pipeline_mode<synchronous>, transform_indices = @transform_2, window_bounds = array<i64: 64, 192>}, {pipeline_mode = #tpu.pipeline_mode<synchronous>, transform_indices = @transform_3, window_bounds = array<i64: 64, 128>}, {pipeline_mode = #tpu.pipeline_mode<synchronous>, transform_indices = @transform_4, window_bounds = array<i64: 32, 64>}, {pipeline_mode = #tpu.pipeline_mode<synchronous>, transform_indices = @transform_5, window_bounds = array<i64: 16, 16>}]} {
    %c0 = arith.constant 0 : index
    %c0_0 = arith.constant 0 : index
    %0 = vector.load %arg1[%c0, %c0_0] : memref<32x64xf32, #tpu.memory_space<vmem>>, vector<32x64xf32>
    %1 = arith.truncf %0 : vector<32x64xf32> to vector<32x64xbf16>
    %c0_1 = arith.constant 0 : index
    %c0_2 = arith.constant 0 : index
    %2 = vector.load %arg3[%c0_1, %c0_2] : memref<64x192xbf16, #tpu.memory_space<vmem>>, vector<64x192xbf16>
    %cst = arith.constant dense<0.000000e+00> : vector<32x192xf32>
    %3 = tpu.matmul %1, %2, %cst {dimension_numbers = #tpu.dot_dimension_numbers<[1], [0], [0], [1], [0, 0, 1, 1], [], []>} : vector<32x64xbf16>, vector<64x192xbf16>, vector<32x192xf32> -> vector<32x192xf32>
    %c0_3 = arith.constant 0 : index
    %c0_4 = arith.constant 0 : index
    %4 = vector.load %arg2[%c0_3, %c0_4] : memref<32x64xf32, #tpu.memory_space<vmem>>, vector<32x64xf32>
    %5 = arith.truncf %4 : vector<32x64xf32> to vector<32x64xbf16>
    %c0_5 = arith.constant 0 : index
    %c0_6 = arith.constant 0 : index
    %6 = vector.load %arg4[%c0_5, %c0_6] : memref<64x128xbf16, #tpu.memory_space<vmem>>, vector<64x128xbf16>
    %cst_7 = arith.constant dense<0.000000e+00> : vector<32x128xf32>
    %7 = tpu.matmul %5, %6, %cst_7 {dimension_numbers = #tpu.dot_dimension_numbers<[1], [0], [0], [1], [0, 0, 1, 1], [], []>} : vector<32x64xbf16>, vector<64x128xbf16>, vector<32x128xf32> -> vector<32x128xf32>
    %8 = vector.extract_strided_slice %3 {offsets = [0, 0], sizes = [16, 192], strides = [1, 1]} : vector<32x192xf32> to vector<16x192xf32>
    %9 = vector.extract_strided_slice %7 {offsets = [0, 0], sizes = [16, 128], strides = [1, 1]} : vector<32x128xf32> to vector<16x128xf32>
    %10 = vector.extract_strided_slice %8 {offsets = [0, 0], sizes = [16, 16], strides = [1, 1]} : vector<16x192xf32> to vector<16x16xf32>
    %11 = vector.extract_strided_slice %8 {offsets = [0, 16], sizes = [16, 16], strides = [1, 1]} : vector<16x192xf32> to vector<16x16xf32>
    %12 = vector.extract_strided_slice %8 {offsets = [0, 32], sizes = [16, 16], strides = [1, 1]} : vector<16x192xf32> to vector<16x16xf32>
    %13 = vector.extract_strided_slice %8 {offsets = [0, 48], sizes = [16, 16], strides = [1, 1]} : vector<16x192xf32> to vector<16x16xf32>
    %14 = vector.shape_cast %10 : vector<16x16xf32> to vector<1x16x16xf32>
    %15 = vector.shape_cast %11 : vector<16x16xf32> to vector<1x16x16xf32>
    %16 = vector.shape_cast %12 : vector<16x16xf32> to vector<1x16x16xf32>
    %17 = vector.shape_cast %13 : vector<16x16xf32> to vector<1x16x16xf32>
    %18 = tpu.concatenate %14, %15, %16, %17 in 0 : vector<1x16x16xf32>, vector<1x16x16xf32>, vector<1x16x16xf32>, vector<1x16x16xf32> -> vector<4x16x16xf32>
    %19 = arith.mulf %18, %18 : vector<4x16x16xf32>
    %cst_8 = arith.constant dense<0.000000e+00> : vector<4x16xf32>
    %20 = vector.multi_reduction <add>, %19, %cst_8 [2] : vector<4x16x16xf32> to vector<4x16xf32>
    %21 = vector.shape_cast %20 : vector<4x16xf32> to vector<4x16x1xf32>
    %22 = math.rsqrt %21 : vector<4x16x1xf32>
    %23 = vector.broadcast %22 : vector<4x16x1xf32> to vector<4x16x16xf32>
    %24 = arith.mulf %18, %23 : vector<4x16x16xf32>
    %25 = vector.extract_strided_slice %8 {offsets = [0, 64], sizes = [16, 16], strides = [1, 1]} : vector<16x192xf32> to vector<16x16xf32>
    %26 = vector.extract_strided_slice %8 {offsets = [0, 80], sizes = [16, 16], strides = [1, 1]} : vector<16x192xf32> to vector<16x16xf32>
    %27 = vector.extract_strided_slice %8 {offsets = [0, 96], sizes = [16, 16], strides = [1, 1]} : vector<16x192xf32> to vector<16x16xf32>
    %28 = vector.extract_strided_slice %8 {offsets = [0, 112], sizes = [16, 16], strides = [1, 1]} : vector<16x192xf32> to vector<16x16xf32>
    %29 = vector.shape_cast %25 : vector<16x16xf32> to vector<1x16x16xf32>
    %30 = vector.shape_cast %26 : vector<16x16xf32> to vector<1x16x16xf32>
    %31 = vector.shape_cast %27 : vector<16x16xf32> to vector<1x16x16xf32>
    %32 = vector.shape_cast %28 : vector<16x16xf32> to vector<1x16x16xf32>
    %33 = tpu.concatenate %29, %30, %31, %32 in 0 : vector<1x16x16xf32>, vector<1x16x16xf32>, vector<1x16x16xf32>, vector<1x16x16xf32> -> vector<4x16x16xf32>
    %34 = arith.mulf %33, %33 : vector<4x16x16xf32>
    %cst_9 = arith.constant dense<0.000000e+00> : vector<4x16xf32>
    %35 = vector.multi_reduction <add>, %34, %cst_9 [2] : vector<4x16x16xf32> to vector<4x16xf32>
    %36 = vector.shape_cast %35 : vector<4x16xf32> to vector<4x16x1xf32>
    %37 = math.rsqrt %36 : vector<4x16x1xf32>
    %38 = vector.broadcast %37 : vector<4x16x1xf32> to vector<4x16x16xf32>
    %39 = arith.mulf %33, %38 : vector<4x16x16xf32>
    %40 = vector.extract_strided_slice %8 {offsets = [0, 128], sizes = [16, 16], strides = [1, 1]} : vector<16x192xf32> to vector<16x16xf32>
    %41 = vector.extract_strided_slice %8 {offsets = [0, 144], sizes = [16, 16], strides = [1, 1]} : vector<16x192xf32> to vector<16x16xf32>
    %42 = vector.extract_strided_slice %8 {offsets = [0, 160], sizes = [16, 16], strides = [1, 1]} : vector<16x192xf32> to vector<16x16xf32>
    %43 = vector.extract_strided_slice %8 {offsets = [0, 176], sizes = [16, 16], strides = [1, 1]} : vector<16x192xf32> to vector<16x16xf32>
    %44 = vector.shape_cast %40 : vector<16x16xf32> to vector<1x16x16xf32>
    %45 = vector.shape_cast %41 : vector<16x16xf32> to vector<1x16x16xf32>
    %46 = vector.shape_cast %42 : vector<16x16xf32> to vector<1x16x16xf32>
    %47 = vector.shape_cast %43 : vector<16x16xf32> to vector<1x16x16xf32>
    %48 = tpu.concatenate %44, %45, %46, %47 in 0 : vector<1x16x16xf32>, vector<1x16x16xf32>, vector<1x16x16xf32>, vector<1x16x16xf32> -> vector<4x16x16xf32>
    %49 = vector.extract_strided_slice %9 {offsets = [0, 0], sizes = [16, 16], strides = [1, 1]} : vector<16x128xf32> to vector<16x16xf32>
    %50 = vector.extract_strided_slice %9 {offsets = [0, 16], sizes = [16, 16], strides = [1, 1]} : vector<16x128xf32> to vector<16x16xf32>
    %51 = vector.extract_strided_slice %9 {offsets = [0, 32], sizes = [16, 16], strides = [1, 1]} : vector<16x128xf32> to vector<16x16xf32>
    %52 = vector.extract_strided_slice %9 {offsets = [0, 48], sizes = [16, 16], strides = [1, 1]} : vector<16x128xf32> to vector<16x16xf32>
    %53 = vector.shape_cast %49 : vector<16x16xf32> to vector<1x16x16xf32>
    %54 = vector.shape_cast %50 : vector<16x16xf32> to vector<1x16x16xf32>
    %55 = vector.shape_cast %51 : vector<16x16xf32> to vector<1x16x16xf32>
    %56 = vector.shape_cast %52 : vector<16x16xf32> to vector<1x16x16xf32>
    %57 = tpu.concatenate %53, %54, %55, %56 in 0 : vector<1x16x16xf32>, vector<1x16x16xf32>, vector<1x16x16xf32>, vector<1x16x16xf32> -> vector<4x16x16xf32>
    %58 = arith.mulf %57, %57 : vector<4x16x16xf32>
    %cst_10 = arith.constant dense<0.000000e+00> : vector<4x16xf32>
    %59 = vector.multi_reduction <add>, %58, %cst_10 [2] : vector<4x16x16xf32> to vector<4x16xf32>
    %60 = vector.shape_cast %59 : vector<4x16xf32> to vector<4x16x1xf32>
    %61 = math.rsqrt %60 : vector<4x16x1xf32>
    %62 = vector.broadcast %61 : vector<4x16x1xf32> to vector<4x16x16xf32>
    %63 = arith.mulf %57, %62 : vector<4x16x16xf32>
    %64 = vector.extract_strided_slice %9 {offsets = [0, 64], sizes = [16, 16], strides = [1, 1]} : vector<16x128xf32> to vector<16x16xf32>
    %65 = vector.extract_strided_slice %9 {offsets = [0, 80], sizes = [16, 16], strides = [1, 1]} : vector<16x128xf32> to vector<16x16xf32>
    %66 = vector.extract_strided_slice %9 {offsets = [0, 96], sizes = [16, 16], strides = [1, 1]} : vector<16x128xf32> to vector<16x16xf32>
    %67 = vector.extract_strided_slice %9 {offsets = [0, 112], sizes = [16, 16], strides = [1, 1]} : vector<16x128xf32> to vector<16x16xf32>
    %68 = vector.shape_cast %64 : vector<16x16xf32> to vector<1x16x16xf32>
    %69 = vector.shape_cast %65 : vector<16x16xf32> to vector<1x16x16xf32>
    %70 = vector.shape_cast %66 : vector<16x16xf32> to vector<1x16x16xf32>
    %71 = vector.shape_cast %67 : vector<16x16xf32> to vector<1x16x16xf32>
    %72 = tpu.concatenate %68, %69, %70, %71 in 0 : vector<1x16x16xf32>, vector<1x16x16xf32>, vector<1x16x16xf32>, vector<1x16x16xf32> -> vector<4x16x16xf32>
    %73 = arith.mulf %72, %72 : vector<4x16x16xf32>
    %cst_11 = arith.constant dense<0.000000e+00> : vector<4x16xf32>
    %74 = vector.multi_reduction <add>, %73, %cst_11 [2] : vector<4x16x16xf32> to vector<4x16xf32>
    %75 = vector.shape_cast %74 : vector<4x16xf32> to vector<4x16x1xf32>
    %76 = math.rsqrt %75 : vector<4x16x1xf32>
    %77 = vector.broadcast %76 : vector<4x16x1xf32> to vector<4x16x16xf32>
    %78 = arith.mulf %72, %77 : vector<4x16x16xf32>
    %79 = arith.truncf %24 : vector<4x16x16xf32> to vector<4x16x16xbf16>
    %80 = arith.truncf %39 : vector<4x16x16xf32> to vector<4x16x16xbf16>
    "tpu.trace_start"() <{level = 10 : i32, message = "hnd,hmd->hnm"}> : () -> ()
    %cst_12 = arith.constant dense<0.000000e+00> : vector<4x16x16xf32>
    %81 = tpu.matmul %79, %80, %cst_12 {dimension_numbers = #tpu.dot_dimension_numbers<[2], [2], [1], [1], [0, 0, 0, 1, 1, 1], [0], [0]>} : vector<4x16x16xbf16>, vector<4x16x16xbf16>, vector<4x16x16xf32> -> vector<4x16x16xf32>
    "tpu.trace_stop"() : () -> ()
    %82 = arith.truncf %63 : vector<4x16x16xf32> to vector<4x16x16xbf16>
    %83 = arith.truncf %78 : vector<4x16x16xf32> to vector<4x16x16xbf16>
    "tpu.trace_start"() <{level = 10 : i32, message = "hnd,hmd->hnm"}> : () -> ()
    %cst_13 = arith.constant dense<0.000000e+00> : vector<4x16x16xf32>
    %84 = tpu.matmul %82, %83, %cst_13 {dimension_numbers = #tpu.dot_dimension_numbers<[2], [2], [1], [1], [0, 0, 0, 1, 1, 1], [0], [0]>} : vector<4x16x16xbf16>, vector<4x16x16xbf16>, vector<4x16x16xf32> -> vector<4x16x16xf32>
    "tpu.trace_stop"() : () -> ()
    %cst_14 = arith.constant dense<0xFF800000> : vector<4x16xf32>
    %85 = vector.multi_reduction <maximumf>, %81, %cst_14 [2] : vector<4x16x16xf32> to vector<4x16xf32>
    %86 = vector.shape_cast %85 : vector<4x16xf32> to vector<4x16x1xf32>
    %87 = vector.broadcast %86 : vector<4x16x1xf32> to vector<4x16x16xf32>
    %88 = arith.subf %81, %87 : vector<4x16x16xf32>
    %89 = math.exp %88 : vector<4x16x16xf32>
    %cst_15 = arith.constant dense<0.000000e+00> : vector<4x16xf32>
    %90 = vector.multi_reduction <add>, %89, %cst_15 [2] : vector<4x16x16xf32> to vector<4x16xf32>
    %91 = vector.shape_cast %90 : vector<4x16xf32> to vector<4x16x1xf32>
    %92 = tpu.reciprocal %91 {approx = true} : vector<4x16x1xf32> -> vector<4x16x1xf32>
    %93 = vector.broadcast %92 : vector<4x16x1xf32> to vector<4x16x16xf32>
    %94 = arith.mulf %89, %93 : vector<4x16x16xf32>
    %cst_16 = arith.constant dense<0xFF800000> : vector<4x16xf32>
    %95 = vector.multi_reduction <maximumf>, %84, %cst_16 [2] : vector<4x16x16xf32> to vector<4x16xf32>
    %96 = vector.shape_cast %95 : vector<4x16xf32> to vector<4x16x1xf32>
    %97 = vector.broadcast %96 : vector<4x16x1xf32> to vector<4x16x16xf32>
    %98 = arith.subf %84, %97 : vector<4x16x16xf32>
    %99 = math.exp %98 : vector<4x16x16xf32>
    %cst_17 = arith.constant dense<0.000000e+00> : vector<4x16xf32>
    %100 = vector.multi_reduction <add>, %99, %cst_17 [2] : vector<4x16x16xf32> to vector<4x16xf32>
    %101 = vector.shape_cast %100 : vector<4x16xf32> to vector<4x16x1xf32>
    %102 = tpu.reciprocal %101 {approx = true} : vector<4x16x1xf32> -> vector<4x16x1xf32>
    %103 = vector.broadcast %102 : vector<4x16x1xf32> to vector<4x16x16xf32>
    %104 = arith.mulf %99, %103 : vector<4x16x16xf32>
    %105 = arith.addf %94, %104 : vector<4x16x16xf32>
    %cst_18 = arith.constant 5.000000e-01 : f32
    %106 = vector.broadcast %cst_18 : f32 to vector<4x16x16xf32>
    %107 = arith.mulf %105, %106 : vector<4x16x16xf32>
    %108 = arith.truncf %107 : vector<4x16x16xf32> to vector<4x16x16xbf16>
    %109 = arith.truncf %48 : vector<4x16x16xf32> to vector<4x16x16xbf16>
    "tpu.trace_start"() <{level = 10 : i32, message = "hnm,hmd->hnd"}> : () -> ()
    %cst_19 = arith.constant dense<0.000000e+00> : vector<4x16x16xf32>
    %110 = tpu.matmul %108, %109, %cst_19 {dimension_numbers = #tpu.dot_dimension_numbers<[2], [1], [1], [2], [0, 0, 0, 1, 1, 2], [0], [0]>} : vector<4x16x16xbf16>, vector<4x16x16xbf16>, vector<4x16x16xf32> -> vector<4x16x16xf32>
    "tpu.trace_stop"() : () -> ()
    %111 = vector.extract_strided_slice %110 {offsets = [0, 0, 0], sizes = [1, 16, 16], strides = [1, 1, 1]} : vector<4x16x16xf32> to vector<1x16x16xf32>
    %112 = vector.shape_cast %111 : vector<1x16x16xf32> to vector<16x16xf32>
    %113 = vector.extract_strided_slice %110 {offsets = [1, 0, 0], sizes = [1, 16, 16], strides = [1, 1, 1]} : vector<4x16x16xf32> to vector<1x16x16xf32>
    %114 = vector.shape_cast %113 : vector<1x16x16xf32> to vector<16x16xf32>
    %115 = vector.extract_strided_slice %110 {offsets = [2, 0, 0], sizes = [1, 16, 16], strides = [1, 1, 1]} : vector<4x16x16xf32> to vector<1x16x16xf32>
    %116 = vector.shape_cast %115 : vector<1x16x16xf32> to vector<16x16xf32>
    %117 = vector.extract_strided_slice %110 {offsets = [3, 0, 0], sizes = [1, 16, 16], strides = [1, 1, 1]} : vector<4x16x16xf32> to vector<1x16x16xf32>
    %118 = vector.shape_cast %117 : vector<1x16x16xf32> to vector<16x16xf32>
    %119 = tpu.concatenate %112, %114, %116, %118 in 1 : vector<16x16xf32>, vector<16x16xf32>, vector<16x16xf32>, vector<16x16xf32> -> vector<16x64xf32>
    %120 = vector.extract_strided_slice %0 {offsets = [0, 0], sizes = [16, 64], strides = [1, 1]} : vector<32x64xf32> to vector<16x64xf32>
    %121 = arith.addf %119, %120 : vector<16x64xf32>
    %c0_20 = arith.constant 0 : index
    %c0_21 = arith.constant 0 : index
    %122 = vector.load %arg5[%c0_20, %c0_21] : memref<32x64xf32, #tpu.memory_space<vmem>>, vector<16x64xf32>
    tpu.vector_store %arg5[%c0_20, %c0_21], %121 {strides = array<i32>} : memref<32x64xf32, #tpu.memory_space<vmem>>, vector<16x64xf32>,
    %123 = arith.mulf %48, %48 : vector<4x16x16xf32>
    %cst_22 = arith.constant dense<0.000000e+00> : vector<4x16xf32>
    %124 = vector.multi_reduction <add>, %123, %cst_22 [2] : vector<4x16x16xf32> to vector<4x16xf32>
    %125 = vector.shape_cast %124 : vector<4x16xf32> to vector<4x16x1xf32>
    %126 = math.rsqrt %125 : vector<4x16x1xf32>
    %127 = vector.broadcast %126 : vector<4x16x1xf32> to vector<4x16x16xf32>
    %128 = arith.mulf %48, %127 : vector<4x16x16xf32>
    "tpu.trace_start"() <{level = 10 : i32, message = "hnd,hmd->hnm"}> : () -> ()
    %cst_23 = arith.constant dense<0.000000e+00> : vector<4x16x16xf32>
    %129 = tpu.matmul %128, %128, %cst_23 {dimension_numbers = #tpu.dot_dimension_numbers<[2], [2], [1], [1], [0, 0, 0, 1, 1, 1], [0], [0]>} : vector<4x16x16xf32>, vector<4x16x16xf32>, vector<4x16x16xf32> -> vector<4x16x16xf32>
    "tpu.trace_stop"() : () -> ()
    %cst_24 = arith.constant dense<0.000000e+00> : vector<16x16xf32>
    %130 = vector.multi_reduction <add>, %129, %cst_24 [0] : vector<4x16x16xf32> to vector<16x16xf32>
    %cst_25 = arith.constant 2.500000e-01 : f32
    %131 = vector.broadcast %cst_25 : f32 to vector<16x16xf32>
    %132 = arith.mulf %130, %131 : vector<16x16xf32>
    %cst_26 = arith.constant dense<0.000000e+00> : vector<16x16xf32>
    %133 = vector.multi_reduction <add>, %107, %cst_26 [0] : vector<4x16x16xf32> to vector<16x16xf32>
    %cst_27 = arith.constant 2.500000e-01 : f32
    %134 = vector.broadcast %cst_27 : f32 to vector<16x16xf32>
    %135 = arith.mulf %133, %134 : vector<16x16xf32>
    %cst_28 = arith.constant 7.500000e-01 : f32
    %136 = vector.broadcast %cst_28 : f32 to vector<16x16xf32>
    %137 = arith.cmpf ogt, %132, %136 : vector<16x16xf32>
    %cst_29 = arith.constant 1.000000e+00 : f32
    %cst_30 = arith.constant 0.000000e+00 : f32
    %138 = vector.broadcast %cst_29 : f32 to vector<16x16xf32>
    %139 = vector.broadcast %cst_30 : f32 to vector<16x16xf32>
    %140 = arith.select %137, %138, %139 : vector<16x16xi1>, vector<16x16xf32>
    %cst_31 = arith.constant dense<0xFF800000> : vector<16xf32>
    %141 = vector.multi_reduction <maximumf>, %135, %cst_31 [1] : vector<16x16xf32> to vector<16xf32>
    %142 = vector.shape_cast %141 : vector<16xf32> to vector<16x1xf32>
    %143 = vector.broadcast %142 : vector<16x1xf32> to vector<16x16xf32>
    %144 = arith.subf %135, %143 : vector<16x16xf32>
    %145 = math.exp %144 : vector<16x16xf32>
    %cst_32 = arith.constant dense<0.000000e+00> : vector<16xf32>
    %146 = vector.multi_reduction <add>, %145, %cst_32 [1] : vector<16x16xf32> to vector<16xf32>
    %147 = vector.shape_cast %146 : vector<16xf32> to vector<16x1xf32>
    %148 = tpu.reciprocal %147 {approx = true} : vector<16x1xf32> -> vector<16x1xf32>
    %149 = vector.broadcast %148 : vector<16x1xf32> to vector<16x16xf32>
    %150 = arith.mulf %145, %149 : vector<16x16xf32>
    %151 = arith.mulf %140, %150 : vector<16x16xf32>
    %cst_33 = arith.constant dense<0.000000e+00> : vector<16xf32>
    %152 = vector.multi_reduction <add>, %151, %cst_33 [1] : vector<16x16xf32> to vector<16xf32>
    %153 = vector.shape_cast %152 : vector<16xf32> to vector<16x1xf32>
    %154 = tpu.reciprocal %153 {approx = true} : vector<16x1xf32> -> vector<16x1xf32>
    %155 = vector.broadcast %154 : vector<16x1xf32> to vector<16x16xf32>
    %156 = arith.mulf %151, %155 : vector<16x16xf32>
    %c0_34 = arith.constant 0 : index
    %c0_35 = arith.constant 0 : index
    %157 = vector.load %arg6[%c0_34, %c0_35] : memref<16x16xf32, #tpu.memory_space<vmem>>, vector<16x16xf32>
    tpu.vector_store %arg6[%c0_34, %c0_35], %156 {strides = array<i32>} : memref<16x16xf32, #tpu.memory_space<vmem>>, vector<16x16xf32>,
    %158 = vector.extract_strided_slice %3 {offsets = [16, 0], sizes = [16, 192], strides = [1, 1]} : vector<32x192xf32> to vector<16x192xf32>
    %159 = vector.extract_strided_slice %7 {offsets = [16, 0], sizes = [16, 128], strides = [1, 1]} : vector<32x128xf32> to vector<16x128xf32>
    %160 = vector.extract_strided_slice %158 {offsets = [0, 0], sizes = [16, 16], strides = [1, 1]} : vector<16x192xf32> to vector<16x16xf32>
    %161 = vector.extract_strided_slice %158 {offsets = [0, 16], sizes = [16, 16], strides = [1, 1]} : vector<16x192xf32> to vector<16x16xf32>
    %162 = vector.extract_strided_slice %158 {offsets = [0, 32], sizes = [16, 16], strides = [1, 1]} : vector<16x192xf32> to vector<16x16xf32>
    %163 = vector.extract_strided_slice %158 {offsets = [0, 48], sizes = [16, 16], strides = [1, 1]} : vector<16x192xf32> to vector<16x16xf32>
    %164 = vector.shape_cast %160 : vector<16x16xf32> to vector<1x16x16xf32>
    %165 = vector.shape_cast %161 : vector<16x16xf32> to vector<1x16x16xf32>
    %166 = vector.shape_cast %162 : vector<16x16xf32> to vector<1x16x16xf32>
    %167 = vector.shape_cast %163 : vector<16x16xf32> to vector<1x16x16xf32>
    %168 = tpu.concatenate %164, %165, %166, %167 in 0 : vector<1x16x16xf32>, vector<1x16x16xf32>, vector<1x16x16xf32>, vector<1x16x16xf32> -> vector<4x16x16xf32>
    %169 = arith.mulf %168, %168 : vector<4x16x16xf32>
    %cst_36 = arith.constant dense<0.000000e+00> : vector<4x16xf32>
    %170 = vector.multi_reduction <add>, %169, %cst_36 [2] : vector<4x16x16xf32> to vector<4x16xf32>
    %171 = vector.shape_cast %170 : vector<4x16xf32> to vector<4x16x1xf32>
    %172 = math.rsqrt %171 : vector<4x16x1xf32>
    %173 = vector.broadcast %172 : vector<4x16x1xf32> to vector<4x16x16xf32>
    %174 = arith.mulf %168, %173 : vector<4x16x16xf32>
    %175 = vector.extract_strided_slice %158 {offsets = [0, 64], sizes = [16, 16], strides = [1, 1]} : vector<16x192xf32> to vector<16x16xf32>
    %176 = vector.extract_strided_slice %158 {offsets = [0, 80], sizes = [16, 16], strides = [1, 1]} : vector<16x192xf32> to vector<16x16xf32>
    %177 = vector.extract_strided_slice %158 {offsets = [0, 96], sizes = [16, 16], strides = [1, 1]} : vector<16x192xf32> to vector<16x16xf32>
    %178 = vector.extract_strided_slice %158 {offsets = [0, 112], sizes = [16, 16], strides = [1, 1]} : vector<16x192xf32> to vector<16x16xf32>
    %179 = vector.shape_cast %175 : vector<16x16xf32> to vector<1x16x16xf32>
    %180 = vector.shape_cast %176 : vector<16x16xf32> to vector<1x16x16xf32>
    %181 = vector.shape_cast %177 : vector<16x16xf32> to vector<1x16x16xf32>
    %182 = vector.shape_cast %178 : vector<16x16xf32> to vector<1x16x16xf32>
    %183 = tpu.concatenate %179, %180, %181, %182 in 0 : vector<1x16x16xf32>, vector<1x16x16xf32>, vector<1x16x16xf32>, vector<1x16x16xf32> -> vector<4x16x16xf32>
    %184 = arith.mulf %183, %183 : vector<4x16x16xf32>
    %cst_37 = arith.constant dense<0.000000e+00> : vector<4x16xf32>
    %185 = vector.multi_reduction <add>, %184, %cst_37 [2] : vector<4x16x16xf32> to vector<4x16xf32>
    %186 = vector.shape_cast %185 : vector<4x16xf32> to vector<4x16x1xf32>
    %187 = math.rsqrt %186 : vector<4x16x1xf32>
    %188 = vector.broadcast %187 : vector<4x16x1xf32> to vector<4x16x16xf32>
    %189 = arith.mulf %183, %188 : vector<4x16x16xf32>
    %190 = vector.extract_strided_slice %158 {offsets = [0, 128], sizes = [16, 16], strides = [1, 1]} : vector<16x192xf32> to vector<16x16xf32>
    %191 = vector.extract_strided_slice %158 {offsets = [0, 144], sizes = [16, 16], strides = [1, 1]} : vector<16x192xf32> to vector<16x16xf32>
    %192 = vector.extract_strided_slice %158 {offsets = [0, 160], sizes = [16, 16], strides = [1, 1]} : vector<16x192xf32> to vector<16x16xf32>
    %193 = vector.extract_strided_slice %158 {offsets = [0, 176], sizes = [16, 16], strides = [1, 1]} : vector<16x192xf32> to vector<16x16xf32>
    %194 = vector.shape_cast %190 : vector<16x16xf32> to vector<1x16x16xf32>
    %195 = vector.shape_cast %191 : vector<16x16xf32> to vector<1x16x16xf32>
    %196 = vector.shape_cast %192 : vector<16x16xf32> to vector<1x16x16xf32>
    %197 = vector.shape_cast %193 : vector<16x16xf32> to vector<1x16x16xf32>
    %198 = tpu.concatenate %194, %195, %196, %197 in 0 : vector<1x16x16xf32>, vector<1x16x16xf32>, vector<1x16x16xf32>, vector<1x16x16xf32> -> vector<4x16x16xf32>
    %199 = vector.extract_strided_slice %159 {offsets = [0, 0], sizes = [16, 16], strides = [1, 1]} : vector<16x128xf32> to vector<16x16xf32>
    %200 = vector.extract_strided_slice %159 {offsets = [0, 16], sizes = [16, 16], strides = [1, 1]} : vector<16x128xf32> to vector<16x16xf32>
    %201 = vector.extract_strided_slice %159 {offsets = [0, 32], sizes = [16, 16], strides = [1, 1]} : vector<16x128xf32> to vector<16x16xf32>
    %202 = vector.extract_strided_slice %159 {offsets = [0, 48], sizes = [16, 16], strides = [1, 1]} : vector<16x128xf32> to vector<16x16xf32>
    %203 = vector.shape_cast %199 : vector<16x16xf32> to vector<1x16x16xf32>
    %204 = vector.shape_cast %200 : vector<16x16xf32> to vector<1x16x16xf32>
    %205 = vector.shape_cast %201 : vector<16x16xf32> to vector<1x16x16xf32>
    %206 = vector.shape_cast %202 : vector<16x16xf32> to vector<1x16x16xf32>
    %207 = tpu.concatenate %203, %204, %205, %206 in 0 : vector<1x16x16xf32>, vector<1x16x16xf32>, vector<1x16x16xf32>, vector<1x16x16xf32> -> vector<4x16x16xf32>
    %208 = arith.mulf %207, %207 : vector<4x16x16xf32>
    %cst_38 = arith.constant dense<0.000000e+00> : vector<4x16xf32>
    %209 = vector.multi_reduction <add>, %208, %cst_38 [2] : vector<4x16x16xf32> to vector<4x16xf32>
    %210 = vector.shape_cast %209 : vector<4x16xf32> to vector<4x16x1xf32>
    %211 = math.rsqrt %210 : vector<4x16x1xf32>
    %212 = vector.broadcast %211 : vector<4x16x1xf32> to vector<4x16x16xf32>
    %213 = arith.mulf %207, %212 : vector<4x16x16xf32>
    %214 = vector.extract_strided_slice %159 {offsets = [0, 64], sizes = [16, 16], strides = [1, 1]} : vector<16x128xf32> to vector<16x16xf32>
    %215 = vector.extract_strided_slice %159 {offsets = [0, 80], sizes = [16, 16], strides = [1, 1]} : vector<16x128xf32> to vector<16x16xf32>
    %216 = vector.extract_strided_slice %159 {offsets = [0, 96], sizes = [16, 16], strides = [1, 1]} : vector<16x128xf32> to vector<16x16xf32>
    %217 = vector.extract_strided_slice %159 {offsets = [0, 112], sizes = [16, 16], strides = [1, 1]} : vector<16x128xf32> to vector<16x16xf32>
    %218 = vector.shape_cast %214 : vector<16x16xf32> to vector<1x16x16xf32>
    %219 = vector.shape_cast %215 : vector<16x16xf32> to vector<1x16x16xf32>
    %220 = vector.shape_cast %216 : vector<16x16xf32> to vector<1x16x16xf32>
    %221 = vector.shape_cast %217 : vector<16x16xf32> to vector<1x16x16xf32>
    %222 = tpu.concatenate %218, %219, %220, %221 in 0 : vector<1x16x16xf32>, vector<1x16x16xf32>, vector<1x16x16xf32>, vector<1x16x16xf32> -> vector<4x16x16xf32>
    %223 = arith.mulf %222, %222 : vector<4x16x16xf32>
    %cst_39 = arith.constant dense<0.000000e+00> : vector<4x16xf32>
    %224 = vector.multi_reduction <add>, %223, %cst_39 [2] : vector<4x16x16xf32> to vector<4x16xf32>
    %225 = vector.shape_cast %224 : vector<4x16xf32> to vector<4x16x1xf32>
    %226 = math.rsqrt %225 : vector<4x16x1xf32>
    %227 = vector.broadcast %226 : vector<4x16x1xf32> to vector<4x16x16xf32>
    %228 = arith.mulf %222, %227 : vector<4x16x16xf32>
    %229 = arith.truncf %174 : vector<4x16x16xf32> to vector<4x16x16xbf16>
    %230 = arith.truncf %189 : vector<4x16x16xf32> to vector<4x16x16xbf16>
    "tpu.trace_start"() <{level = 10 : i32, message = "hnd,hmd->hnm"}> : () -> ()
    %cst_40 = arith.constant dense<0.000000e+00> : vector<4x16x16xf32>
    %231 = tpu.matmul %229, %230, %cst_40 {dimension_numbers = #tpu.dot_dimension_numbers<[2], [2], [1], [1], [0, 0, 0, 1, 1, 1], [0], [0]>} : vector<4x16x16xbf16>, vector<4x16x16xbf16>, vector<4x16x16xf32> -> vector<4x16x16xf32>
    "tpu.trace_stop"() : () -> ()
    %232 = arith.truncf %213 : vector<4x16x16xf32> to vector<4x16x16xbf16>
    %233 = arith.truncf %228 : vector<4x16x16xf32> to vector<4x16x16xbf16>
    "tpu.trace_start"() <{level = 10 : i32, message = "hnd,hmd->hnm"}> : () -> ()
    %cst_41 = arith.constant dense<0.000000e+00> : vector<4x16x16xf32>
    %234 = tpu.matmul %232, %233, %cst_41 {dimension_numbers = #tpu.dot_dimension_numbers<[2], [2], [1], [1], [0, 0, 0, 1, 1, 1], [0], [0]>} : vector<4x16x16xbf16>, vector<4x16x16xbf16>, vector<4x16x16xf32> -> vector<4x16x16xf32>
    "tpu.trace_stop"() : () -> ()
    %cst_42 = arith.constant dense<0xFF800000> : vector<4x16xf32>
    %235 = vector.multi_reduction <maximumf>, %231, %cst_42 [2] : vector<4x16x16xf32> to vector<4x16xf32>
    %236 = vector.shape_cast %235 : vector<4x16xf32> to vector<4x16x1xf32>
    %237 = vector.broadcast %236 : vector<4x16x1xf32> to vector<4x16x16xf32>
    %238 = arith.subf %231, %237 : vector<4x16x16xf32>
    %239 = math.exp %238 : vector<4x16x16xf32>
    %cst_43 = arith.constant dense<0.000000e+00> : vector<4x16xf32>
    %240 = vector.multi_reduction <add>, %239, %cst_43 [2] : vector<4x16x16xf32> to vector<4x16xf32>
    %241 = vector.shape_cast %240 : vector<4x16xf32> to vector<4x16x1xf32>
    %242 = tpu.reciprocal %241 {approx = true} : vector<4x16x1xf32> -> vector<4x16x1xf32>
    %243 = vector.broadcast %242 : vector<4x16x1xf32> to vector<4x16x16xf32>
    %244 = arith.mulf %239, %243 : vector<4x16x16xf32>
    %cst_44 = arith.constant dense<0xFF800000> : vector<4x16xf32>
    %245 = vector.multi_reduction <maximumf>, %234, %cst_44 [2] : vector<4x16x16xf32> to vector<4x16xf32>
    %246 = vector.shape_cast %245 : vector<4x16xf32> to vector<4x16x1xf32>
    %247 = vector.broadcast %246 : vector<4x16x1xf32> to vector<4x16x16xf32>
    %248 = arith.subf %234, %247 : vector<4x16x16xf32>
    %249 = math.exp %248 : vector<4x16x16xf32>
    %cst_45 = arith.constant dense<0.000000e+00> : vector<4x16xf32>
    %250 = vector.multi_reduction <add>, %249, %cst_45 [2] : vector<4x16x16xf32> to vector<4x16xf32>
    %251 = vector.shape_cast %250 : vector<4x16xf32> to vector<4x16x1xf32>
    %252 = tpu.reciprocal %251 {approx = true} : vector<4x16x1xf32> -> vector<4x16x1xf32>
    %253 = vector.broadcast %252 : vector<4x16x1xf32> to vector<4x16x16xf32>
    %254 = arith.mulf %249, %253 : vector<4x16x16xf32>
    %255 = arith.addf %244, %254 : vector<4x16x16xf32>
    %cst_46 = arith.constant 5.000000e-01 : f32
    %256 = vector.broadcast %cst_46 : f32 to vector<4x16x16xf32>
    %257 = arith.mulf %255, %256 : vector<4x16x16xf32>
    %258 = arith.truncf %257 : vector<4x16x16xf32> to vector<4x16x16xbf16>
    %259 = arith.truncf %198 : vector<4x16x16xf32> to vector<4x16x16xbf16>
    "tpu.trace_start"() <{level = 10 : i32, message = "hnm,hmd->hnd"}> : () -> ()
    %cst_47 = arith.constant dense<0.000000e+00> : vector<4x16x16xf32>
    %260 = tpu.matmul %258, %259, %cst_47 {dimension_numbers = #tpu.dot_dimension_numbers<[2], [1], [1], [2], [0, 0, 0, 1, 1, 2], [0], [0]>} : vector<4x16x16xbf16>, vector<4x16x16xbf16>, vector<4x16x16xf32> -> vector<4x16x16xf32>
    "tpu.trace_stop"() : () -> ()
    %261 = vector.extract_strided_slice %260 {offsets = [0, 0, 0], sizes = [1, 16, 16], strides = [1, 1, 1]} : vector<4x16x16xf32> to vector<1x16x16xf32>
    %262 = vector.shape_cast %261 : vector<1x16x16xf32> to vector<16x16xf32>
    %263 = vector.extract_strided_slice %260 {offsets = [1, 0, 0], sizes = [1, 16, 16], strides = [1, 1, 1]} : vector<4x16x16xf32> to vector<1x16x16xf32>
    %264 = vector.shape_cast %263 : vector<1x16x16xf32> to vector<16x16xf32>
    %265 = vector.extract_strided_slice %260 {offsets = [2, 0, 0], sizes = [1, 16, 16], strides = [1, 1, 1]} : vector<4x16x16xf32> to vector<1x16x16xf32>
    %266 = vector.shape_cast %265 : vector<1x16x16xf32> to vector<16x16xf32>
    %267 = vector.extract_strided_slice %260 {offsets = [3, 0, 0], sizes = [1, 16, 16], strides = [1, 1, 1]} : vector<4x16x16xf32> to vector<1x16x16xf32>
    %268 = vector.shape_cast %267 : vector<1x16x16xf32> to vector<16x16xf32>
    %269 = tpu.concatenate %262, %264, %266, %268 in 1 : vector<16x16xf32>, vector<16x16xf32>, vector<16x16xf32>, vector<16x16xf32> -> vector<16x64xf32>
    %270 = vector.extract_strided_slice %0 {offsets = [16, 0], sizes = [16, 64], strides = [1, 1]} : vector<32x64xf32> to vector<16x64xf32>
    %271 = arith.addf %269, %270 : vector<16x64xf32>
    %c16 = arith.constant 16 : index
    %c0_48 = arith.constant 0 : index
    %272 = vector.load %arg5[%c16, %c0_48] : memref<32x64xf32, #tpu.memory_space<vmem>>, vector<16x64xf32>
    tpu.vector_store %arg5[%c16, %c0_48], %271 {strides = array<i32>} : memref<32x64xf32, #tpu.memory_space<vmem>>, vector<16x64xf32>,
    return
  }
  func.func @transform_0(%arg0: i32) -> (i32, i32) {
    %c0_i32 = arith.constant 0 : i32
    %c0_i32_0 = arith.constant 0 : i32
    %c0_i32_1 = arith.constant 0 : i32
    return %c0_i32, %c0_i32_0 : i32, i32
  }
  func.func @transform_1(%arg0: i32) -> (i32, i32) {
    %c0_i32 = arith.constant 0 : i32
    %c0_i32_0 = arith.constant 0 : i32
    %c0_i32_1 = arith.constant 0 : i32
    return %c0_i32, %c0_i32_0 : i32, i32
  }
  func.func @transform_2(%arg0: i32) -> (i32, i32) {
    %c0_i32 = arith.constant 0 : i32
    %c0_i32_0 = arith.constant 0 : i32
    %c0_i32_1 = arith.constant 0 : i32
    return %c0_i32, %c0_i32_0 : i32, i32
  }
  func.func @transform_3(%arg0: i32) -> (i32, i32) {
    %c0_i32 = arith.constant 0 : i32
    %c0_i32_0 = arith.constant 0 : i32
    %c0_i32_1 = arith.constant 0 : i32
    return %c0_i32, %c0_i32_0 : i32, i32
  }
  func.func @transform_4(%arg0: i32) -> (i32, i32) {
    %c0_i32 = arith.constant 0 : i32
    %c0_i32_0 = arith.constant 0 : i32
    %c0_i32_1 = arith.constant 0 : i32
    return %c0_i32, %c0_i32_0 : i32, i32
  }
  func.func @transform_5(%arg0: i32) -> (i32, i32) {
    %c0_i32 = arith.constant 0 : i32
    %c0_i32_0 = arith.constant 0 : i32
    %c0_i32_1 = arith.constant 0 : i32
    return %c0_i32, %c0_i32_0 : i32, i32
  }
}

</mosaic_0001>

<bundles_post_ra>
// kernel: tpu_custom_call.1
= control target key start
LH: loop header
LB: loop body
LE: loop exit
PB: predicated region body
PF: predicated region fallthrough
CT: control target
= control target key end

     0   :  { %11 = vsyncpa [#allocation3], 0  ;;  %s5247_s0 = inlined_call_operand.hbm [shape: f32[32,64], index: 0, kind: input, shape index: {}]   ;;  %s5248_s1 = inlined_call_operand.hbm [shape: f32[32,64], index: 1, kind: input, shape index: {}]   ;;  %s5249_s2 = inlined_call_operand.hbm [shape: bf16[64,192], index: 2, kind: input, shape index: {}]   ;;  %s5250_s3 = inlined_call_operand.hbm [shape: bf16[64,128], index: 3, kind: input, shape index: {}]   ;;  %s5251_s4 = inlined_call_operand.hbm [shape: f32[32,64], index: 4, kind: output, shape index: {0}]   ;;  %s5252_s5 = inlined_call_operand.hbm [shape: f32[16,16], index: 5, kind: output, shape index: {1}]  }
   0x1   :  { %12 = vsyncpa [#allocation6], 0 }
   0x2   :  { %13 = vsyncpa [#allocation9], 0 }
   0x3   :  { %14 = vsyncpa [#allocation4], 0 }
   0x4   :  { %15 = vsyncpa [#allocation12], 0  ;;  %s3832_s18 = smov [#allocation5]   ;;  %s3833_s20 = smov [#allocation2]  }
   0x5   :  { %s33_s19 = sshll.u32 %s3832_s18, 4  ;;  %s21_s21 = sshll.u32 %s3833_s20, 4  ;;  %s34_s19 = int_to_ptr.vmem [resolvable:$true] %s33_s19  ;;  %s3881_s21 = int_to_ptr.vmem [resolvable:$true] %s21_s21 }
   0x6   :  { %s3690_s24 = scalar_lea.hbm %s5248_s1, 512 }
   0x7   :  { %p3691_p0 = scmp.ne.s32.totalorder %s5248_s1, %s3690_s24  ;;  %p3694_p1 = scmp.lt.u32.totalorder %s3690_s24, %s5248_s1 }
   0x9   :  { %p3696_p2 = pnand %p3694_p1, %p3691_p0 }
   0xb   :  { %3699 = shalt.err (!%p3696_p2)
}
   0xc   :  { %s3700_s29 = scalar_lea.vmem %s34_s19, 512  ;;  %p3705_p4 = scmp.lt.s32.totalorder %s34_s19, %s34_s19 }
   0xd   :  { %p3701_p3 = scmp.ne.s32.totalorder %s34_s19, %s3700_s29  ;;  %p3706_p5 = scmp.lt.s32.totalorder %s3700_s29, %s3700_s29 }
   0xf   :  { %p3707_p6 = por %p3706_p5, %p3705_p4 }
  0x11   :  { %p3708_p7 = pnand %p3707_p6, %p3701_p3 }
  0x13   :  { %3711 = shalt.err (!%p3708_p7)
}
  0x14   :  { %s3834_s30 = smov 128   ;;  %s3835_s6 = smov 8  }
  0x15   :  { %39 = dma.hbm_to_vmem [thread:$0]  %s5248_s1, 512, %s34_s19, [#allocation6], %s3834_s30, %s3834_s30, %s3835_s6  }
  0x16   :  { %s3712_s11 = scalar_lea.hbm %s5247_s0, 512 }
  0x17   :  { %p3713_p8 = scmp.ne.s32.totalorder %s5247_s0, %s3712_s11  ;;  %p3716_p9 = scmp.lt.u32.totalorder %s3712_s11, %s5247_s0 }
  0x19   :  { %p3718_p10 = pnand %p3716_p9, %p3713_p8 }
  0x1b   :  { %3721 = shalt.err (!%p3718_p10)
}
  0x1c   :  { %s3722_s16 = scalar_lea.vmem %s3881_s21, 512  ;;  %p3727_p12 = scmp.lt.s32.totalorder %s3881_s21, %s3881_s21 }
  0x1d   :  { %p3723_p11 = scmp.ne.s32.totalorder %s3881_s21, %s3722_s16  ;;  %p3728_p13 = scmp.lt.s32.totalorder %s3722_s16, %s3722_s16 }
  0x1f   :  { %p3729_p0 = por %p3728_p13, %p3727_p12 }
  0x21   :  { %p3730_p1 = pnand %p3729_p0, %p3723_p11 }
  0x23   :  { %3733 = shalt.err (!%p3730_p1)
}
  0x24   :  { %27 = dma.hbm_to_vmem [thread:$0]  %s5247_s0, 512, %s3881_s21, [#allocation3], %s3834_s30, %s3834_s30, %s3835_s6  }
  0x25   :  { %s3836_s18 = smov [#allocation7]   ;;  %s3837_s20 = smov [#allocation8]  }
  0x26   :  { %s45_s19 = sshll.u32 %s3836_s18, 4  ;;  %s57_s22 = sshll.u32 %s3837_s20, 4  ;;  %s46_s19 = int_to_ptr.vmem [resolvable:$true] %s45_s19  ;;  %s3918_s22 = int_to_ptr.vmem [resolvable:$true] %s57_s22 }
  0x27   :  { %s3734_s25 = scalar_lea.hbm %s5249_s2, 1024 }
  0x28   :  { %p3735_p2 = scmp.ne.s32.totalorder %s5249_s2, %s3734_s25  ;;  %p3738_p3 = scmp.lt.u32.totalorder %s3734_s25, %s5249_s2 }
  0x2a   :  { %p3740_p4 = pnand %p3738_p3, %p3735_p2 }
  0x2c   :  { %3743 = shalt.err (!%p3740_p4)
}
  0x2d   :  { %s3744_s0 = scalar_lea.vmem %s46_s19, 1024  ;;  %p3749_p6 = scmp.lt.s32.totalorder %s46_s19, %s46_s19 }
  0x2e   :  { %p3745_p5 = scmp.ne.s32.totalorder %s46_s19, %s3744_s0  ;;  %p3750_p7 = scmp.lt.s32.totalorder %s3744_s0, %s3744_s0 }
  0x30   :  { %p3751_p8 = por %p3750_p7, %p3749_p6 }
  0x32   :  { %p3752_p9 = pnand %p3751_p8, %p3745_p5 }
  0x34   :  { %3755 = shalt.err (!%p3752_p9)
}
  0x35   :  { %51 = dma.hbm_to_vmem [thread:$0]  %s5249_s2, 1024, %s46_s19, [#allocation6], %s3834_s30, %s3834_s30, %s3835_s6  }
  0x36   :  { %s3756_s10 = scalar_lea.hbm %s5250_s3, 512 }
  0x37   :  { %p3757_p10 = scmp.ne.s32.totalorder %s5250_s3, %s3756_s10  ;;  %p3760_p11 = scmp.lt.u32.totalorder %s3756_s10, %s5250_s3 }
  0x39   :  { %p3762_p12 = pnand %p3760_p11, %p3757_p10 }
  0x3b   :  { %3765 = shalt.err (!%p3762_p12)
}
  0x3c   :  { %s3766_s15 = scalar_lea.vmem %s3918_s22, 512  ;;  %p3771_p0 = scmp.lt.s32.totalorder %s3918_s22, %s3918_s22 }
  0x3d   :  { %p3767_p13 = scmp.ne.s32.totalorder %s3918_s22, %s3766_s15  ;;  %p3772_p1 = scmp.lt.s32.totalorder %s3766_s15, %s3766_s15 }
  0x3f   :  { %p3773_p2 = por %p3772_p1, %p3771_p0 }
  0x41   :  { %p3774_p3 = pnand %p3773_p2, %p3767_p13 }
  0x43   :  { %3777 = shalt.err (!%p3774_p3)
}
  0x44   :  { %s3838_s2 = smov 64   ;;  %s3839_s16 = smov 4  }
  0x45   :  { %63 = dma.hbm_to_vmem [thread:$0]  %s5250_s3, 512, %s3918_s22, [#allocation9], %s3838_s2, %s3838_s2, %s3839_s16  }
  0x46   :  { %3822 = dma.done.wait [#allocation3], 512  }
  0x47   :  { %3823 = vsyncadd [#allocation3], 4294966784 }
  0x48   :  { %3824 = dma.done.wait [#allocation6], 1536  }
  0x49   :  { %3825 = vsyncadd [#allocation6], 4294965760 }
  0x4a   :  { %3826 = dma.done.wait [#allocation9], 512  }
  0x4b   :  { %3827 = vsyncadd [#allocation9], 4294966784  ;;  %v3840_v0 = vmov 0   ;;  %v3386_v1 = vld [vmem:[#allocation7 + $0x4] ss:$8 sps:$4 sm:$0xff]   ;;  %v3400_v10 = vld [vmem:[#allocation8 + $0x10] sm:$0xff]  }
  0x4c   :  { %170 = vmatprep.mubr.bf16.mxu0 %v3840_v0  ;;  %v3388_v2 = vld [vmem:[#allocation7] ss:$8 sps:$4 sm:$0xff]   ;;  %138 = vmatprep.subr.bf16.mxu0 %v3386_v1  ;;  %v3389_v3 = vld [vmem:[#allocation7 + $0x14] ss:$8 sps:$4 sm:$0xff]   ;;  %v3391_v4 = vld [vmem:[#allocation7 + $0x10] ss:$8 sps:$4 sm:$0xff]  }
  0x4d   :  { %139 = vmatpush1.bf16.msra.mxu0 %v3388_v2  ;;  %v3392_v5 = vld [vmem:[#allocation8] sm:$0xff]   ;;  %v3396_v7 = vld [vmem:[#allocation8 + $0x8] sm:$0xff]   ;;  %v3397_v9 = vld [vmem:[#allocation7 + $0x34] ss:$8 sps:$4 sm:$0xff]   ;;  %vm131_vm0 = vcmask 523264   ;;  %s3841_s3 = smov 96  }
  0x4e   :  { %140 = vmatprep.subr.bf16.mxu0 %v3389_v3  ;;  %v3393_v6 = vld [vmem:[#allocation7 + $0x24] ss:$8 sps:$4 sm:$0xff]   ;;  %3144 = vmatprep.subr.bf16.mxu1 %v3392_v5  ;;  %v3395_v8 = vld [vmem:[#allocation7 + $0x20] ss:$8 sps:$4 sm:$0xff]   ;;  %v3399_v11 = vld [vmem:[#allocation7 + $0x30] ss:$8 sps:$4 sm:$0xff]  }
  0x4f   :  { %3145 = vmatpush3.bf16.msra.mxu1 %v3392_v5  ;;  %v191_v12 = vld [vmem:[#allocation5] sm:$0xff]  ;;  %v192_v13 = vld [vmem:[#allocation5 + $0x8] sm:$0xff]  ;;  %v3401_v16 = vld [vmem:[#allocation8 + $0x18] sm:$0xff]   ;;  %s3842_s18 = smov 112   ;;  %s3843_s19 = smov 80   ;;  %vm312_vm1 = vcmask 130048  }
  0x50   :  { %3146 = vmatprep.subr.bf16.mxu1 %v3396_v7  ;;  %v77_v14 = vld [vmem:[#allocation2] sm:$0xff]  ;;  %v78_v15 = vld [vmem:[#allocation2 + $0x8] sm:$0xff]  ;;  %v195_v17 = vpack.c.bf16 %v192_v13, %v191_v12  ;;  %v193_v19 = vld [vmem:[#allocation5 + $0x10] sm:$0xff]  ;;  %vm3845_vm2 = vmmov 0   ;;  %s3846_s20 = smov 16   ;;  %s3847_s22 = smov 32  }
  0x51   :  { %141 = vmatpush1.bf16.msra.mxu0 %v3391_v4  ;;  %v81_v18 = vpack.c.bf16 %v78_v15, %v77_v14  ;;  %v194_v20 = vld [vmem:[#allocation5 + $0x18] sm:$0xff]  ;;  %vm4809_vm3 = vmpackc.low %vm312_vm1, %vm312_vm1  ;;  %s3848_s23 = smov 48   ;;  %vm1403_vm6 = vcmask 261120   ;;  %vm1406_vm7 = vcmask 392192   ;;  %s3849_s24 = smov [#allocation11]  }
  0x52   :  { %142 = vmatprep.subr.bf16.mxu0 %v3393_v6  ;;  %3152 = vmatprep.mubr.msk.bf16.mxu1 %vm131_vm0, %v195_v17  ;;  %v196_v21 = vpack.c.bf16 %v194_v20, %v193_v19  ;;  %s3000_s25 = sshll.u32 %s3849_s24, 4  ;;  %s3001_s25 = int_to_ptr.vmem [resolvable:$true] %s3000_s25 }
  0x53   :  { %3147 = vmatpush3.bf16.msra.mxu1 %v3396_v7  ;;  %v79_v7 = vld [vmem:[#allocation2 + $0x10] sm:$0xff]  ;;  %s3778_s26 = scalar_lea.vmem %s3001_s25, 256  ;;  %p3783_p5 = scmp.lt.s32.totalorder %s3001_s25, %s3001_s25 }
  0x54   :  { %3148 = vmatprep.subr.bf16.mxu1 %v3400_v10  ;;  %p3779_p4 = scmp.ne.s32.totalorder %s3001_s25, %s3778_s26  ;;  %p3784_p6 = scmp.lt.s32.totalorder %s3778_s26, %s3778_s26 }
  0x55   :  { %143 = vmatpush1.bf16.msra.mxu0 %v3395_v8  ;;  %v80_v8 = vld [vmem:[#allocation2 + $0x18] sm:$0xff] }
  0x56   :  { %144 = vmatprep.subr.bf16.mxu0 %v3397_v9  ;;  %v82_v9 = vpack.c.bf16 %v80_v8, %v79_v7  ;;  %p3785_p7 = por %p3784_p6, %p3783_p5 }
  0x57   :  { %3149 = vmatpush3.bf16.msra.mxu1 %v3400_v10 }
  0x58   :  { %3150 = vmatprep.subr.bf16.mxu1 %v3401_v16  ;;  %p3786_p8 = pnand %p3785_p7, %p3779_p4 }
  0x59   :  { %145 = vmatpush1.bf16.msra.mxu0 %v3399_v11 }
  0x5b   :  { %3151 = vmatpush3.bf16.msra.mxu1 %v3401_v16 }
  0x5c   :  { %3026 = vmatmul.mubr.msk.bf16.vlgmr.msra.gmra.mrb[0].mxu0 %vm131_vm0, %v81_v18 }
  0x5d   :  { %180 = vmatprep.mubr.bf16.mxu0 %v3840_v0 }
  0x5e   :  { %3153 = vmatmul.mubr.msk.bf16.vlgmr.msra.gmra.mrb[0].mxu1 %vm131_vm0, %v196_v21 }
  0x64   :  { %3027 = vmatmul.mubr.msk.bf16.gmra.mrb[4].mxu0 %vm131_vm0, %v82_v9 }
 0x12f   :  { %v3957_v22 = vpop.f32.mrb[0].mxu0 }
 0x130   :  { %292 = vrot.lane.b32.xlu1 %v3957_v22, %s3841_s3  ;;  %286 = vrot.lane.b32.xlu0 %v3957_v22, %s3842_s18  ;;  %v3963_v23 = vpop.f32.mrb[1].mxu0  ;;  %v304_v31 = vmul.f32 %v3957_v22, %v3957_v22 }
 0x131   :  { %v3965_v24 = vpop.f32.mrb[2].mxu0  ;;  %v3969_v26 = vpop.f32.mrb[0].mxu1 }
 0x132   :  { %v3967_v25 = vpop.f32.mrb[3].mxu0  ;;  %v3971_v27 = vpop.f32.mrb[1].mxu1  ;;  %v305_v33 = vmul.f32 %v3965_v24, %v3965_v24  ;;  %v313_v34 = vsel %vm312_vm1, %v304_v31, 0.0 }
 0x133   :  { %v1197_v28 = vpack.c.bf16 %v3967_v25, %v3963_v23  ;;  %v3979_v29 = vpop.f32.mrb[2].mxu1  ;;  %v465_v32 = vmul.f32 %v3971_v27, %v3971_v27 }
 0x134   :  { %298 = vrot.lane.b32.xlu0 %v3957_v22, %s3843_s19  ;;  %294 = vrot.lane.b32.xlu1 %v3965_v24, %s3841_s3  ;;  %v3981_v30 = vpop.f32.mrb[3].mxu1  ;;  %v316_v35 = vsel %vm312_vm1, %v305_v33, 0.0 }
 0x135   :  { %v466_v36 = vmul.f32 %v3981_v30, %v3981_v30  ;;  %v473_v38 = vsel %vm312_vm1, %v465_v32, 0.0 }
 0x137   :  { %v476_v37 = vsel %vm312_vm1, %v466_v36, 0.0 }
 0x138   :  { %447 = vrot.lane.b32.xlu0 %v3971_v27, %s3842_s18  ;;  %300 = vrot.lane.b32.xlu1 %v3965_v24, %s3843_s19 }
 0x13c   :  { %453 = vrot.lane.b32.xlu0 %v3971_v27, %s3841_s3  ;;  %449 = vrot.lane.b32.xlu1 %v3981_v30, %s3842_s18 }
 0x140   :  { %459 = vrot.lane.b32.xlu0 %v3971_v27, %s3843_s19  ;;  %455 = vrot.lane.b32.xlu1 %v3981_v30, %s3841_s3 }
 0x144   :  { %461 = vrot.lane.b32.xlu1 %v3981_v30, %s3843_s19  ;;  %288 = vrot.lane.b32.xlu0 %v3965_v24, %s3842_s18 }
 0x148   :  { %361 = vrot.lane.b32.xlu0 %v304_v31, %s3838_s2 }
 0x14c   :  { %521 = vrot.lane.b32.xlu0 %v465_v32, %s3838_s2 }
 0x168   :  { %314 = vadd.xlane.f32.xlu1 %v313_v34 }
 0x16b   :  { %317 = vadd.xlane.f32.xlu0 %v316_v35 }
 0x16f   :  { %477 = vadd.xlane.f32.xlu0 %v476_v37 }
 0x179   :  { %363 = vrot.lane.b32.xlu1 %v305_v33, %s3838_s2 }
 0x19d   :  { %474 = vadd.xlane.f32.xlu1 %v473_v38 }
 0x1a2   :  { %v4014_v39 = vpop.permute.xlu0 %286  ;;  %v4018_v41 = vpop.permute.xlu1 %292 }
 0x1a3   :  { %v306_v40 = vmul.f32 %v4014_v39, %v4014_v39  ;;  %v308_v43 = vmul.f32 %v4018_v41, %v4018_v41 }
 0x1a5   :  { %365 = vrot.lane.b32.xlu0 %v306_v40, %s3838_s2  ;;  %v319_v52 = vsel %vm312_vm1, %v306_v40, 0.0  ;;  %v325_v54 = vsel %vm312_vm1, %v308_v43, 0.0 }
 0x1a6   :  { %v4021_v42 = vpop.permute.xlu0 %298  ;;  %v4055_v55 = vpop.permute.xlu1 %294 }
 0x1a7   :  { %v310_v45 = vmul.f32 %v4021_v42, %v4021_v42  ;;  %v309_v60 = vmul.f32 %v4055_v55, %v4055_v55 }
 0x1a9   :  { %369 = vrot.lane.b32.xlu0 %v308_v43, %s3838_s2  ;;  %v331_v58 = vsel %vm312_vm1, %v310_v45, 0.0  ;;  %v328_v62 = vsel %vm312_vm1, %v309_v60, 0.0 }
 0x1aa   :  { %v4026_v44 = vpop.permute.xlu0 %447  ;;  %v4064_v61 = vpop.permute.xlu1 %300 }
 0x1ab   :  { %v467_v47 = vmul.f32 %v4026_v44, %v4026_v44  ;;  %v311_v63 = vmul.f32 %v4064_v61, %v4064_v61 }
 0x1ad   :  { %373 = vrot.lane.b32.xlu0 %v310_v45, %s3838_s2  ;;  %v334_v0 = vsel %vm312_vm1, %v311_v63, 0.0  ;;  %v479_v16 = vsel %vm312_vm1, %v467_v47, 0.0 }
 0x1ae   :  { %v4031_v46 = vpop.permute.xlu0 %453  ;;  %523 = vrot.lane.b32.xlu1 %v466_v36, %s3838_s2  ;;  %v4070_v1 = vpop.permute.xlu1 %449 }
 0x1af   :  { %v4039_v48 = vmul.f32 %v4031_v46, %v4031_v46  ;;  %v468_v20 = vmul.f32 %v4070_v1, %v4070_v1 }
 0x1b1   :  { %525 = vrot.lane.b32.xlu0 %v467_v47, %s3838_s2  ;;  %v482_v35 = vsel %vm312_vm1, %v468_v20, 0.0 }
 0x1b2   :  { %v4041_v49 = vpop.permute.xlu0 %459  ;;  %v4072_v2 = vpop.permute.xlu1 %455 }
 0x1b3   :  { %v4047_v50 = vmul.f32 %v4041_v49, %v4041_v49  ;;  %v470_v31 = vmul.f32 %v4072_v2, %v4072_v2 }
 0x1b5   :  { %529 = vrot.lane.b32.xlu0 %v4039_v48, %s3838_s2  ;;  %v488_v40 = vsel %vm312_vm1, %v470_v31, 0.0 }
 0x1b6   :  { %v4051_v51 = vpop.permute.xlu0 %288  ;;  %v4076_v3 = vpop.permute.xlu1 %461 }
 0x1b7   :  { %v307_v57 = vmul.f32 %v4051_v51, %v4051_v51  ;;  %v4099_v33 = vmul.f32 %v4076_v3, %v4076_v3 }
 0x1b9   :  { %533 = vrot.lane.b32.xlu0 %v4047_v50, %s3838_s2  ;;  %v322_v59 = vsel %vm312_vm1, %v307_v57, 0.0 }
 0x1ba   :  { %v362_v53 = vpop.permute.xlu0 %361 }
 0x1bb   :  { %v385_v56 = vsel %vm312_vm1, %v362_v53, 0.0  ;;  %v485_v53 = vsel %vm312_vm1, %v4039_v48, 0.0 }
 0x1be   :  { %v522_v4 = vpop.permute.xlu0 %521 }
 0x1bf   :  { %v545_v15 = vsel %vm312_vm1, %v522_v4, 0.0 }
 0x1d2   :  { %320 = vadd.xlane.f32.xlu1 %v319_v52 }
 0x1d6   :  { %326 = vadd.xlane.f32.xlu1 %v325_v54 }
 0x1d8   :  { %386 = vadd.xlane.f32.xlu0 %v385_v56 }
 0x1da   :  { %332 = vadd.xlane.f32.xlu1 %v331_v58 }
 0x1dc   :  { %323 = vadd.xlane.f32.xlu0 %v322_v59 }
 0x1e0   :  { %329 = vadd.xlane.f32.xlu0 %v328_v62 }
 0x1e4   :  { %335 = vadd.xlane.f32.xlu0 %v334_v0 }
 0x1eb   :  { %367 = vrot.lane.b32.xlu1 %v307_v57, %s3838_s2 }
 0x1ef   :  { %371 = vrot.lane.b32.xlu1 %v309_v60, %s3838_s2 }
 0x1f3   :  { %375 = vrot.lane.b32.xlu1 %v311_v63, %s3838_s2 }
 0x1f5   :  { %v315_v5 = vpop.xlane.xlu1 %314 }
 0x1f6   :  { %3402 = vrsqrt.f32 %v315_v5 }
 0x1f8   :  { %v318_v6 = vpop.xlane.xlu0 %317 }
 0x1f9   :  { %3404 = vrsqrt.f32 %v318_v6  ;;  %v364_v17 = vpop.permute.xlu1 %363 }
 0x1fa   :  { %v388_v56 = vsel %vm312_vm1, %v364_v17, 0.0 }
 0x1fc   :  { %v478_v18 = vpop.xlane.xlu0 %477 }
 0x1fd   :  { %3406 = vrsqrt.f32 %v478_v18 }
 0x200   :  { %v3403_v10 = vpop.eup %3402 }
 0x201   :  { %v4081_v12 = vmul.f32 %v3403_v10, %v3957_v22 }
 0x203   :  { %v3405_v11 = vpop.eup %3404 }
 0x204   :  { %v4084_v13 = vmul.f32 %v3405_v11, %v3965_v24 }
 0x206   :  { %v585_v14 = vpack.c.bf16 %v4084_v13, %v4081_v12 }
 0x207   :  { %v3407_v34 = vpop.eup %3406 }
 0x208   :  { %v4105_v37 = vmul.f32 %v3407_v34, %v3981_v30 }
 0x217   :  { %546 = vadd.xlane.f32.xlu1 %v545_v15  ;;  %v366_v43 = vpop.permute.xlu0 %365 }
 0x218   :  { %v391_v47 = vsel %vm312_vm1, %v366_v43, 0.0 }
 0x21b   :  { %480 = vadd.xlane.f32.xlu1 %v479_v16  ;;  %v370_v52 = vpop.permute.xlu0 %369 }
 0x21c   :  { %v397_v58 = vsel %vm312_vm1, %v370_v52, 0.0 }
 0x21f   :  { %v374_v54 = vpop.permute.xlu0 %373 }
 0x220   :  { %v403_v62 = vsel %vm312_vm1, %v374_v54, 0.0 }
 0x223   :  { %v526_v59 = vpop.permute.xlu0 %525 }
 0x224   :  { %v551_v48 = vsel %vm312_vm1, %v526_v59, 0.0 }
 0x227   :  { %v530_v63 = vpop.permute.xlu0 %529 }
 0x228   :  { %v557_v5 = vsel %vm312_vm1, %v530_v63, 0.0 }
 0x22a   :  { %v475_v19 = vpop.xlane.xlu1 %474 }
 0x22b   :  { %3408 = vrsqrt.f32 %v475_v19  ;;  %v534_v6 = vpop.permute.xlu0 %533 }
 0x22c   :  { %527 = vrot.lane.b32.xlu1 %v468_v20, %s3838_s2  ;;  %v563_v9 = vsel %vm312_vm1, %v534_v6, 0.0 }
 0x22e   :  { %v524_v21 = vpop.permute.xlu1 %523 }
 0x22f   :  { %v548_v32 = vsel %vm312_vm1, %v524_v21, 0.0 }
 0x230   :  { %531 = vrot.lane.b32.xlu1 %v470_v31, %s3838_s2  ;;  %549 = vadd.xlane.f32.xlu0 %v548_v32 }
 0x234   :  { %535 = vrot.lane.b32.xlu1 %v4099_v33, %s3838_s2  ;;  %483 = vadd.xlane.f32.xlu0 %v482_v35 }
 0x235   :  { %v3409_v36 = vpop.eup %3408 }
 0x236   :  { %v4108_v38 = vmul.f32 %v3409_v36, %v3971_v27 }
 0x238   :  { %489 = vadd.xlane.f32.xlu0 %v488_v40  ;;  %v793_v45 = vpack.c.bf16 %v4105_v37, %v4108_v38 }
 0x23c   :  { %392 = vadd.xlane.f32.xlu0 %v391_v47 }
 0x258   :  { %486 = vadd.xlane.f32.xlu1 %v485_v53 }
 0x25c   :  { %389 = vadd.xlane.f32.xlu1 %v388_v56 }
 0x25f   :  { %v4117_v57 = vpop.xlane.xlu1 %320 }
 0x260   :  { %398 = vadd.xlane.f32.xlu1 %v397_v58  ;;  %v4144_v58 = vpop.f32.mrb[4].mxu0 }
 0x261   :  { %v4146_v59 = vpop.f32.mrb[5].mxu0 }
 0x262   :  { %5276 = vst [vmem:[#allocation18_spill] sm:$0xff] %v4146_v59 }
 0x263   :  { %v4120_v60 = vpop.xlane.xlu1 %326 }
 0x264   :  { %404 = vadd.xlane.f32.xlu1 %v403_v62  ;;  %v4148_v62 = vpop.f32.mrb[6].mxu0 }
 0x265   :  { %v387_v17 = vpop.xlane.xlu0 %386 }
 0x267   :  { %v4123_v0 = vpop.xlane.xlu1 %332 }
 0x268   :  { %552 = vadd.xlane.f32.xlu1 %v551_v48 }
 0x269   :  { %v4133_v20 = vpop.xlane.xlu0 %323 }
 0x26b   :  { %v368_v4 = vpop.permute.xlu1 %367 }
 0x26c   :  { %558 = vadd.xlane.f32.xlu1 %v557_v5  ;;  %v394_v7 = vsel %vm312_vm1, %v368_v4, 0.0  ;;  %v5253_v5 = vmov 0.0  }
 0x26d   :  { %395 = vadd.xlane.f32.xlu0 %v394_v7  ;;  %v4137_v34 = vpop.xlane.xlu0 %329  ;;  %3156 = vmatprep.subr.bf16.mxu1 %v5253_v5 }
 0x26e   :  { %3162 = vmatprep.subr.bf16.mxu0 %v5253_v5  ;;  %3158 = vmatprep.mubr.msk.bf16.mxu1 %vm3845_vm2, %v5253_v5 }
 0x26f   :  { %v372_v8 = vpop.permute.xlu1 %371  ;;  %3164 = vmatprep.mubr.msk.bf16.mxu0 %vm3845_vm2, %v5253_v5 }
 0x270   :  { %564 = vadd.xlane.f32.xlu1 %v563_v9  ;;  %v400_v10 = vsel %vm312_vm1, %v372_v8, 0.0 }
 0x271   :  { %401 = vadd.xlane.f32.xlu0 %v400_v10  ;;  %v4140_v40 = vpop.xlane.xlu0 %335 }
 0x273   :  { %v376_v11 = vpop.permute.xlu1 %375 }
 0x274   :  { %v406_v15 = vsel %vm312_vm1, %v376_v11, 0.0 }
 0x275   :  { %407 = vadd.xlane.f32.xlu0 %v406_v15 }
 0x2a4   :  { %v547_v16 = vpop.xlane.xlu1 %546 }
 0x2a5   :  { %3410 = vrsqrt.f32 %v547_v16 }
 0x2a8   :  { %v4131_v18 = vpop.xlane.xlu1 %480 }
 0x2ac   :  { %v528_v19 = vpop.permute.xlu1 %527 }
 0x2ad   :  { %v554_v21 = vsel %vm312_vm1, %v528_v19, 0.0 }
 0x2ae   :  { %555 = vadd.xlane.f32.xlu0 %v554_v21 }
 0x2af   :  { %v3411_v47 = vpop.eup %3410 }
 0x2b0   :  { %v532_v31 = vpop.permute.xlu1 %531  ;;  %v577_v53 = vmul.f32 %v3411_v47, %v3971_v27  ;;  %v4156_v27 = vpop.f32.mrb[7].mxu0 }
 0x2b1   :  { %v560_v32 = vsel %vm312_vm1, %v532_v31, 0.0  ;;  %5277 = vst [vmem:[#allocation19_spill] sm:$0xff] %v4156_v27 }
 0x2b2   :  { %561 = vadd.xlane.f32.xlu0 %v560_v32 }
 0x2b4   :  { %v536_v35 = vpop.permute.xlu1 %535 }
 0x2b5   :  { %v566_v36 = vsel %vm312_vm1, %v536_v35, 0.0 }
 0x2b6   :  { %567 = vadd.xlane.f32.xlu0 %v566_v36 }
 0x2bd   :  { %v550_v43 = vpop.xlane.xlu0 %549 }
 0x2be   :  { %3412 = vrsqrt.f32 %v550_v43 }
 0x2bf   :  { %3414 = vrsqrt.f32 %v387_v17 }
 0x2c1   :  { %v4152_v4 = vpop.xlane.xlu0 %483 }
 0x2c5   :  { %v4168_v7 = vpop.xlane.xlu0 %489 }
 0x2c8   :  { %v3413_v52 = vpop.eup %3412 }
 0x2c9   :  { %v578_v54 = vmul.f32 %v3413_v52, %v3981_v30  ;;  %v4160_v30 = vpack.i.bf16 %v4156_v27, %v4146_v59  ;;  %v3415_v8 = vpop.eup %3414  ;;  %v393_v15 = vpop.xlane.xlu0 %392  ;;  %v494_v52 = vsel %vm312_vm1, %v4099_v33, 0.0 }
 0x2ca   :  { %v417_v10 = vmul.f32 %v3415_v8, %v3957_v22 }
 0x2cb   :  { %v797_v56 = vpack.c.bf16 %v578_v54, %v577_v53  ;;  %5278 = vst [vmem:[#allocation20_spill] sm:$0xff] %v4160_v30 }
 0x2e5   :  { %v4150_v63 = vpop.xlane.xlu1 %486 }
 0x2e9   :  { %v390_v48 = vpop.xlane.xlu1 %389 }
 0x2ea   :  { %3416 = vrsqrt.f32 %v390_v48 }
 0x2eb   :  { %3418 = vrsqrt.f32 %v393_v15 }
 0x2ed   :  { %v399_v22 = vpop.xlane.xlu1 %398 }
 0x2f1   :  { %v405_v8 = vpop.xlane.xlu1 %404 }
 0x2f4   :  { %v3417_v9 = vpop.eup %3416 }
 0x2f5   :  { %v418_v11 = vmul.f32 %v3417_v9, %v3965_v24  ;;  %v3419_v19 = vpop.eup %3418  ;;  %v491_v24 = vsel %vm312_vm1, %v4047_v50, 0.0  ;;  %v553_v50 = vpop.xlane.xlu1 %552 }
 0x2f6   :  { %v419_v31 = vmul.f32 %v3419_v19, %v4014_v39 }
 0x2f7   :  { %v589_v16 = vpack.c.bf16 %v418_v11, %v417_v10 }
 0x2f9   :  { %594 = vrot.lane.b32.xlu1 %v589_v16, %s3838_s2  ;;  %v559_v15 = vpop.xlane.xlu1 %558 }
 0x2fa   :  { %v396_v17 = vpop.xlane.xlu0 %395 }
 0x2fb   :  { %3420 = vrsqrt.f32 %v396_v17 }
 0x2fe   :  { %v402_v36 = vpop.xlane.xlu0 %401 }
 0x2ff   :  { %3422 = vrsqrt.f32 %v402_v36 }
 0x300   :  { %3424 = vrsqrt.f32 %v399_v22 }
 0x302   :  { %v408_v54 = vpop.xlane.xlu0 %407 }
 0x303   :  { %3426 = vrsqrt.f32 %v408_v54 }
 0x304   :  { %3428 = vrsqrt.f32 %v405_v8 }
 0x305   :  { %v3421_v21 = vpop.eup %3420  ;;  %3430 = vrsqrt.f32 %v553_v50 }
 0x306   :  { %v420_v32 = vmul.f32 %v3421_v21, %v4051_v51  ;;  %v565_v21 = vpop.xlane.xlu1 %564 }
 0x308   :  { %v590_v35 = vpack.c.bf16 %v420_v32, %v419_v31 }
 0x309   :  { %v3423_v43 = vpop.eup %3422 }
 0x30a   :  { %644 = vrot.lane.b32.xlu0 %v590_v35, %s3838_s2  ;;  %v3425_v47 = vpop.eup %3424  ;;  %v422_v53 = vmul.f32 %v3423_v43, %v4055_v55 }
 0x30b   :  { %v421_v48 = vmul.f32 %v3425_v47, %v4018_v41 }
 0x30d   :  { %v591_v9 = vpack.c.bf16 %v422_v53, %v421_v48  ;;  %v3427_v10 = vpop.eup %3426 }
 0x30e   :  { %v3429_v11 = vpop.eup %3428  ;;  %v424_v33 = vmul.f32 %v3427_v10, %v4064_v61 }
 0x30f   :  { %v423_v17 = vmul.f32 %v3429_v11, %v4021_v42  ;;  %v3431_v32 = vpop.eup %3430  ;;  %v4220_v11 = vmul.f32 %v4144_v58, %v4144_v58 }
 0x310   :  { %v579_v36 = vmul.f32 %v3431_v32, %v4026_v44 }
 0x311   :  { %v592_v19 = vpack.c.bf16 %v424_v33, %v423_v17  ;;  %v4228_v33 = vmul.f32 %v4148_v62, %v4148_v62  ;;  %v1885_v30 = vsel %vm312_vm1, %v4220_v11, 0.0 }
 0x31d   :  { %492 = vadd.xlane.f32.xlu1 %v491_v24 }
 0x329   :  { %495 = vadd.xlane.f32.xlu0 %v494_v52 }
 0x32e   :  { %694 = vrot.lane.b32.xlu1 %v591_v9, %s3838_s2 }
 0x332   :  { %802 = vrot.lane.b32.xlu1 %v797_v56, %s3838_s2 }
 0x33b   :  { %v556_v16 = vpop.xlane.xlu0 %555 }
 0x33c   :  { %3432 = vrsqrt.f32 %v556_v16 }
 0x33d   :  { %3434 = vrsqrt.f32 %v559_v15 }
 0x33f   :  { %744 = vrot.lane.b32.xlu0 %v592_v19, %s3838_s2  ;;  %v562_v31 = vpop.xlane.xlu0 %561 }
 0x340   :  { %3436 = vrsqrt.f32 %v562_v31 }
 0x341   :  { %3438 = vrsqrt.f32 %v565_v21 }
 0x343   :  { %v568_v56 = vpop.xlane.xlu0 %567 }
 0x344   :  { %3440 = vrsqrt.f32 %v568_v56 }
 0x345   :  { %3442 = vrsqrt.f32 %v4133_v20 }
 0x346   :  { %v3433_v35 = vpop.eup %3432  ;;  %3444 = vrsqrt.f32 %v4117_v57 }
 0x347   :  { %v580_v22 = vmul.f32 %v3433_v35, %v4070_v1  ;;  %v3435_v24 = vpop.eup %3434  ;;  %3446 = vrsqrt.f32 %v4137_v34 }
 0x348   :  { %v581_v52 = vmul.f32 %v3435_v24, %v4031_v46  ;;  %3448 = vrsqrt.f32 %v4120_v60 }
 0x349   :  { %v798_v43 = vpack.c.bf16 %v580_v22, %v579_v36  ;;  %3450 = vrsqrt.f32 %v4140_v40 }
 0x34a   :  { %v3437_v47 = vpop.eup %3436  ;;  %3452 = vrsqrt.f32 %v4123_v0 }
 0x34b   :  { %852 = vrot.lane.b32.xlu1 %v798_v43, %s3838_s2  ;;  %v582_v53 = vmul.f32 %v3437_v47, %v4072_v2  ;;  %v3439_v54 = vpop.eup %3438  ;;  %3454 = vrsqrt.f32 %v4150_v63 }
 0x34c   :  { %v583_v9 = vmul.f32 %v3439_v54, %v4041_v49  ;;  %3456 = vrsqrt.f32 %v4152_v4 }
 0x34d   :  { %v799_v48 = vpack.c.bf16 %v582_v53, %v581_v52  ;;  %3458 = vrsqrt.f32 %v4168_v7 }
 0x34e   :  { %v3441_v8 = vpop.eup %3440  ;;  %3460 = vrsqrt.f32 %v4131_v18 }
 0x34f   :  { %902 = vrot.lane.b32.xlu0 %v799_v48, %s3838_s2  ;;  %v584_v50 = vmul.f32 %v3441_v8, %v4076_v3  ;;  %v3443_v17 = vpop.eup %3442 }
 0x350   :  { %v3445_v31 = vpop.eup %3444  ;;  %v348_v56 = vmul.f32 %v3443_v17, %v4051_v51 }
 0x351   :  { %v800_v10 = vpack.c.bf16 %v584_v50, %v583_v9  ;;  %v347_v57 = vmul.f32 %v3445_v31, %v4014_v39  ;;  %v3447_v13 = vpop.eup %3446 }
 0x352   :  { %v3449_v51 = vpop.eup %3448  ;;  %v350_v39 = vmul.f32 %v3447_v13, %v4055_v55  ;;  %v4347_v13 = vmul.f32 %v3979_v29, %v3979_v29 }
 0x353   :  { %952 = vrot.lane.b32.xlu1 %v800_v10, %s3838_s2  ;;  %1859 = vrot.lane.b32.xlu0 %v4144_v58, %s3842_s18  ;;  %v586_v20 = vpack.c.bf16 %v348_v56, %v347_v57  ;;  %v349_v35 = vmul.f32 %v3449_v51, %v4018_v41  ;;  %v3451_v41 = vpop.eup %3450  ;;  %v4368_v51 = vmul.f32 %v3969_v26, %v3969_v26 }
 0x354   :  { %v3453_v40 = vpop.eup %3452  ;;  %v352_v63 = vmul.f32 %v3451_v41, %v4064_v61 }
 0x355   :  { %v587_v36 = vpack.c.bf16 %v350_v39, %v349_v35  ;;  %v351_v4 = vmul.f32 %v3453_v40, %v4021_v42  ;;  %v3455_v18 = vpop.eup %3454 }
 0x356   :  { %v3457_v47 = vpop.eup %3456  ;;  %v509_v38 = vmul.f32 %v3455_v18, %v4031_v46 }
 0x357   :  { %1865 = vrot.lane.b32.xlu0 %v4144_v58, %s3841_s3  ;;  %1861 = vrot.lane.b32.xlu1 %v4148_v62, %s3842_s18  ;;  %v588_v43 = vpack.c.bf16 %v352_v63, %v351_v4  ;;  %v3459_v52 = vpop.eup %3458 }
 0x358   :  { %v3461_v37 = vpop.eup %3460  ;;  %v510_v48 = vmul.f32 %v3459_v52, %v4072_v2 }
 0x359   :  { %v507_v46 = vmul.f32 %v3461_v37, %v4026_v44 }
 0x35a   :  { %v795_v9 = vpack.c.bf16 %v510_v48, %v509_v38 }
 0x35b   :  { %1871 = vrot.lane.b32.xlu0 %v4144_v58, %s3843_s19  ;;  %1867 = vrot.lane.b32.xlu1 %v4148_v62, %s3841_s3 }
 0x35f   :  { %2019 = vrot.lane.b32.xlu0 %v3969_v26, %s3842_s18  ;;  %1873 = vrot.lane.b32.xlu1 %v4148_v62, %s3843_s19 }
 0x363   :  { %2025 = vrot.lane.b32.xlu0 %v3969_v26, %s3841_s3  ;;  %2021 = vrot.lane.b32.xlu1 %v3979_v29, %s3842_s18 }
 0x367   :  { %2031 = vrot.lane.b32.xlu0 %v3969_v26, %s3843_s19  ;;  %2027 = vrot.lane.b32.xlu1 %v3979_v29, %s3841_s3 }
 0x36b   :  { %v595_v15 = vpop.permute.xlu1 %594  ;;  %2033 = vrot.lane.b32.xlu1 %v3979_v29, %s3843_s19  ;;  %1933 = vrot.lane.b32.xlu0 %v4220_v11, %s3838_s2 }
 0x36c   :  { %v600_v16 = vsel %vm312_vm1, %v595_v15, 0 }
 0x36d   :  { %3157 = vmatpush3.bf16.xpose.msra.mxu1 %v600_v16 }
 0x36e   :  { %3168 = vmatprep.subr.bf16.mxu1 %v5253_v5 }
 0x36f   :  { %1935 = vrot.lane.b32.xlu1 %v4228_v33, %s3838_s2 }
 0x374   :  { %3159 = vmatmul.mubr.msk.bf16.vlgmr.msra.gmra.mrb[4].mxu1 %vm312_vm1, %v585_v14 }
 0x375   :  { %3170 = vmatprep.mubr.msk.bf16.mxu1 %vm3845_vm2, %v5253_v5 }
 0x37c   :  { %v645_v19 = vpop.permute.xlu0 %644 }
 0x37d   :  { %v650_v21 = vsel %vm312_vm1, %v645_v19, 0 }
 0x37e   :  { %3163 = vmatpush3.bf16.xpose.msra.mxu0 %v650_v21 }
 0x37f   :  { %3174 = vmatprep.subr.bf16.mxu0 %v5253_v5 }
 0x385   :  { %3165 = vmatmul.mubr.msk.bf16.vlgmr.msra.gmra.mrb[8].mxu0 %vm312_vm1, %v586_v20 }
 0x386   :  { %3176 = vmatprep.mubr.msk.bf16.mxu0 %vm3845_vm2, %v5253_v5 }
 0x3aa   :  { %v493_v12 = vpop.xlane.xlu1 %492 }
 0x3ae   :  { %v695_v14 = vpop.permute.xlu1 %694 }
 0x3af   :  { %v700_v32 = vsel %vm312_vm1, %v695_v14, 0 }
 0x3b0   :  { %3169 = vmatpush3.bf16.xpose.msra.mxu1 %v700_v32 }
 0x3b1   :  { %3180 = vmatprep.subr.bf16.mxu1 %v5253_v5 }
 0x3b2   :  { %v803_v34 = vpop.permute.xlu1 %802 }
 0x3b3   :  { %v808_v22 = vsel %vm312_vm1, %v803_v34, 0 }
 0x3b6   :  { %v496_v60 = vpop.xlane.xlu0 %495 }
 0x3b7   :  { %3171 = vmatmul.mubr.msk.bf16.vlgmr.msra.gmra.mrb[8].mxu1 %vm312_vm1, %v587_v36  ;;  %3462 = vrsqrt.f32 %v496_v60 }
 0x3b8   :  { %3181 = vmatpush3.bf16.xpose.msra.mxu1 %v808_v22  ;;  %3182 = vmatprep.mubr.msk.bf16.mxu1 %vm3845_vm2, %v5253_v5  ;;  %3464 = vrsqrt.f32 %v493_v12 }
 0x3b9   :  { %3192 = vmatprep.subr.bf16.mxu1 %v5253_v5 }
 0x3ba   :  { %v745_v55 = vpop.permute.xlu0 %744 }
 0x3bb   :  { %v750_v0 = vsel %vm312_vm1, %v745_v55, 0 }
 0x3bc   :  { %3175 = vmatpush3.bf16.xpose.msra.mxu0 %v750_v0 }
 0x3bd   :  { %3186 = vmatprep.subr.bf16.mxu0 %v5253_v5  ;;  %v853_v7 = vpop.permute.xlu1 %852 }
 0x3be   :  { %v858_v42 = vsel %vm312_vm1, %v853_v7, 0 }
 0x3bf   :  { %3183 = vmatmul.mubr.msk.bf16.vlgmr.msra.gmra.mrb[12].mxu1 %vm312_vm1, %v793_v45  ;;  %v508_v45 = vmul.f32 %v3457_v47, %v4070_v1 }
 0x3c0   :  { %3194 = vmatprep.mubr.msk.bf16.mxu1 %vm3845_vm2, %v5253_v5 }
 0x3c1   :  { %v903_v24 = vpop.permute.xlu0 %902  ;;  %v794_v10 = vpack.c.bf16 %v508_v45, %v507_v46  ;;  %v3463_v15 = vpop.eup %3462 }
 0x3c2   :  { %v908_v61 = vsel %vm312_vm1, %v903_v24, 0  ;;  %v3465_v17 = vpop.eup %3464  ;;  %v512_v19 = vmul.f32 %v3463_v15, %v4076_v3 }
 0x3c3   :  { %3177 = vmatmul.mubr.msk.bf16.vlgmr.msra.gmra.mrb[12].mxu0 %vm312_vm1, %v588_v43  ;;  %3193 = vmatpush3.bf16.xpose.msra.mxu1 %v908_v61  ;;  %v511_v3 = vmul.f32 %v3465_v17, %v4041_v49 }
 0x3c4   :  { %3187 = vmatpush3.bf16.xpose.msra.mxu0 %v858_v42  ;;  %3188 = vmatprep.mubr.msk.bf16.mxu0 %vm3845_vm2, %v5253_v5 }
 0x3c5   :  { %v953_v53 = vpop.permute.xlu1 %952  ;;  %v4283_v54 = vpop.permute.xlu0 %1859  ;;  %3204 = vmatprep.subr.bf16.mxu1 %v5253_v5  ;;  %3198 = vmatprep.subr.bf16.mxu0 %v5253_v5  ;;  %v796_v12 = vpack.c.bf16 %v512_v19, %v511_v3 }
 0x3c6   :  { %v4290_v8 = vmul.f32 %v4283_v54, %v4283_v54  ;;  %v958_v44 = vsel %vm312_vm1, %v953_v53, 0 }
 0x3c8   :  { %1937 = vrot.lane.b32.xlu1 %v4290_v8, %s3838_s2 }
 0x3c9   :  { %v4295_v1 = vpop.permute.xlu0 %1865  ;;  %v4297_v50 = vpop.permute.xlu1 %1861 }
 0x3ca   :  { %3195 = vmatmul.mubr.msk.bf16.vlgmr.msra.gmra.mrb[16].mxu1 %vm312_vm1, %v795_v9  ;;  %v4302_v2 = vmul.f32 %v4297_v50, %v4297_v50  ;;  %v4306_v16 = vmul.f32 %v4295_v1, %v4295_v1 }
 0x3cb   :  { %3189 = vmatmul.mubr.msk.bf16.vlgmr.msra.gmra.mrb[16].mxu0 %vm312_vm1, %v794_v10  ;;  %3205 = vmatpush3.bf16.msra.mxu1 %v1197_v28 }
 0x3cc   :  { %3199 = vmatpush3.bf16.xpose.msra.mxu0 %v958_v44  ;;  %1939 = vrot.lane.b32.xlu0 %v4302_v2, %s3838_s2 }
 0x3cd   :  { %1941 = vrot.lane.b32.xlu1 %v4306_v16, %s3838_s2  ;;  %v4318_v21 = vpop.permute.xlu0 %1871  ;;  %v4320_v31 = vpop.permute.xlu1 %1867  ;;  %3200 = vmatprep.mubr.msk.bf16.mxu0 %vm3845_vm2, %v5253_v5 }
 0x3ce   :  { %v4326_v28 = vmul.f32 %v4320_v31, %v4320_v31  ;;  %v4330_v56 = vmul.f32 %v4318_v21, %v4318_v21  ;;  %3210 = vmatprep.subr.bf16.mxu0 %v5253_v5  ;;  %3206 = vmatprep.mubr.msk.bf16.mxu1 %vm3845_vm2, %v5253_v5 }
 0x3cf   :  { %3216 = vmatprep.subr.bf16.mxu1 %v5253_v5 }
 0x3d0   :  { %1943 = vrot.lane.b32.xlu0 %v4326_v28, %s3838_s2 }
 0x3d1   :  { %1945 = vrot.lane.b32.xlu1 %v4330_v56, %s3838_s2  ;;  %v4341_v57 = vpop.permute.xlu0 %2019  ;;  %v4343_v20 = vpop.permute.xlu1 %1873 }
 0x3d2   :  { %v4351_v49 = vmul.f32 %v4343_v20, %v4343_v20  ;;  %v4384_v36 = vmul.f32 %v4341_v57, %v4341_v57 }
 0x3d3   :  { %3201 = vmatmul.mubr.msk.bf16.vlgmr.msra.gmra.mrb[20].mxu0 %vm312_vm1, %v796_v12 }
 0x3d4   :  { %2095 = vrot.lane.b32.xlu0 %v4347_v13, %s3838_s2  ;;  %3212 = vmatprep.mubr.msk.bf16.mxu0 %vm3845_vm2, %v5253_v5 }
 0x3d5   :  { %1947 = vrot.lane.b32.xlu1 %v4351_v49, %s3838_s2  ;;  %v4360_v14 = vpop.permute.xlu0 %2025  ;;  %v4370_v39 = vpop.permute.xlu1 %2021 }
 0x3d6   :  { %5279 = vst [vmem:[#allocation21_spill] sm:$0xff] %v4360_v14  ;;  %v4364_v32 = vmul.f32 %v4360_v14, %v4360_v14  ;;  %v4394_v22 = vmul.f32 %v4370_v39, %v4370_v39 }
 0x3d8   :  { %2101 = vrot.lane.b32.xlu0 %v4364_v32, %s3838_s2 }
 0x3d9   :  { %2093 = vrot.lane.b32.xlu1 %v4368_v51, %s3838_s2  ;;  %v4376_v35 = vpop.permute.xlu0 %2031  ;;  %v4390_v60 = vpop.permute.xlu1 %2027 }
 0x3da   :  { %5280 = vst [vmem:[#allocation22_spill] sm:$0xff] %v4376_v35  ;;  %v4380_v34 = vmul.f32 %v4376_v35, %v4376_v35  ;;  %5281 = vst [vmem:[#allocation23_spill] sm:$0xff] %v4390_v60  ;;  %v4402_v41 = vmul.f32 %v4390_v60, %v4390_v60 }
 0x3dc   :  { %2105 = vrot.lane.b32.xlu0 %v4380_v34, %s3838_s2 }
 0x3dd   :  { %2097 = vrot.lane.b32.xlu1 %v4384_v36, %s3838_s2  ;;  %v4404_v55 = vpop.permute.xlu1 %2033  ;;  %v1934_v40 = vpop.permute.xlu0 %1933 }
 0x3de   :  { %v4412_v0 = vmul.f32 %v4404_v55, %v4404_v55  ;;  %v1957_v63 = vsel %vm312_vm1, %v1934_v40, 0.0 }
 0x3e0   :  { %427 = vrot.lane.b32.xlu0 %v3963_v23, %s3842_s18 }
 0x3e1   :  { %2099 = vrot.lane.b32.xlu1 %v4394_v22, %s3838_s2  ;;  %v1936_v4 = vpop.permute.xlu1 %1935 }
 0x3e2   :  { %v1960_v7 = vsel %vm312_vm1, %v1936_v4, 0.0 }
 0x3e4   :  { %433 = vrot.lane.b32.xlu0 %v3963_v23, %s3841_s3 }
 0x3e5   :  { %2103 = vrot.lane.b32.xlu1 %v4402_v41, %s3838_s2 }
 0x3e8   :  { %439 = vrot.lane.b32.xlu0 %v3963_v23, %s3843_s19 }
 0x3e9   :  { %2107 = vrot.lane.b32.xlu1 %v4412_v0, %s3838_s2 }
 0x3ed   :  { %429 = vrot.lane.b32.xlu1 %v3967_v25, %s3842_s18 }
 0x3f1   :  { %435 = vrot.lane.b32.xlu1 %v3967_v25, %s3841_s3 }
 0x3f5   :  { %441 = vrot.lane.b32.xlu1 %v3967_v25, %s3843_s19 }
 0x407   :  { %1958 = vadd.xlane.f32.xlu0 %v1957_v63 }
 0x419   :  { %1961 = vadd.xlane.f32.xlu1 %v1960_v7 }
 0x43a   :  { %v1938_v18 = vpop.permute.xlu1 %1937 }
 0x43b   :  { %v1963_v24 = vsel %vm312_vm1, %v1938_v18, 0.0 }
 0x43c   :  { %1964 = vadd.xlane.f32.xlu0 %v1963_v24 }
 0x43e   :  { %v1940_v43 = vpop.permute.xlu0 %1939 }
 0x43f   :  { %v1942_v47 = vpop.permute.xlu1 %1941  ;;  %v1966_v61 = vsel %vm312_vm1, %v1940_v43, 0.0 }
 0x440   :  { %1967 = vadd.xlane.f32.xlu0 %v1966_v61  ;;  %v1969_v52 = vsel %vm312_vm1, %v1942_v47, 0.0 }
 0x441   :  { %1970 = vadd.xlane.f32.xlu1 %v1969_v52 }
 0x442   :  { %v1944_v42 = vpop.permute.xlu0 %1943 }
 0x443   :  { %v1946_v37 = vpop.permute.xlu1 %1945  ;;  %v1972_v38 = vsel %vm312_vm1, %v1944_v42, 0.0 }
 0x444   :  { %1973 = vadd.xlane.f32.xlu0 %v1972_v38  ;;  %v1975_v45 = vsel %vm312_vm1, %v1946_v37, 0.0  ;;  %v1413_v37 = vmul.f32 %v3963_v23, %v3963_v23 }
 0x445   :  { %1976 = vadd.xlane.f32.xlu1 %v1975_v45 }
 0x446   :  { %v2096_v53 = vpop.permute.xlu0 %2095 }
 0x447   :  { %v1948_v48 = vpop.permute.xlu1 %1947  ;;  %v4431_v46 = vpop.f32.mrb[4].mxu1  ;;  %v2120_v3 = vsel %vm312_vm1, %v2096_v53, 0.0 }
 0x448   :  { %v3160_v9 = vpop.f32.mrb[5].mxu1  ;;  %v1978_v10 = vsel %vm312_vm1, %v1948_v48, 0.0 }
 0x449   :  { %1979 = vadd.xlane.f32.xlu0 %v1978_v10  ;;  %v4434_v15 = vpop.f32.mrb[6].mxu1  ;;  %v1414_v10 = vmul.f32 %v3967_v25, %v3967_v25 }
 0x44a   :  { %v3161_v44 = vpop.f32.mrb[7].mxu1  ;;  %v2102_v17 = vpop.permute.xlu0 %2101 }
 0x44b   :  { %v2094_v19 = vpop.permute.xlu1 %2093  ;;  %v2129_v24 = vsel %vm312_vm1, %v2102_v17, 0.0  ;;  %v1421_v44 = vsel %vm312_vm1, %v1413_v37, 0.0 }
 0x44c   :  { %v2117_v12 = vsel %vm312_vm1, %v2094_v19, 0.0 }
 0x44d   :  { %2121 = vadd.xlane.f32.xlu0 %v2120_v3  ;;  %2118 = vadd.xlane.f32.xlu1 %v2117_v12  ;;  %v1424_v12 = vsel %vm312_vm1, %v1414_v10, 0.0  ;;  %v1001_v10 = vsel %vm312_vm1, %v4431_v46, -inf }
 0x44e   :  { %v2106_v40 = vpop.permute.xlu0 %2105 }
 0x44f   :  { %v2098_v63 = vpop.permute.xlu1 %2097  ;;  %v2135_v61 = vsel %vm312_vm1, %v2106_v40, 0.0 }
 0x450   :  { %v2123_v4 = vsel %vm312_vm1, %v2098_v63, 0.0 }
 0x451   :  { %2124 = vadd.xlane.f32.xlu1 %v2123_v4 }
 0x452   :  { %v4439_v18 = vpop.permute.xlu0 %427 }
 0x453   :  { %v2100_v7 = vpop.permute.xlu1 %2099  ;;  %5282 = vst [vmem:[#allocation24_spill] sm:$0xff] %v4439_v18  ;;  %v1415_v19 = vmul.f32 %v4439_v18, %v4439_v18 }
 0x454   :  { %v2126_v43 = vsel %vm312_vm1, %v2100_v7, 0.0 }
 0x455   :  { %2130 = vadd.xlane.f32.xlu1 %v2129_v24  ;;  %2127 = vadd.xlane.f32.xlu0 %v2126_v43  ;;  %v1427_v63 = vsel %vm312_vm1, %v1415_v19, 0.0 }
 0x456   :  { %v4449_v45 = vpop.permute.xlu0 %433 }
 0x457   :  { %v2104_v47 = vpop.permute.xlu1 %2103  ;;  %5283 = vst [vmem:[#allocation25_spill] sm:$0xff] %v4449_v45  ;;  %v1417_v4 = vmul.f32 %v4449_v45, %v4449_v45 }
 0x458   :  { %v2132_v52 = vsel %vm312_vm1, %v2104_v47, 0.0  ;;  %v4445_v42 = vpop.f32.mrb[8].mxu0 }
 0x459   :  { %2136 = vadd.xlane.f32.xlu1 %v2135_v61  ;;  %2133 = vadd.xlane.f32.xlu0 %v2132_v52  ;;  %v3166_v38 = vpop.f32.mrb[9].mxu0  ;;  %v1433_v47 = vsel %vm312_vm1, %v1417_v4, 0.0 }
 0x45a   :  { %v4451_v53 = vpop.f32.mrb[10].mxu0  ;;  %v4469_v24 = vpop.permute.xlu0 %439 }
 0x45b   :  { %v2108_v48 = vpop.permute.xlu1 %2107  ;;  %v3167_v9 = vpop.f32.mrb[11].mxu0  ;;  %5285 = vst [vmem:[#allocation27_spill] sm:$0xff] %v4469_v24  ;;  %v1419_v52 = vmul.f32 %v4469_v24, %v4469_v24 }
 0x45c   :  { %v2138_v17 = vsel %vm312_vm1, %v2108_v48, 0.0  ;;  %v1004_v9 = vsel %vm312_vm1, %v4434_v15, -inf }
 0x45d   :  { %1422 = vadd.xlane.f32.xlu1 %v1421_v44  ;;  %2139 = vadd.xlane.f32.xlu0 %v2138_v17  ;;  %v1439_v38 = vsel %vm312_vm1, %v1419_v52, 0.0  ;;  %v1007_v44 = vsel %vm312_vm1, %v4445_v42, -inf }
 0x45f   :  { %v4459_v3 = vpop.permute.xlu1 %429 }
 0x460   :  { %5284 = vst [vmem:[#allocation26_spill] sm:$0xff] %v4459_v3  ;;  %v1198_v40 = vpack.c.bf16 %v4459_v3, %v4439_v18  ;;  %v1416_v7 = vmul.f32 %v4459_v3, %v4459_v3 }
 0x461   :  { %1428 = vadd.xlane.f32.xlu1 %v1427_v63  ;;  %1425 = vadd.xlane.f32.xlu0 %v1424_v12 }
 0x462   :  { %3211 = vmatpush3.bf16.msra.mxu0 %v1198_v40  ;;  %v1430_v61 = vsel %vm312_vm1, %v1416_v7, 0.0  ;;  %v1010_v7 = vsel %vm312_vm1, %v4451_v53, -inf }
 0x463   :  { %v4471_v43 = vpop.permute.xlu1 %435  ;;  %3222 = vmatprep.subr.bf16.mxu0 %v5253_v5 }
 0x464   :  { %5286 = vst [vmem:[#allocation28_spill] sm:$0xff] %v4471_v43  ;;  %v1418_v37 = vmul.f32 %v4471_v43, %v4471_v43 }
 0x465   :  { %1434 = vadd.xlane.f32.xlu1 %v1433_v47  ;;  %1431 = vadd.xlane.f32.xlu0 %v1430_v61 }
 0x466   :  { %v1436_v48 = vsel %vm312_vm1, %v1418_v37, 0.0 }
 0x469   :  { %1440 = vadd.xlane.f32.xlu1 %v1439_v38  ;;  %1437 = vadd.xlane.f32.xlu0 %v1436_v48 }
 0x46d   :  { %1005 = vmax.xlane.f32.xlu1 %v1004_v9  ;;  %1002 = vmax.xlane.f32.xlu0 %v1001_v10 }
 0x471   :  { %1008 = vmax.xlane.f32.xlu1 %v1007_v44 }
 0x48a   :  { %v4488_v17 = vpop.f32.mrb[8].mxu1 }
 0x48b   :  { %v3172_v19 = vpop.f32.mrb[9].mxu1  ;;  %v1013_v12 = vsel %vm312_vm1, %v4488_v17, -inf }
 0x48c   :  { %v4492_v40 = vpop.f32.mrb[10].mxu1  ;;  %1014 = vmax.xlane.f32.xlu0 %v1013_v12 }
 0x48d   :  { %v3173_v63 = vpop.f32.mrb[11].mxu1  ;;  %v1016_v4 = vsel %vm312_vm1, %v4492_v40, -inf }
 0x48e   :  { %1017 = vmax.xlane.f32.xlu1 %v1016_v4  ;;  %v4514_v4 = vpop.permute.xlu1 %441 }
 0x48f   :  { %5287 = vst [vmem:[#allocation29_spill] sm:$0xff] %v4514_v4 }
 0x490   :  { %1011 = vmax.xlane.f32.xlu0 %v1010_v7 }
 0x492   :  { %v4498_v47 = vpop.f32.mrb[12].mxu1 }
 0x493   :  { %v3184_v61 = vpop.f32.mrb[13].mxu1  ;;  %v1089_v52 = vsel %vm312_vm1, %v4498_v47, -inf }
 0x494   :  { %v4502_v37 = vpop.f32.mrb[14].mxu1  ;;  %1090 = vmax.xlane.f32.xlu0 %v1089_v52  ;;  %v1959_v5 = vpop.xlane.xlu0 %1958 }
 0x495   :  { %v3185_v38 = vpop.f32.mrb[15].mxu1  ;;  %v1092_v10 = vsel %vm312_vm1, %v4502_v37, -inf  ;;  %3466 = vrsqrt.f32 %v1959_v5  ;;  %v1891_v5 = vsel %vm312_vm1, %v4290_v8, 0.0  ;;  %v1903_v8 = vsel %vm312_vm1, %v4330_v56, 0.0 }
 0x496   :  { %v4504_v48 = vpop.f32.mrb[12].mxu0  ;;  %v1900_v56 = vsel %vm312_vm1, %v4326_v28, 0.0 }
 0x497   :  { %v3178_v9 = vpop.f32.mrb[13].mxu0  ;;  %v1019_v44 = vsel %vm312_vm1, %v4504_v48, -inf }
 0x498   :  { %1093 = vmax.xlane.f32.xlu0 %v1092_v10  ;;  %1020 = vmax.xlane.f32.xlu1 %v1019_v44  ;;  %v4510_v19 = vpop.f32.mrb[14].mxu0 }
 0x499   :  { %v3179_v12 = vpop.f32.mrb[15].mxu0  ;;  %v1022_v63 = vsel %vm312_vm1, %v4510_v19, -inf }
 0x49c   :  { %1023 = vmax.xlane.f32.xlu0 %v1022_v63 }
 0x49d   :  { %v4516_v7 = vpop.f32.mrb[16].mxu1 }
 0x49e   :  { %v4518_v61 = vpop.f32.mrb[16].mxu0  ;;  %v3196_v52 = vpop.f32.mrb[17].mxu1  ;;  %v1101_v38 = vsel %vm312_vm1, %v4516_v7, -inf }
 0x49f   :  { %v3190_v9 = vpop.f32.mrb[17].mxu0  ;;  %v4522_v10 = vpop.f32.mrb[18].mxu1  ;;  %v1095_v44 = vsel %vm312_vm1, %v4518_v61, -inf }
 0x4a0   :  { %v3197_v12 = vpop.f32.mrb[19].mxu1  ;;  %1102 = vmax.xlane.f32.xlu0 %v1101_v38  ;;  %1096 = vmax.xlane.f32.xlu1 %v1095_v44  ;;  %v4526_v63 = vpop.f32.mrb[18].mxu0  ;;  %v1420_v9 = vmul.f32 %v4514_v4, %v4514_v4 }
 0x4a1   :  { %v3191_v6 = vpop.f32.mrb[19].mxu0  ;;  %v1098_v52 = vsel %vm312_vm1, %v4526_v63, -inf }
 0x4a2   :  { %v1442_v6 = vsel %vm312_vm1, %v1420_v9, 0.0 }
 0x4a4   :  { %1886 = vadd.xlane.f32.xlu1 %v1885_v30  ;;  %1099 = vmax.xlane.f32.xlu0 %v1098_v52  ;;  %v1104_v30 = vsel %vm312_vm1, %v4522_v10, -inf  ;;  %v1897_v52 = vsel %vm312_vm1, %v4306_v16, 0.0 }
 0x4a6   :  { %v1962_v59 = vpop.xlane.xlu1 %1961  ;;  %v4534_v12 = vpop.f32.mrb[20].mxu0 }
 0x4a7   :  { %3468 = vrsqrt.f32 %v1962_v59  ;;  %v3202_v38 = vpop.f32.mrb[21].mxu0  ;;  %v1107_v44 = vsel %vm312_vm1, %v4534_v12, -inf  ;;  %v3467_v59 = vpop.eup %3466 }
 0x4a8   :  { %1443 = vadd.xlane.f32.xlu0 %v1442_v6  ;;  %1108 = vmax.xlane.f32.xlu1 %v1107_v44  ;;  %v4539_v11 = vpop.f32.mrb[22].mxu0  ;;  %v1888_v44 = vsel %vm312_vm1, %v4228_v33, 0.0  ;;  %v1906_v33 = vsel %vm312_vm1, %v4351_v49, 0.0 }
 0x4a9   :  { %v3203_v27 = vpop.f32.mrb[23].mxu0  ;;  %v1110_v9 = vsel %vm312_vm1, %v4539_v11, -inf }
 0x4aa   :  { %v4550_v27 = vmul.f32 %v3467_v59, %v4144_v58  ;;  %v2051_v59 = vsel %vm312_vm1, %v4384_v36, 0.0 }
 0x4ac   :  { %1105 = vmax.xlane.f32.xlu0 %v1104_v30  ;;  %1892 = vadd.xlane.f32.xlu1 %v1891_v5  ;;  %v2045_v30 = vsel %vm312_vm1, %v4368_v51, 0.0  ;;  %v1894_v5 = vsel %vm312_vm1, %v4302_v2, 0.0  ;;  %v2048_v51 = vsel %vm312_vm1, %v4347_v13, 0.0  ;;  %v2054_v2 = vsel %vm312_vm1, %v4394_v22, 0.0 }
 0x4b0   :  { %1898 = vadd.xlane.f32.xlu1 %v1897_v52  ;;  %1111 = vmax.xlane.f32.xlu0 %v1110_v9 }
 0x4b1   :  { %v3469_v38 = vpop.eup %3468 }
 0x4b2   :  { %v4553_v6 = vmul.f32 %v3469_v38, %v4148_v62 }
 0x4b4   :  { %1904 = vadd.xlane.f32.xlu1 %v1903_v8  ;;  %1889 = vadd.xlane.f32.xlu0 %v1888_v44 }
 0x4b8   :  { %2046 = vadd.xlane.f32.xlu1 %v2045_v30  ;;  %1895 = vadd.xlane.f32.xlu0 %v1894_v5 }
 0x4bc   :  { %2052 = vadd.xlane.f32.xlu1 %v2051_v59  ;;  %1901 = vadd.xlane.f32.xlu0 %v1900_v56 }
 0x4c0   :  { %1907 = vadd.xlane.f32.xlu0 %v1906_v33 }
 0x4c4   :  { %2049 = vadd.xlane.f32.xlu0 %v2048_v51 }
 0x4c8   :  { %2055 = vadd.xlane.f32.xlu0 %v2054_v2 }
 0x4c9   :  { %v4575_v52 = vpop.xlane.xlu0 %1964 }
 0x4cd   :  { %v4577_v36 = vpop.xlane.xlu0 %1967 }
 0x4ce   :  { %v4579_v9 = vpop.xlane.xlu1 %1970 }
 0x4d1   :  { %v4581_v28 = vpop.xlane.xlu0 %1973 }
 0x4d2   :  { %v4583_v38 = vpop.xlane.xlu1 %1976 }
 0x4d6   :  { %v4585_v49 = vpop.xlane.xlu0 %1979 }
 0x4da   :  { %v2122_v8 = vpop.xlane.xlu0 %2121  ;;  %v2119_v44 = vpop.xlane.xlu1 %2118 }
 0x4db   :  { %3470 = vrsqrt.f32 %v2122_v8 }
 0x4dc   :  { %3472 = vrsqrt.f32 %v2119_v44 }
 0x4de   :  { %v4587_v13 = vpop.xlane.xlu1 %2124 }
 0x4e2   :  { %v4589_v22 = vpop.xlane.xlu0 %2127  ;;  %v4591_v30 = vpop.xlane.xlu1 %2130 }
 0x4e5   :  { %v3471_v5 = vpop.eup %3470 }
 0x4e6   :  { %v3473_v59 = vpop.eup %3472  ;;  %v4593_v56 = vpop.xlane.xlu0 %2133  ;;  %v4598_v51 = vmul.f32 %v3471_v5, %v3979_v29 }
 0x4e7   :  { %v4595_v33 = vpop.xlane.xlu1 %2136  ;;  %v4601_v2 = vmul.f32 %v3473_v59, %v3969_v26 }
 0x4ea   :  { %v4605_v44 = vpop.xlane.xlu0 %2139 }
 0x4eb   :  { %v1423_v16 = vpop.xlane.xlu1 %1422 }
 0x4ec   :  { %3474 = vrsqrt.f32 %v1423_v16 }
 0x4ee   :  { %v1426_v4 = vpop.xlane.xlu0 %1425 }
 0x4ef   :  { %v4607_v24 = vpop.xlane.xlu1 %1428  ;;  %3476 = vrsqrt.f32 %v1426_v4 }
 0x4f0   :  { %5288 = vst [vmem:[#allocation30_spill] sm:$0xff] %v4607_v24 }
 0x4f2   :  { %v4609_v18 = vpop.xlane.xlu0 %1431 }
 0x4f3   :  { %5289 = vst [vmem:[#allocation31_spill] sm:$0xff] %v4609_v18  ;;  %v4611_v3 = vpop.xlane.xlu1 %1434 }
 0x4f4   :  { %5290 = vst [vmem:[#allocation32_spill] sm:$0xff] %v4611_v3 }
 0x4f6   :  { %v4613_v5 = vpop.xlane.xlu0 %1437  ;;  %v3475_v59 = vpop.eup %3474 }
 0x4f7   :  { %5291 = vst [vmem:[#allocation33_spill] sm:$0xff] %v4613_v5  ;;  %v4615_v43 = vpop.xlane.xlu1 %1440  ;;  %v4618_v60 = vmul.f32 %v3475_v59, %v3963_v23 }
 0x4f8   :  { %5292 = vst [vmem:[#allocation34_spill] sm:$0xff] %v4615_v43 }
 0x4f9   :  { %v3477_v45 = vpop.eup %3476  ;;  %5293 = vst [vmem:[#allocation35_spill] sm:$0xff] %v4618_v60 }
 0x4fa   :  { %v1003_v14 = vpop.xlane.xlu0 %1002  ;;  %v4621_v16 = vmul.f32 %v3477_v45, %v3967_v25 }
 0x4fb   :  { %v1006_v8 = vpop.xlane.xlu1 %1005  ;;  %v1025_v4 = vsub.f32 %v4431_v46, %v1003_v14 }
 0x4fc   :  { %5294 = vst [vmem:[#allocation36_spill] sm:$0xff] %v4621_v16  ;;  %v1026_v24 = vsub.f32 %v4434_v15, %v1006_v8  ;;  %v4627_v3 = vpack.c.bf16 %v4621_v16, %v4618_v60 }
 0x4fd   :  { %v1033_v5 = vmul.f32 1.442695, %v1025_v4 }
 0x4fe   :  { %v1035_v43 = vmul.f32 1.442695, %v1026_v24 }
 0x4ff   :  { %v1009_v18 = vpop.xlane.xlu1 %1008  ;;  %3478 = vpow2.f32 %v1033_v5 }
 0x500   :  { %v1027_v35 = vsub.f32 %v4445_v42, %v1009_v18  ;;  %3480 = vpow2.f32 %v1035_v43 }
 0x502   :  { %v1037_v23 = vmul.f32 1.442695, %v1027_v35 }
 0x504   :  { %3482 = vpow2.f32 %v1037_v23 }
 0x509   :  { %v4630_v59 = vpop.eup %3478 }
 0x50a   :  { %v4632_v25 = vpop.eup %3480  ;;  %v1049_v14 = vsel %vm312_vm1, %v4630_v59, 0.0 }
 0x50b   :  { %1050 = vadd.xlane.f32.xlu1 %v1049_v14  ;;  %v1052_v46 = vsel %vm312_vm1, %v4632_v25, 0.0 }
 0x50c   :  { %1053 = vadd.xlane.f32.xlu0 %v1052_v46 }
 0x50e   :  { %v4638_v15 = vpop.eup %3482 }
 0x50f   :  { %v1055_v18 = vsel %vm312_vm1, %v4638_v15, 0.0 }
 0x510   :  { %1056 = vadd.xlane.f32.xlu1 %v1055_v18 }
 0x519   :  { %v1015_v35 = vpop.xlane.xlu0 %1014 }
 0x51a   :  { %v1029_v42 = vsub.f32 %v4488_v17, %v1015_v35 }
 0x51b   :  { %v1018_v45 = vpop.xlane.xlu1 %1017 }
 0x51c   :  { %v1041_v24 = vmul.f32 1.442695, %v1029_v42  ;;  %v1030_v43 = vsub.f32 %v4492_v40, %v1018_v45 }
 0x51d   :  { %v1012_v8 = vpop.xlane.xlu0 %1011 }
 0x51e   :  { %3484 = vpow2.f32 %v1041_v24  ;;  %v1028_v5 = vsub.f32 %v4451_v53, %v1012_v8  ;;  %v1043_v4 = vmul.f32 1.442695, %v1030_v43 }
 0x520   :  { %v1039_v23 = vmul.f32 1.442695, %v1028_v5 }
 0x521   :  { %v1091_v14 = vpop.xlane.xlu0 %1090 }
 0x522   :  { %3486 = vpow2.f32 %v1039_v23  ;;  %v1113_v46 = vsub.f32 %v4498_v47, %v1091_v14 }
 0x523   :  { %3488 = vpow2.f32 %v1043_v4 }
 0x524   :  { %v1121_v16 = vmul.f32 1.442695, %v1113_v46 }
 0x525   :  { %v1094_v18 = vpop.xlane.xlu0 %1093  ;;  %v1021_v60 = vpop.xlane.xlu1 %1020 }
 0x526   :  { %3490 = vpow2.f32 %v1121_v16  ;;  %v1114_v17 = vsub.f32 %v4502_v37, %v1094_v18  ;;  %v1031_v35 = vsub.f32 %v4504_v48, %v1021_v60 }
 0x528   :  { %v4648_v40 = vpop.eup %3484  ;;  %v1123_v42 = vmul.f32 1.442695, %v1114_v17  ;;  %v1045_v45 = vmul.f32 1.442695, %v1031_v35 }
 0x529   :  { %v1024_v53 = vpop.xlane.xlu0 %1023  ;;  %v1061_v24 = vsel %vm312_vm1, %v4648_v40, 0.0 }
 0x52a   :  { %3492 = vpow2.f32 %v1123_v42  ;;  %v1032_v47 = vsub.f32 %v4510_v19, %v1024_v53  ;;  %1062 = vadd.xlane.f32.xlu1 %v1061_v24 }
 0x52b   :  { %3494 = vpow2.f32 %v1045_v45 }
 0x52c   :  { %v4653_v43 = vpop.eup %3486  ;;  %v1047_v16 = vmul.f32 1.442695, %v1032_v47 }
 0x52d   :  { %v1103_v8 = vpop.xlane.xlu0 %1102  ;;  %v1097_v37 = vpop.xlane.xlu1 %1096  ;;  %v1058_v60 = vsel %vm312_vm1, %v4653_v43, 0.0 }
 0x52e   :  { %v4657_v48 = vpop.eup %3488  ;;  %3496 = vpow2.f32 %v1047_v16  ;;  %v1117_v5 = vsub.f32 %v4516_v7, %v1103_v8  ;;  %v1115_v4 = vsub.f32 %v4518_v61, %v1097_v37  ;;  %1059 = vadd.xlane.f32.xlu0 %v1058_v60 }
 0x52f   :  { %v1064_v35 = vsel %vm312_vm1, %v4657_v48, 0.0 }
 0x530   :  { %v4661_v23 = vpop.eup %3490  ;;  %v1125_v19 = vmul.f32 1.442695, %v1115_v4  ;;  %v1129_v14 = vmul.f32 1.442695, %v1117_v5 }
 0x531   :  { %v1887_v46 = vpop.xlane.xlu1 %1886  ;;  %v1100_v18 = vpop.xlane.xlu0 %1099  ;;  %v1137_v17 = vsel %vm312_vm1, %v4661_v23, 0.0 }
 0x532   :  { %v1116_v42 = vsub.f32 %v4526_v63, %v1100_v18  ;;  %1138 = vadd.xlane.f32.xlu1 %v1137_v17  ;;  %1065 = vadd.xlane.f32.xlu0 %v1064_v35  ;;  %3498 = vpow2.f32 %v1125_v19 }
 0x533   :  { %3500 = vrsqrt.f32 %v1887_v46 }
 0x534   :  { %v4668_v7 = vpop.eup %3492  ;;  %v1127_v61 = vmul.f32 1.442695, %v1116_v42  ;;  %3502 = vpow2.f32 %v1129_v14 }
 0x535   :  { %v4670_v45 = vpop.eup %3494  ;;  %v4672_v53 = vpop.xlane.xlu0 %1443  ;;  %v1140_v47 = vsel %vm312_vm1, %v4668_v7, 0.0 }
 0x536   :  { %v1109_v24 = vpop.xlane.xlu1 %1108  ;;  %3504 = vpow2.f32 %v1127_v61  ;;  %v1067_v63 = vsel %vm312_vm1, %v4670_v45, 0.0  ;;  %1141 = vadd.xlane.f32.xlu0 %v1140_v47 }
 0x537   :  { %v1119_v16 = vsub.f32 %v4534_v12, %v1109_v24  ;;  %1068 = vadd.xlane.f32.xlu1 %v1067_v63 }
 0x538   :  { %v4679_v8 = vpop.eup %3496 }
 0x539   :  { %v1133_v37 = vmul.f32 1.442695, %v1119_v16  ;;  %v1106_v60 = vpop.xlane.xlu0 %1105  ;;  %v1070_v4 = vsel %vm312_vm1, %v4679_v8, 0.0 }
 0x53a   :  { %v1893_v5 = vpop.xlane.xlu1 %1892  ;;  %v1118_v19 = vsub.f32 %v4522_v10, %v1106_v60  ;;  %1071 = vadd.xlane.f32.xlu0 %v1070_v4 }
 0x53b   :  { %3506 = vpow2.f32 %v1133_v37 }
 0x53c   :  { %v1131_v14 = vmul.f32 1.442695, %v1118_v19  ;;  %v4684_v46 = vpop.eup %3498 }
 0x53d   :  { %v1112_v18 = vpop.xlane.xlu0 %1111  ;;  %v3501_v17 = vpop.eup %3500  ;;  %v1143_v42 = vsel %vm312_vm1, %v4684_v46, 0.0 }
 0x53e   :  { %v1899_v12 = vpop.xlane.xlu1 %1898  ;;  %3508 = vpow2.f32 %v1131_v14  ;;  %v1120_v35 = vsub.f32 %v4539_v11, %v1112_v18  ;;  %v4689_v61 = vpop.eup %3502  ;;  %v4692_v24 = vmul.f32 %v3501_v17, %v4144_v58  ;;  %1144 = vadd.xlane.f32.xlu1 %v1143_v42 }
 0x53f   :  { %v1149_v11 = vsel %vm312_vm1, %v4689_v61, 0.0 }
 0x540   :  { %v4694_v10 = vpop.eup %3504  ;;  %v1135_v47 = vmul.f32 1.442695, %v1120_v35 }
 0x541   :  { %v1890_v63 = vpop.xlane.xlu0 %1889  ;;  %v1146_v37 = vsel %vm312_vm1, %v4694_v10, 0.0 }
 0x542   :  { %v1905_v16 = vpop.xlane.xlu1 %1904  ;;  %3510 = vpow2.f32 %v1135_v47  ;;  %1147 = vadd.xlane.f32.xlu0 %v1146_v37  ;;  %1150 = vadd.xlane.f32.xlu1 %v1149_v11 }
 0x543   :  { %3512 = vrsqrt.f32 %v1890_v63 }
 0x544   :  { %3514 = vrsqrt.f32 %v1893_v5 }
 0x545   :  { %v4700_v60 = vpop.eup %3506  ;;  %v1896_v4 = vpop.xlane.xlu0 %1895 }
 0x546   :  { %v2047_v58 = vpop.xlane.xlu1 %2046  ;;  %v1155_v19 = vsel %vm312_vm1, %v4700_v60, 0.0 }
 0x547   :  { %3516 = vrsqrt.f32 %v2047_v58  ;;  %1156 = vadd.xlane.f32.xlu1 %v1155_v19 }
 0x548   :  { %3518 = vrsqrt.f32 %v1896_v4  ;;  %v4704_v14 = vpop.eup %3508 }
 0x549   :  { %3520 = vrsqrt.f32 %v1899_v12  ;;  %v1902_v18 = vpop.xlane.xlu0 %1901  ;;  %v1152_v17 = vsel %vm312_vm1, %v4704_v14, 0.0 }
 0x54a   :  { %1153 = vadd.xlane.f32.xlu0 %v1152_v17  ;;  %3522 = vrsqrt.f32 %v1902_v18 }
 0x54b   :  { %3524 = vrsqrt.f32 %v1905_v16 }
 0x54c   :  { %v4708_v35 = vpop.eup %3510 }
 0x54d   :  { %v1908_v5 = vpop.xlane.xlu0 %1907  ;;  %v1158_v42 = vsel %vm312_vm1, %v4708_v35, 0.0  ;;  %v3513_v47 = vpop.eup %3512 }
 0x54e   :  { %3526 = vrsqrt.f32 %v1908_v5  ;;  %1159 = vadd.xlane.f32.xlu0 %v1158_v42  ;;  %v3515_v63 = vpop.eup %3514  ;;  %v4713_v37 = vmul.f32 %v3513_v47, %v4148_v62 }
 0x54f   :  { %3528 = vrsqrt.f32 %v4577_v36  ;;  %v4722_v19 = vmul.f32 %v3515_v63, %v4283_v54  ;;  %v5295_v63 = vpack.c.bf16 %v4553_v6, %v4550_v27 }
 0x551   :  { %v3517_v12 = vpop.eup %3516  ;;  %v2050_v4 = vpop.xlane.xlu0 %2049 }
 0x552   :  { %v3519_v11 = vpop.eup %3518  ;;  %v4717_v58 = vmul.f32 %v3517_v12, %v3969_v26  ;;  %3530 = vrsqrt.f32 %v2050_v4 }
 0x553   :  { %v4725_v18 = vmul.f32 %v3519_v11, %v4297_v50  ;;  %v3521_v62 = vpop.eup %3520  ;;  %3532 = vrsqrt.f32 %v4575_v52 }
 0x554   :  { %v3523_v17 = vpop.eup %3522  ;;  %v4731_v5 = vmul.f32 %v3521_v62, %v4295_v1  ;;  %3534 = vrsqrt.f32 %v4581_v28 }
 0x555   :  { %v3525_v26 = vpop.eup %3524  ;;  %v4734_v42 = vmul.f32 %v3523_v17, %v4320_v31  ;;  %3536 = vrsqrt.f32 %v4579_v9 }
 0x556   :  { %v4743_v12 = vmul.f32 %v3525_v26, %v4318_v21  ;;  %3538 = vrsqrt.f32 %v4589_v22 }
 0x557   :  { %v2159_v52 = vpack.c.bf16 %v4734_v42, %v4731_v5  ;;  %3540 = vrsqrt.f32 %v4587_v13 }
 0x558   :  { %v3527_v47 = vpop.eup %3526  ;;  %2166 = vrot.lane.b32.xlu1 %v5295_v63, %s3838_s2  ;;  %3542 = vrsqrt.f32 %v4585_v49 }
 0x559   :  { %v4746_v11 = vmul.f32 %v3527_v47, %v4343_v20  ;;  %v3529_v4 = vpop.eup %3528  ;;  %v2057_v47 = vsel %vm312_vm1, %v4364_v32, 0.0  ;;  %3544 = vrsqrt.f32 %v4605_v44 }
 0x55a   :  { %v1992_v27 = vmul.f32 %v3529_v4, %v4297_v50  ;;  %v2060_v50 = vsel %vm312_vm1, %v4402_v41, 0.0  ;;  %3546 = vrsqrt.f32 %v4583_v38 }
 0x55b   :  { %v2160_v62 = vpack.c.bf16 %v4746_v11, %v4743_v12  ;;  %3548 = vrsqrt.f32 %v4595_v33 }
 0x55c   :  { %v3531_v17 = vpop.eup %3530  ;;  %3550 = vrsqrt.f32 %v4593_v56 }
 0x55d   :  { %v3533_v36 = vpop.eup %3532  ;;  %v4751_v16 = vmul.f32 %v3531_v17, %v3979_v29  ;;  %v2063_v29 = vsel %vm312_vm1, %v4380_v34, 0.0  ;;  %3552 = vrsqrt.f32 %v4591_v30  ;;  %v5297_v17 = vld [vmem:[#allocation22_spill] sm:$0xff] }
 0x55e   :  { %v1991_v26 = vmul.f32 %v3533_v36, %v4283_v54  ;;  %v2066_v54 = vsel %vm312_vm1, %v4412_v0, 0.0  ;;  %v3535_v32 = vpop.eup %3534 }
 0x55f   :  { %v2365_v6 = vpack.c.bf16 %v4751_v16, %v4717_v58  ;;  %v3537_v28 = vpop.eup %3536  ;;  %v1994_v34 = vmul.f32 %v3535_v32, %v4320_v31  ;;  %v5296_v31 = vpack.c.bf16 %v4598_v51, %v4601_v2  ;;  %v5298_v51 = vld [vmem:[#allocation23_spill] sm:$0xff] }
 0x560   :  { %v2162_v63 = vpack.c.bf16 %v1992_v27, %v1991_v26  ;;  %v1993_v41 = vmul.f32 %v3537_v28, %v4295_v1  ;;  %v3539_v9 = vpop.eup %3538 }
 0x561   :  { %v3541_v49 = vpop.eup %3540  ;;  %v2152_v22 = vmul.f32 %v3539_v9, %v4370_v39 }
 0x562   :  { %v2163_v0 = vpack.c.bf16 %v1994_v34, %v1993_v41  ;;  %v3543_v13 = vpop.eup %3542  ;;  %v2151_v1 = vmul.f32 %v3541_v49, %v4341_v57  ;;  %v4797_v34 = vpop.xlane.xlu0 %2055 }
 0x563   :  { %v3545_v44 = vpop.eup %3544  ;;  %v1996_v30 = vmul.f32 %v3543_v13, %v4343_v20  ;;  %v4795_v20 = vpop.xlane.xlu1 %2052 }
 0x564   :  { %2216 = vrot.lane.b32.xlu0 %v2162_v63, %s3838_s2  ;;  %v3547_v38 = vpop.eup %3546  ;;  %v2370_v33 = vpack.c.bf16 %v2152_v22, %v2151_v1  ;;  %v2156_v36 = vmul.f32 %v3545_v44, %v4404_v55 }
 0x565   :  { %v3549_v56 = vpop.eup %3548  ;;  %v1995_v26 = vmul.f32 %v3547_v38, %v4318_v21 }
 0x566   :  { %v3551_v4 = vpop.eup %3550  ;;  %v2155_v27 = vmul.f32 %v3549_v56, %v5297_v17 }
 0x567   :  { %v3553_v63 = vpop.eup %3552  ;;  %v2154_v2 = vmul.f32 %v3551_v4, %v5298_v51 }
 0x57c   :  { %2058 = vadd.xlane.f32.xlu1 %v2057_v47  ;;  %v2372_v47 = vpack.c.bf16 %v2156_v36, %v2155_v27 }
 0x580   :  { %2064 = vadd.xlane.f32.xlu1 %v2063_v29  ;;  %v2164_v29 = vpack.c.bf16 %v1996_v30, %v1995_v26 }
 0x583   :  { %2061 = vadd.xlane.f32.xlu0 %v2060_v50  ;;  %v5299_v50 = vld [vmem:[#allocation21_spill] sm:$0xff] }
 0x587   :  { %2067 = vadd.xlane.f32.xlu0 %v2066_v54  ;;  %v2153_v54 = vmul.f32 %v3553_v63, %v5299_v50 }
 0x589   :  { %v2371_v32 = vpack.c.bf16 %v2154_v2, %v2153_v54 }
 0x591   :  { %2266 = vrot.lane.b32.xlu1 %v2163_v0, %s3838_s2 }
 0x595   :  { %2374 = vrot.lane.b32.xlu1 %v5296_v31, %s3838_s2 }
 0x598   :  { %v1051_v28 = vpop.xlane.xlu1 %1050 }
 0x599   :  { %2424 = vrot.lane.b32.xlu1 %v2370_v33, %s3838_s2  ;;  %v1054_v21 = vpop.xlane.xlu0 %1053  ;;  %3554 = vrcp.f32 %v1051_v28 }
 0x59d   :  { %2524 = vrot.lane.b32.xlu1 %v2372_v47, %s3838_s2  ;;  %2316 = vrot.lane.b32.xlu0 %v2164_v29, %s3838_s2  ;;  %v1057_v41 = vpop.xlane.xlu1 %1056 }
 0x5a1   :  { %2474 = vrot.lane.b32.xlu0 %v2371_v32, %s3838_s2 }
 0x5a3   :  { %v3555_v38 = vpop.eup %3554 }
 0x5a4   :  { %v1081_v30 = vmul.f32 %v3555_v38, %v4630_v59  ;;  %v5301_v59 = vld [vmem:[#allocation30_spill] sm:$0xff] }
 0x5b7   :  { %v1063_v0 = vpop.xlane.xlu1 %1062 }
 0x5bb   :  { %v1060_v9 = vpop.xlane.xlu0 %1059 }
 0x5bf   :  { %v1139_v49 = vpop.xlane.xlu1 %1138  ;;  %v1066_v13 = vpop.xlane.xlu0 %1065 }
 0x5c0   :  { %3556 = vrcp.f32 %v1139_v49 }
 0x5c1   :  { %3558 = vrcp.f32 %v1054_v21 }
 0x5c3   :  { %v1142_v22 = vpop.xlane.xlu0 %1141 }
 0x5c4   :  { %3560 = vrcp.f32 %v1142_v22  ;;  %v1069_v44 = vpop.xlane.xlu1 %1068 }
 0x5c5   :  { %3562 = vrcp.f32 %v1057_v41  ;;  %v5302_v41 = vld [vmem:[#allocation25_spill] sm:$0xff] }
 0x5c7   :  { %v1072_v56 = vpop.xlane.xlu0 %1071 }
 0x5ca   :  { %v3557_v31 = vpop.eup %3556 }
 0x5cb   :  { %v1169_v1 = vmul.f32 %v3557_v31, %v4661_v23  ;;  %v3559_v33 = vpop.eup %3558  ;;  %v1145_v36 = vpop.xlane.xlu1 %1144  ;;  %v5300_v23 = vld [vmem:[#allocation31_spill] sm:$0xff] }
 0x5cc   :  { %3564 = vrcp.f32 %v1145_v36  ;;  %v1082_v27 = vmul.f32 %v3559_v33, %v4632_v25  ;;  %v5307_v33 = vld [vmem:[#allocation33_spill] sm:$0xff] }
 0x5cd   :  { %3566 = vrcp.f32 %v1060_v9  ;;  %v1177_v26 = vadd.f32 %v1169_v1, %v1081_v30  ;;  %v5306_v1 = vmov 0.0  }
 0x5ce   :  { %v3561_v4 = vpop.eup %3560  ;;  %3568 = vrcp.f32 %v1063_v0  ;;  %v5303_v0 = vld [vmem:[#allocation28_spill] sm:$0xff] }
 0x5cf   :  { %v1170_v63 = vmul.f32 %v3561_v4, %v4668_v7  ;;  %v1148_v47 = vpop.xlane.xlu0 %1147  ;;  %v1151_v29 = vpop.xlane.xlu1 %1150  ;;  %v1185_v54 = vmul.f32 0.5, %v1177_v26  ;;  %v1199_v9 = vpack.c.bf16 %v5303_v0, %v5302_v41  ;;  %v5316_v7 = vpack.c.bf16 %v4713_v37, %v4692_v24 }
 0x5d0   :  { %3570 = vrcp.f32 %v1148_v47  ;;  %v3563_v21 = vpop.eup %3562 }
 0x5d1   :  { %v1178_v2 = vadd.f32 %v1170_v63, %v1082_v27  ;;  %3572 = vrcp.f32 %v1151_v29  ;;  %v1083_v38 = vmul.f32 %v3563_v21, %v4638_v15  ;;  %v5308_v27 = vld [vmem:[#allocation32_spill] sm:$0xff]  ;;  %v1801_v21 = vsel %vm312_vm1, %v1185_v54, 0.0 }
 0x5d2   :  { %3574 = vrsqrt.f32 %v5300_v23 }
 0x5d3   :  { %3576 = vrcp.f32 %v1069_v44  ;;  %v1186_v32 = vmul.f32 0.5, %v1178_v2 }
 0x5d4   :  { %3578 = vrsqrt.f32 %v5301_v59  ;;  %v1157_v28 = vpop.xlane.xlu1 %1156 }
 0x5d5   :  { %3580 = vrcp.f32 %v1157_v28  ;;  %v1193_v25 = vpack.c.bf16 %v1186_v32, %v1185_v54  ;;  %v1808_v54 = vsel %vm312_vm1, %v1186_v32, 0.0 }
 0x5d6   :  { %3582 = vrcp.f32 %v1066_v13  ;;  %v3565_v49 = vpop.eup %3564 }
 0x5d7   :  { %3207 = vmatmul.mubr.msk.bf16.vlgmr.msra.gmra.mrb[20].mxu1 %vm312_vm1, %v1193_v25  ;;  %v1154_v22 = vpop.xlane.xlu0 %1153  ;;  %v3567_v44 = vpop.eup %3566  ;;  %v1171_v31 = vmul.f32 %v3565_v49, %v4684_v46 }
 0x5d8   :  { %3217 = vmatpush3.bf16.msra.mxu1 %v1199_v9  ;;  %3584 = vrcp.f32 %v1154_v22  ;;  %3218 = vmatprep.mubr.msk.bf16.mxu1 %vm3845_vm2, %v5306_v1  ;;  %v3569_v13 = vpop.eup %3568  ;;  %v1084_v15 = vmul.f32 %v3567_v44, %v4653_v43  ;;  %v5309_v9 = vld [vmem:[#allocation26_spill] sm:$0xff] }
 0x5d9   :  { %3586 = vrsqrt.f32 %v5307_v33  ;;  %3330 = vmatprep.subr.msk.bf16.mxu1 %vm4809_vm3, %v4627_v3  ;;  %v1179_v30 = vadd.f32 %v1171_v31, %v1083_v38  ;;  %v1085_v47 = vmul.f32 %v3569_v13, %v4648_v40  ;;  %v5311_v13 = vld [vmem:[#allocation24_spill] sm:$0xff] }
 0x5da   :  { %v3571_v36 = vpop.eup %3570  ;;  %3588 = vrcp.f32 %v1072_v56 }
 0x5db   :  { %v3573_v4 = vpop.eup %3572  ;;  %3590 = vrsqrt.f32 %v5308_v27  ;;  %v1172_v46 = vmul.f32 %v3571_v36, %v4694_v10  ;;  %v1160_v26 = vpop.xlane.xlu0 %1159  ;;  %v1187_v2 = vmul.f32 0.5, %v1179_v30  ;;  %v5313_v27 = vld [vmem:[#allocation29_spill] sm:$0xff] }
 0x5dc   :  { %v3575_v63 = vpop.eup %3574  ;;  %v1173_v29 = vmul.f32 %v3573_v4, %v4689_v61  ;;  %3592 = vrcp.f32 %v1160_v26  ;;  %v5310_v61 = vld [vmem:[#allocation34_spill] sm:$0xff]  ;;  %v5312_v4 = vld [vmem:[#allocation27_spill] sm:$0xff] }
 0x5dd   :  { %v3577_v23 = vpop.eup %3576  ;;  %v1180_v59 = vadd.f32 %v1172_v46, %v1084_v15  ;;  %3594 = vrsqrt.f32 %v4672_v53  ;;  %v1802_v43 = vsel %vm312_vm1, %v1187_v2, 0.0  ;;  %v4831_v49 = vmul.f32 %v3575_v63, %v5309_v9 }
 0x5de   :  { %v3579_v28 = vpop.eup %3578  ;;  %v1181_v56 = vadd.f32 %v1173_v29, %v1085_v47  ;;  %v1803_v40 = vadd.f32 %v1802_v43, %v1801_v21  ;;  %3596 = vrsqrt.f32 %v5310_v61  ;;  %v1087_v44 = vmul.f32 %v3577_v23, %v4670_v45 }
 0x5df   :  { %v3581_v25 = vpop.eup %3580  ;;  %v1188_v10 = vmul.f32 0.5, %v1180_v59  ;;  %v1455_v33 = vmul.f32 %v3579_v28, %v5311_v13  ;;  %v1200_v15 = vpack.c.bf16 %v5313_v27, %v5312_v4  ;;  %3598 = vrsqrt.f32 %v4797_v34 }
 0x5e0   :  { %v3583_v22 = vpop.eup %3582  ;;  %v1175_v38 = vmul.f32 %v3581_v25, %v4700_v60  ;;  %v1189_v31 = vmul.f32 0.5, %v1181_v56 }
 0x5e1   :  { %v1194_v53 = vpack.c.bf16 %v1188_v10, %v1187_v2  ;;  %v1809_v36 = vsel %vm312_vm1, %v1188_v10, 0.0  ;;  %v1086_v45 = vmul.f32 %v3583_v22, %v4657_v48  ;;  %v3334_v29 = vpack.c.bf16 %v4831_v49, %v1455_v33 }
 0x5e2   :  { %v3585_v30 = vpop.eup %3584  ;;  %v1183_v46 = vadd.f32 %v1175_v38, %v1087_v44  ;;  %v1804_v26 = vsel %vm312_vm1, %v1189_v31, 0.0  ;;  %v1810_v63 = vadd.f32 %v1809_v36, %v1808_v54 }
 0x5e3   :  { %v3587_v47 = vpop.eup %3586  ;;  %v1174_v60 = vmul.f32 %v3585_v30, %v4704_v14  ;;  %3213 = vmatmul.mubr.msk.bf16.vlgmr.msra.gmra.mrb[24].mxu0 %vm312_vm1, %v1194_v53  ;;  %v1805_v32 = vadd.f32 %v1804_v26, %v1803_v40 }
 0x5e4   :  { %v3589_v2 = vpop.eup %3588  ;;  %3223 = vmatpush3.bf16.msra.mxu0 %v1200_v15  ;;  %3224 = vmatprep.mubr.msk.bf16.mxu0 %vm3845_vm2, %v5306_v1  ;;  %v1191_v23 = vmul.f32 0.5, %v1183_v46  ;;  %v1458_v48 = vmul.f32 %v3587_v47, %v5303_v0  ;;  %v5317_v15 = vpack.c.bf16 %v4725_v18, %v4722_v19 }
 0x5e5   :  { %v3591_v59 = vpop.eup %3590  ;;  %v1182_v28 = vadd.f32 %v1174_v60, %v1086_v45  ;;  %3336 = vmatprep.subr.msk.bf16.mxu0 %vm4809_vm3, %v3334_v29  ;;  %v1088_v21 = vmul.f32 %v3589_v2, %v4679_v8 }
 0x5e6   :  { %v3593_v56 = vpop.eup %3592  ;;  %v1806_v14 = vsel %vm312_vm1, %v1191_v23, 0.0  ;;  %v1457_v61 = vmul.f32 %v3591_v59, %v5302_v41 }
 0x5e7   :  { %v1176_v43 = vmul.f32 %v3593_v56, %v4708_v35  ;;  %v1190_v25 = vmul.f32 0.5, %v1182_v28  ;;  %v4854_v10 = vadd.f32 %v1806_v14, %v1805_v32  ;;  %v3595_v9 = vpop.eup %3594  ;;  %v5314_v35 = vld [vmem:[#allocation35_spill] sm:$0xff] }
 0x5e8   :  { %v3597_v38 = vpop.eup %3596  ;;  %v3340_v0 = vpack.c.bf16 %v1458_v48, %v1457_v61  ;;  %v1460_v8 = vmul.f32 %v3595_v9, %v5313_v27  ;;  %v2217_v27 = vpop.permute.xlu0 %2216  ;;  %v5318_v56 = vld [vmem:[#allocation19_spill] sm:$0xff] }
 0x5e9   :  { %v1184_v40 = vadd.f32 %v1176_v43, %v1088_v21  ;;  %v1195_v22 = vpack.c.bf16 %v1190_v25, %v1189_v31  ;;  %v1811_v44 = vsel %vm312_vm1, %v1190_v25, 0.0  ;;  %v1459_v31 = vmul.f32 %v3597_v38, %v5312_v4  ;;  %v2167_v4 = vpop.permute.xlu1 %2166 }
 0x5ea   :  { %v1812_v53 = vadd.f32 %v1811_v44, %v1810_v63 }
 0x5eb   :  { %3219 = vmatmul.mubr.msk.bf16.vlgmr.msra.gmra.mrb[24].mxu1 %vm312_vm1, %v1195_v22  ;;  %v1192_v13 = vmul.f32 0.5, %v1184_v40  ;;  %v3346_v30 = vpack.c.bf16 %v1460_v8, %v1459_v31 }
 0x5ec   :  { %3333 = vmatpush3.bf16.xpose.msk.msra.mxu1 %vm4809_vm3, %v4627_v3  ;;  %3232 = vmatprep.mubr.msk.f32.mxu1 %vm312_vm1, %v5314_v35  ;;  %v5315_v3 = vld [vmem:[#allocation36_spill] sm:$0xff] }
 0x5ed   :  { %3342 = vmatprep.subr.msk.bf16.mxu1 %vm4809_vm3, %v3340_v0  ;;  %v1196_v41 = vpack.c.bf16 %v1192_v13, %v1191_v23  ;;  %v1813_v54 = vsel %vm312_vm1, %v1192_v13, 0.0 }
 0x5ee   :  { %v4869_v36 = vadd.f32 %v1813_v54, %v1812_v53 }
 0x5ef   :  { %3225 = vmatmul.mubr.msk.bf16.vlgmr.msra.gmra.mrb[28].mxu0 %vm312_vm1, %v1196_v41 }
 0x5f0   :  { %3339 = vmatpush3.bf16.xpose.msk.msra.mxu0 %vm4809_vm3, %v3334_v29  ;;  %3239 = vmatprep.mubr.msk.f32.mxu0 %vm312_vm1, %v1455_v33  ;;  %v2172_v33 = vsel %vm312_vm1, %v2167_v4, 0  ;;  %v3599_v29 = vpop.eup %3598 }
 0x5f1   :  { %3348 = vmatprep.subr.msk.bf16.mxu0 %vm4809_vm3, %v3346_v30  ;;  %v2080_v23 = vmul.f32 %v3599_v29, %v4370_v39 }
 0x5f3   :  { %3233 = vmatmul.mubr.msk.f32.vlgmr.msra.gmra.mrb[28].mxu1 %vm312_vm1, %v5315_v3 }
 0x5f4   :  { %3345 = vmatpush3.bf16.xpose.msk.msra.mxu1 %vm4809_vm3, %v3340_v0  ;;  %3246 = vmatprep.mubr.msk.f32.mxu1 %vm312_vm1, %v1457_v61 }
 0x5f5   :  { %3256 = vmatprep.subr.bf16.mxu1 %v5306_v1 }
 0x5f7   :  { %3240 = vmatmul.mubr.msk.f32.vlgmr.msra.gmra.mrb[32].mxu0 %vm312_vm1, %v4831_v49  ;;  %v2222_v49 = vsel %vm312_vm1, %v2217_v27, 0 }
 0x5f8   :  { %3351 = vmatpush3.bf16.xpose.msk.msra.mxu0 %vm4809_vm3, %v3346_v30  ;;  %3253 = vmatprep.mubr.msk.f32.mxu0 %vm312_vm1, %v1459_v31 }
 0x5f9   :  { %3262 = vmatprep.subr.bf16.mxu0 %v5306_v1 }
 0x5fb   :  { %3247 = vmatmul.mubr.msk.f32.vlgmr.msra.gmra.mrb[30].mxu1 %vm312_vm1, %v1458_v48 }
 0x5fc   :  { %3257 = vmatpush3.bf16.xpose.msra.mxu1 %v2172_v33  ;;  %3258 = vmatprep.mubr.msk.bf16.mxu1 %vm3845_vm2, %v5306_v1 }
 0x5fd   :  { %3268 = vmatprep.subr.bf16.mxu1 %v5306_v1 }
 0x5ff   :  { %3254 = vmatmul.mubr.msk.f32.vlgmr.msra.gmra.mrb[34].mxu0 %vm312_vm1, %v1460_v8 }
 0x600   :  { %3263 = vmatpush3.bf16.xpose.msra.mxu0 %v2222_v49  ;;  %3264 = vmatprep.mubr.msk.bf16.mxu0 %vm3845_vm2, %v5306_v1 }
 0x601   :  { %3274 = vmatprep.subr.bf16.mxu0 %v5306_v1 }
 0x603   :  { %3259 = vmatmul.mubr.msk.bf16.vlgmr.msra.gmra.mrb[32].mxu1 %vm312_vm1, %v5316_v7 }
 0x604   :  { %3270 = vmatprep.mubr.msk.bf16.mxu1 %vm3845_vm2, %v5306_v1 }
 0x607   :  { %3265 = vmatmul.mubr.msk.bf16.vlgmr.msra.gmra.mrb[36].mxu0 %vm312_vm1, %v5317_v15 }
 0x608   :  { %3276 = vmatprep.mubr.msk.bf16.mxu0 %vm3845_vm2, %v5306_v1 }
 0x609   :  { %v2059_v46 = vpop.xlane.xlu1 %2058 }
 0x60d   :  { %v2065_v26 = vpop.xlane.xlu1 %2064 }
 0x610   :  { %v2062_v63 = vpop.xlane.xlu0 %2061 }
 0x611   :  { %v2267_v47 = vpop.permute.xlu1 %2266  ;;  %3600 = vrsqrt.f32 %v2062_v63 }
 0x612   :  { %v2272_v45 = vsel %vm312_vm1, %v2267_v47, 0  ;;  %3602 = vrsqrt.f32 %v4795_v20 }
 0x613   :  { %3269 = vmatpush3.bf16.xpose.msra.mxu1 %v2272_v45  ;;  %3604 = vrsqrt.f32 %v2059_v46 }
 0x614   :  { %v2068_v24 = vpop.xlane.xlu0 %2067  ;;  %3280 = vmatprep.subr.bf16.mxu1 %v5306_v1 }
 0x615   :  { %v2375_v37 = vpop.permute.xlu1 %2374  ;;  %3606 = vrsqrt.f32 %v2068_v24 }
 0x616   :  { %v2380_v60 = vsel %vm312_vm1, %v2375_v37, 0  ;;  %3608 = vrsqrt.f32 %v2065_v26 }
 0x618   :  { %v2317_v19 = vpop.permute.xlu0 %2316 }
 0x619   :  { %v2322_v18 = vsel %vm312_vm1, %v2317_v19, 0  ;;  %v2425_v20 = vpop.permute.xlu1 %2424 }
 0x61a   :  { %3271 = vmatmul.mubr.msk.bf16.vlgmr.msra.gmra.mrb[36].mxu1 %vm312_vm1, %v2159_v52  ;;  %3275 = vmatpush3.bf16.xpose.msra.mxu0 %v2322_v18  ;;  %v2430_v2 = vsel %vm312_vm1, %v2425_v20, 0 }
 0x61b   :  { %3281 = vmatpush3.bf16.xpose.msra.mxu1 %v2380_v60  ;;  %3282 = vmatprep.mubr.msk.bf16.mxu1 %vm3845_vm2, %v5306_v1  ;;  %v3601_v32 = vpop.eup %3600 }
 0x61c   :  { %3286 = vmatprep.subr.bf16.mxu0 %v5306_v1  ;;  %3292 = vmatprep.subr.bf16.mxu1 %v5306_v1  ;;  %v2475_v34 = vpop.permute.xlu0 %2474  ;;  %v3603_v5 = vpop.eup %3602  ;;  %v2082_v12 = vmul.f32 %v3601_v32, %v5298_v51 }
 0x61d   :  { %v2480_v42 = vsel %vm312_vm1, %v2475_v34, 0  ;;  %v3605_v52 = vpop.eup %3604  ;;  %v2079_v11 = vmul.f32 %v3603_v5, %v4341_v57  ;;  %v2525_v16 = vpop.permute.xlu1 %2524  ;;  %v5319_v57 = vld [vmem:[#allocation18_spill] sm:$0xff] }
 0x61e   :  { %v2081_v58 = vmul.f32 %v3605_v52, %v5299_v50  ;;  %v2530_v59 = vsel %vm312_vm1, %v2525_v16, 0  ;;  %v5320_v48 = vpack.c.bf16 %v5318_v56, %v5319_v57 }
 0x61f   :  { %v3607_v39 = vpop.eup %3606 }
 0x620   :  { %v3609_v51 = vpop.eup %3608  ;;  %v2084_v28 = vmul.f32 %v3607_v39, %v4404_v55 }
 0x621   :  { %3277 = vmatmul.mubr.msk.bf16.vlgmr.msra.gmra.mrb[40].mxu0 %vm312_vm1, %v2160_v62  ;;  %v2366_v62 = vpack.c.bf16 %v2080_v23, %v2079_v11  ;;  %v2083_v50 = vmul.f32 %v3609_v51, %v5297_v17 }
 0x622   :  { %3283 = vmatmul.mubr.msk.bf16.vlgmr.msra.gmra.mrb[40].mxu1 %vm312_vm1, %v2365_v6  ;;  %3287 = vmatpush3.bf16.xpose.msra.mxu0 %v2430_v2  ;;  %v2367_v6 = vpack.c.bf16 %v2082_v12, %v2081_v58 }
 0x623   :  { %3293 = vmatpush3.bf16.xpose.msra.mxu1 %v2480_v42  ;;  %3288 = vmatprep.mubr.msk.bf16.mxu0 %vm3845_vm2, %v5306_v1  ;;  %v2368_v14 = vpack.c.bf16 %v2084_v28, %v2083_v50 }
 0x624   :  { %3294 = vmatprep.mubr.msk.bf16.mxu1 %vm3845_vm2, %v5306_v1  ;;  %3298 = vmatprep.subr.bf16.mxu0 %v5306_v1 }
 0x625   :  { %3304 = vmatprep.subr.bf16.mxu1 %v5306_v1 }
 0x629   :  { %3289 = vmatmul.mubr.msk.bf16.vlgmr.msra.gmra.mrb[44].mxu0 %vm312_vm1, %v2366_v62 }
 0x62a   :  { %3295 = vmatmul.mubr.msk.bf16.vlgmr.msra.gmra.mrb[44].mxu1 %vm312_vm1, %v2367_v6  ;;  %3299 = vmatpush3.bf16.xpose.msra.mxu0 %v2530_v59 }
 0x62b   :  { %3305 = vmatpush3.bf16.msra.mxu1 %v5320_v48  ;;  %3300 = vmatprep.mubr.msk.bf16.mxu0 %vm3845_vm2, %v5306_v1 }
 0x62c   :  { %3310 = vmatprep.subr.bf16.mxu0 %v5306_v1  ;;  %3306 = vmatprep.mubr.msk.bf16.mxu1 %vm3845_vm2, %v5306_v1 }
 0x62d   :  { %3316 = vmatprep.subr.bf16.mxu1 %v5306_v1 }
 0x631   :  { %3301 = vmatmul.mubr.msk.bf16.vlgmr.msra.gmra.mrb[48].mxu0 %vm312_vm1, %v2368_v14 }
 0x632   :  { %3312 = vmatprep.mubr.msk.bf16.mxu0 %vm3845_vm2, %v5306_v1 }
 0x6aa   :  { %v4962_v55 = vpop.f32.mrb[20].mxu1 }
 0x6ab   :  { %v3208_v21 = vpop.f32.mrb[21].mxu1 }
 0x6ac   :  { %v4964_v43 = vpop.f32.mrb[22].mxu1 }
 0x6ad   :  { %v3209_v25 = vpop.f32.mrb[23].mxu1 }
 0x6b6   :  { %v4966_v9 = vpop.f32.mrb[24].mxu0 }
 0x6b7   :  { %v3214_v40 = vpop.f32.mrb[25].mxu0 }
 0x6b8   :  { %v4968_v22 = vpop.f32.mrb[26].mxu0 }
 0x6b9   :  { %v3215_v17 = vpop.f32.mrb[27].mxu0 }
 0x6be   :  { %v4970_v61 = vpop.f32.mrb[24].mxu1 }
 0x6bf   :  { %v3220_v44 = vpop.f32.mrb[25].mxu1 }
 0x6c0   :  { %v4972_v38 = vpop.f32.mrb[26].mxu1 }
 0x6c1   :  { %v3221_v53 = vpop.f32.mrb[27].mxu1 }
 0x6c2   :  { %v4974_v0 = vpop.f32.mrb[28].mxu0 }
 0x6c3   :  { %v3226_v13 = vpop.f32.mrb[29].mxu0 }
 0x6c4   :  { %v4976_v8 = vpop.f32.mrb[30].mxu0 }
 0x6c5   :  { %v3227_v35 = vpop.f32.mrb[31].mxu0 }
 0x6c6   :  { %v3234_v41 = vpop.f32.mrb[28].mxu1 }
 0x6c7   :  { %v1533_v31 = vpop.f32.mrb[29].mxu1  ;;  %v1792_v30 = vsel %vm312_vm1, %v3234_v41, 0.0 }
 0x6c8   :  { %v1785_v33 = vsel %vm312_vm1, %v1533_v31, 0.0 }
 0x6ca   :  { %v3241_v54 = vpop.f32.mrb[32].mxu0 }
 0x6cb   :  { %v1793_v3 = vsel %vm312_vm1, %v3241_v54, 0.0  ;;  %v1614_v4 = vpop.f32.mrb[33].mxu0 }
 0x6cc   :  { %v1794_v27 = vadd.f32 %v1793_v3, %v1792_v30  ;;  %v1786_v49 = vsel %vm312_vm1, %v1614_v4, 0.0 }
 0x6cd   :  { %v1787_v7 = vadd.f32 %v1786_v49, %v1785_v33 }
 0x6ce   :  { %v3248_v15 = vpop.f32.mrb[30].mxu1 }
 0x6cf   :  { %v1795_v46 = vsel %vm312_vm1, %v3248_v15, 0.0  ;;  %v1695_v26 = vpop.f32.mrb[31].mxu1 }
 0x6d0   :  { %v1796_v63 = vadd.f32 %v1795_v46, %v1794_v27  ;;  %v1788_v47 = vsel %vm312_vm1, %v1695_v26, 0.0 }
 0x6d1   :  { %v1789_v45 = vadd.f32 %v1788_v47, %v1787_v7 }
 0x6d2   :  { %v3255_v24 = vpop.f32.mrb[34].mxu0 }
 0x6d3   :  { %v1797_v37 = vsel %vm312_vm1, %v3255_v24, 0.0  ;;  %v1776_v19 = vpop.f32.mrb[35].mxu0 }
 0x6d4   :  { %v4985_v18 = vadd.f32 %v1797_v37, %v1796_v63  ;;  %v1790_v60 = vsel %vm312_vm1, %v1776_v19, 0.0  ;;  %v5321_v37 = vld [vmem:[#allocation20_spill] sm:$0xff] }
 0x6d5   :  { %v4988_v20 = vadd.f32 %v1790_v60, %v1789_v45 }
 0x6d6   :  { %v4990_v34 = vpop.f32.mrb[32].mxu1 }
 0x6d7   :  { %v3260_v29 = vpop.f32.mrb[33].mxu1  ;;  %v2573_v32 = vsel %vm312_vm1, %v4990_v34, -inf }
 0x6d8   :  { %2574 = vmax.xlane.f32.xlu0 %v2573_v32  ;;  %v4994_v2 = vpop.f32.mrb[34].mxu1 }
 0x6d9   :  { %v3261_v5 = vpop.f32.mrb[35].mxu1  ;;  %v2576_v42 = vsel %vm312_vm1, %v4994_v2, -inf }
 0x6da   :  { %2577 = vmax.xlane.f32.xlu1 %v2576_v42  ;;  %v4998_v52 = vpop.f32.mrb[36].mxu0 }
 0x6db   :  { %v3266_v23 = vpop.f32.mrb[37].mxu0  ;;  %v2579_v58 = vsel %vm312_vm1, %v4998_v52, -inf }
 0x6dc   :  { %v5000_v12 = vpop.f32.mrb[38].mxu0 }
 0x6dd   :  { %v3267_v11 = vpop.f32.mrb[39].mxu0  ;;  %v2582_v16 = vsel %vm312_vm1, %v5000_v12, -inf }
 0x6de   :  { %2580 = vmax.xlane.f32.xlu1 %v2579_v58  ;;  %2583 = vmax.xlane.f32.xlu0 %v2582_v16 }
 0x6ed   :  { %v5006_v62 = vpop.f32.mrb[36].mxu1 }
 0x6ee   :  { %v3272_v39 = vpop.f32.mrb[37].mxu1  ;;  %v2585_v6 = vsel %vm312_vm1, %v5006_v62, -inf }
 0x6ef   :  { %v5010_v59 = vpop.f32.mrb[38].mxu1  ;;  %2586 = vmax.xlane.f32.xlu1 %v2585_v6 }
 0x6f0   :  { %v3273_v51 = vpop.f32.mrb[39].mxu1  ;;  %v2588_v28 = vsel %vm312_vm1, %v5010_v59, -inf }
 0x6f1   :  { %2589 = vmax.xlane.f32.xlu0 %v2588_v28 }
 0x6f4   :  { %v5014_v56 = vpop.f32.mrb[40].mxu0 }
 0x6f5   :  { %v5016_v57 = vpop.f32.mrb[40].mxu1  ;;  %v3278_v48 = vpop.f32.mrb[41].mxu0  ;;  %v2591_v50 = vsel %vm312_vm1, %v5014_v56, -inf }
 0x6f6   :  { %v3284_v14 = vpop.f32.mrb[41].mxu1  ;;  %v2661_v21 = vsel %vm312_vm1, %v5016_v57, -inf  ;;  %2592 = vmax.xlane.f32.xlu1 %v2591_v50  ;;  %v5022_v25 = vpop.f32.mrb[42].mxu0 }
 0x6f7   :  { %v5024_v40 = vpop.f32.mrb[42].mxu1  ;;  %2662 = vmax.xlane.f32.xlu0 %v2661_v21  ;;  %v3279_v17 = vpop.f32.mrb[43].mxu0  ;;  %v2594_v30 = vsel %vm312_vm1, %v5022_v25, -inf }
 0x6f8   :  { %v3285_v44 = vpop.f32.mrb[43].mxu1  ;;  %v2664_v53 = vsel %vm312_vm1, %v5024_v40, -inf }
 0x6fb   :  { %2665 = vmax.xlane.f32.xlu0 %v2664_v53 }
 0x6fc   :  { %v5028_v13 = vpop.f32.mrb[44].mxu0 }
 0x6fd   :  { %v5030_v35 = vpop.f32.mrb[44].mxu1  ;;  %v3290_v41 = vpop.f32.mrb[45].mxu0  ;;  %v2667_v31 = vsel %vm312_vm1, %v5028_v13, -inf }
 0x6fe   :  { %v3296_v54 = vpop.f32.mrb[45].mxu1  ;;  %2668 = vmax.xlane.f32.xlu1 %v2667_v31  ;;  %v5036_v3 = vpop.f32.mrb[46].mxu0  ;;  %v2673_v49 = vsel %vm312_vm1, %v5030_v35, -inf }
 0x6ff   :  { %v5038_v4 = vpop.f32.mrb[46].mxu1  ;;  %2595 = vmax.xlane.f32.xlu0 %v2594_v30  ;;  %v3291_v33 = vpop.f32.mrb[47].mxu0  ;;  %v2670_v7 = vsel %vm312_vm1, %v5036_v3, -inf }
 0x700   :  { %v3297_v27 = vpop.f32.mrb[47].mxu1  ;;  %v2676_v63 = vsel %vm312_vm1, %v5038_v4, -inf }
 0x702   :  { %2674 = vmax.xlane.f32.xlu1 %v2673_v49 }
 0x703   :  { %2671 = vmax.xlane.f32.xlu0 %v2670_v7 }
 0x704   :  { %v5044_v15 = vpop.f32.mrb[48].mxu0 }
 0x705   :  { %v3302_v46 = vpop.f32.mrb[49].mxu0  ;;  %v2679_v26 = vsel %vm312_vm1, %v5044_v15, -inf }
 0x706   :  { %2680 = vmax.xlane.f32.xlu1 %v2679_v26  ;;  %v5050_v47 = vpop.f32.mrb[50].mxu0 }
 0x707   :  { %2677 = vmax.xlane.f32.xlu0 %v2676_v63  ;;  %v3303_v45 = vpop.f32.mrb[51].mxu0  ;;  %v2682_v24 = vsel %vm312_vm1, %v5050_v47, -inf }
 0x70b   :  { %2683 = vmax.xlane.f32.xlu0 %v2682_v24 }
 0x717   :  { %3372 = vrot.lane.b32.xlu1 %v5321_v37, %s3842_s18 }
 0x765   :  { %v2575_v19 = vpop.xlane.xlu0 %2574 }
 0x766   :  { %v2597_v60 = vsub.f32 %v4990_v34, %v2575_v19 }
 0x767   :  { %v2578_v29 = vpop.xlane.xlu1 %2577 }
 0x768   :  { %v2605_v32 = vmul.f32 1.442695, %v2597_v60  ;;  %v2598_v5 = vsub.f32 %v4994_v2, %v2578_v29 }
 0x76a   :  { %3610 = vpow2.f32 %v2605_v32  ;;  %v2607_v42 = vmul.f32 1.442695, %v2598_v5 }
 0x76b   :  { %v2581_v23 = vpop.xlane.xlu1 %2580  ;;  %v2584_v11 = vpop.xlane.xlu0 %2583 }
 0x76c   :  { %3612 = vpow2.f32 %v2607_v42  ;;  %v2599_v58 = vsub.f32 %v4998_v52, %v2581_v23  ;;  %v2600_v16 = vsub.f32 %v5000_v12, %v2584_v11 }
 0x76e   :  { %v2609_v39 = vmul.f32 1.442695, %v2599_v58  ;;  %v2611_v6 = vmul.f32 1.442695, %v2600_v16 }
 0x770   :  { %3614 = vpow2.f32 %v2609_v39 }
 0x771   :  { %3616 = vpow2.f32 %v2611_v6 }
 0x774   :  { %v5060_v51 = vpop.eup %3610 }
 0x775   :  { %v2621_v34 = vsel %vm312_vm1, %v5060_v51, 0.0 }
 0x776   :  { %v5064_v28 = vpop.eup %3612  ;;  %2622 = vadd.xlane.f32.xlu1 %v2621_v34 }
 0x777   :  { %v2624_v2 = vsel %vm312_vm1, %v5064_v28, 0.0 }
 0x778   :  { %2625 = vadd.xlane.f32.xlu0 %v2624_v2 }
 0x77a   :  { %v5068_v48 = vpop.eup %3614 }
 0x77b   :  { %v5070_v52 = vpop.eup %3616  ;;  %v2627_v12 = vsel %vm312_vm1, %v5068_v48, 0.0 }
 0x77c   :  { %v2587_v50 = vpop.xlane.xlu1 %2586  ;;  %2628 = vadd.xlane.f32.xlu1 %v2627_v12  ;;  %v2630_v14 = vsel %vm312_vm1, %v5070_v52, 0.0 }
 0x77d   :  { %v2601_v21 = vsub.f32 %v5006_v62, %v2587_v50  ;;  %2631 = vadd.xlane.f32.xlu0 %v2630_v14 }
 0x77e   :  { %v2590_v17 = vpop.xlane.xlu0 %2589 }
 0x77f   :  { %v2613_v44 = vmul.f32 1.442695, %v2601_v21  ;;  %v2602_v53 = vsub.f32 %v5010_v59, %v2590_v17 }
 0x781   :  { %3618 = vpow2.f32 %v2613_v44  ;;  %v2615_v41 = vmul.f32 1.442695, %v2602_v53 }
 0x783   :  { %3620 = vpow2.f32 %v2615_v41  ;;  %v2593_v31 = vpop.xlane.xlu1 %2592 }
 0x784   :  { %v2663_v54 = vpop.xlane.xlu0 %2662  ;;  %v2603_v30 = vsub.f32 %v5014_v56, %v2593_v31 }
 0x785   :  { %v2685_v33 = vsub.f32 %v5016_v57, %v2663_v54 }
 0x786   :  { %v2617_v27 = vmul.f32 1.442695, %v2603_v30 }
 0x787   :  { %v2693_v49 = vmul.f32 1.442695, %v2685_v33 }
 0x788   :  { %v2666_v7 = vpop.xlane.xlu0 %2665 }
 0x789   :  { %3622 = vpow2.f32 %v2693_v49  ;;  %v2686_v62 = vsub.f32 %v5024_v40, %v2666_v7 }
 0x78a   :  { %3624 = vpow2.f32 %v2617_v27 }
 0x78b   :  { %v5081_v46 = vpop.eup %3618  ;;  %v2695_v26 = vmul.f32 1.442695, %v2686_v62  ;;  %v2669_v59 = vpop.xlane.xlu1 %2668 }
 0x78c   :  { %v2596_v63 = vpop.xlane.xlu0 %2595  ;;  %v2687_v45 = vsub.f32 %v5028_v13, %v2669_v59  ;;  %v2633_v24 = vsel %vm312_vm1, %v5081_v46, 0.0 }
 0x78d   :  { %v5086_v56 = vpop.eup %3620  ;;  %3626 = vpow2.f32 %v2695_v26  ;;  %v2604_v57 = vsub.f32 %v5022_v25, %v2596_v63  ;;  %2634 = vadd.xlane.f32.xlu1 %v2633_v24  ;;  %v5142_v24 = vmul.f32 0.25, %v4854_v10 }
 0x78e   :  { %v2697_v19 = vmul.f32 1.442695, %v2687_v45  ;;  %v2636_v40 = vsel %vm312_vm1, %v5086_v56, 0.0 }
 0x78f   :  { %v2619_v60 = vmul.f32 1.442695, %v2604_v57  ;;  %2637 = vadd.xlane.f32.xlu0 %v2636_v40  ;;  %v2675_v29 = vpop.xlane.xlu1 %2674  ;;  %v1821_v57 = vsel %vm312_vm1, %v5142_v24, -inf }
 0x790   :  { %3628 = vpow2.f32 %v2697_v19  ;;  %v2689_v32 = vsub.f32 %v5030_v35, %v2675_v29  ;;  %v2672_v13 = vpop.xlane.xlu0 %2671  ;;  %v5147_v19 = vmul.f32 0.25, %v4869_v36 }
 0x791   :  { %3630 = vpow2.f32 %v2619_v60  ;;  %v2688_v5 = vsub.f32 %v5036_v3, %v2672_v13 }
 0x792   :  { %v2701_v42 = vmul.f32 1.442695, %v2689_v32  ;;  %v1824_v40 = vsel %vm312_vm1, %v5147_v19, -inf }
 0x793   :  { %v5093_v23 = vpop.eup %3622  ;;  %v2699_v11 = vmul.f32 1.442695, %v2688_v5  ;;  %v2681_v25 = vpop.xlane.xlu1 %2680 }
 0x794   :  { %v5095_v58 = vpop.eup %3624  ;;  %3632 = vpow2.f32 %v2701_v42  ;;  %v2678_v16 = vpop.xlane.xlu0 %2677  ;;  %v2691_v39 = vsub.f32 %v5044_v15, %v2681_v25  ;;  %v2709_v6 = vsel %vm312_vm1, %v5093_v23, 0.0 }
 0x795   :  { %3634 = vpow2.f32 %v2699_v11  ;;  %v2690_v35 = vsub.f32 %v5038_v4, %v2678_v16  ;;  %2710 = vadd.xlane.f32.xlu1 %v2709_v6  ;;  %v2639_v50 = vsel %vm312_vm1, %v5095_v58, 0.0 }
 0x796   :  { %v2705_v34 = vmul.f32 1.442695, %v2691_v39 }
 0x797   :  { %v5101_v3 = vpop.eup %3626  ;;  %v2703_v2 = vmul.f32 1.442695, %v2690_v35  ;;  %v3373_v12 = vpop.permute.xlu1 %3372 }
 0x798   :  { %3636 = vpow2.f32 %v2705_v34  ;;  %v3375_v14 = vunpack.i.h.bf16 %v3373_v12  ;;  %v3374_v21 = vunpack.i.l.bf16 %v3373_v12  ;;  %v2684_v17 = vpop.xlane.xlu0 %2683  ;;  %v2712_v15 = vsel %vm312_vm1, %v5101_v3, 0.0 }
 0x799   :  { %3638 = vpow2.f32 %v2703_v2  ;;  %v2692_v44 = vsub.f32 %v5050_v47, %v2684_v17  ;;  %2640 = vadd.xlane.f32.xlu1 %v2639_v50  ;;  %2713 = vadd.xlane.f32.xlu0 %v2712_v15 }
 0x79a   :  { %v5108_v4 = vpop.eup %3628  ;;  %v2770_v53 = vpack.c.bf16 %v3375_v14, %v3374_v21 }
 0x79b   :  { %v5110_v41 = vpop.eup %3630  ;;  %v2707_v31 = vmul.f32 1.442695, %v2692_v44  ;;  %v2715_v54 = vsel %vm312_vm1, %v5108_v4, 0.0 }
 0x79c   :  { %3311 = vmatpush3.bf16.msra.mxu0 %v2770_v53  ;;  %v2642_v30 = vsel %vm312_vm1, %v5110_v41, 0.0 }
 0x79d   :  { %3640 = vpow2.f32 %v2707_v31  ;;  %2716 = vadd.xlane.f32.xlu1 %v2715_v54  ;;  %2643 = vadd.xlane.f32.xlu0 %v2642_v30 }
 0x79e   :  { %v5116_v33 = vpop.eup %3632  ;;  %3322 = vmatprep.subr.bf16.mxu0 %v5306_v1 }
 0x79f   :  { %v5119_v47 = vpop.eup %3634  ;;  %v2721_v27 = vsel %vm312_vm1, %v5116_v33, 0.0 }
 0x7a0   :  { %v2718_v49 = vsel %vm312_vm1, %v5119_v47, 0.0 }
 0x7a1   :  { %2722 = vadd.xlane.f32.xlu1 %v2721_v27  ;;  %2719 = vadd.xlane.f32.xlu0 %v2718_v49 }
 0x7a2   :  { %v5125_v7 = vpop.eup %3636 }
 0x7a3   :  { %v5127_v62 = vpop.eup %3638  ;;  %v2727_v26 = vsel %vm312_vm1, %v5125_v7, 0.0 }
 0x7a4   :  { %v2724_v59 = vsel %vm312_vm1, %v5127_v62, 0.0 }
 0x7a5   :  { %2728 = vadd.xlane.f32.xlu1 %v2727_v26  ;;  %2725 = vadd.xlane.f32.xlu0 %v2724_v59 }
 0x7a7   :  { %v5133_v63 = vpop.eup %3640 }
 0x7a8   :  { %v2730_v45 = vsel %vm312_vm1, %v5133_v63, 0.0 }
 0x7a9   :  { %2731 = vadd.xlane.f32.xlu0 %v2730_v45 }
 0x7b6   :  { %3382 = vrot.lane.b32.xlu1 %v5321_v37, %s3843_s19 }
 0x7bf   :  { %3377 = vrot.lane.b32.xlu0 %v5321_v37, %s3841_s3 }
 0x7da   :  { %1822 = vmax.xlane.f32.xlu1 %v1821_v57 }
 0x7de   :  { %1825 = vmax.xlane.f32.xlu0 %v1824_v40 }
 0x803   :  { %v2623_v60 = vpop.xlane.xlu1 %2622 }
 0x805   :  { %v2626_v29 = vpop.xlane.xlu0 %2625 }
 0x809   :  { %v2629_v32 = vpop.xlane.xlu1 %2628 }
 0x80a   :  { %v2632_v13 = vpop.xlane.xlu0 %2631 }
 0x81a   :  { %v2635_v5 = vpop.xlane.xlu1 %2634 }
 0x81c   :  { %v2638_v37 = vpop.xlane.xlu0 %2637 }
 0x822   :  { %v2711_v42 = vpop.xlane.xlu1 %2710 }
 0x823   :  { %3642 = vrcp.f32 %v2711_v42 }
 0x824   :  { %3644 = vrcp.f32 %v2623_v60 }
 0x825   :  { %3646 = vrcp.f32 %v2626_v29 }
 0x826   :  { %v2641_v10 = vpop.xlane.xlu1 %2640  ;;  %v2714_v11 = vpop.xlane.xlu0 %2713 }
 0x827   :  { %3648 = vrcp.f32 %v2714_v11 }
 0x828   :  { %3650 = vrcp.f32 %v2629_v32 }
 0x82a   :  { %v2717_v36 = vpop.xlane.xlu1 %2716  ;;  %v2644_v25 = vpop.xlane.xlu0 %2643 }
 0x82b   :  { %3652 = vrcp.f32 %v2717_v36 }
 0x82c   :  { %3654 = vrcp.f32 %v2632_v13 }
 0x82d   :  { %v3643_v16 = vpop.eup %3642  ;;  %3656 = vrcp.f32 %v2635_v5 }
 0x82e   :  { %v2723_v39 = vpop.xlane.xlu1 %2722  ;;  %v2720_v6 = vpop.xlane.xlu0 %2719  ;;  %v2741_v2 = vmul.f32 %v3643_v16, %v5093_v23 }
 0x82f   :  { %v3645_v35 = vpop.eup %3644  ;;  %3658 = vrcp.f32 %v2723_v39 }
 0x830   :  { %v3647_v34 = vpop.eup %3646  ;;  %3660 = vrcp.f32 %v2720_v6  ;;  %v2653_v50 = vmul.f32 %v3645_v35, %v5060_v51 }
 0x831   :  { %3662 = vrcp.f32 %v2638_v37  ;;  %v3649_v12 = vpop.eup %3648  ;;  %v2654_v17 = vmul.f32 %v3647_v34, %v5064_v28 }
 0x832   :  { %3664 = vrcp.f32 %v2641_v10  ;;  %v2729_v14 = vpop.xlane.xlu1 %2728  ;;  %v2726_v21 = vpop.xlane.xlu0 %2725  ;;  %v2742_v15 = vmul.f32 %v3649_v12, %v5101_v3  ;;  %v2749_v53 = vadd.f32 %v2741_v2, %v2653_v50 }
 0x833   :  { %3666 = vrcp.f32 %v2729_v14  ;;  %v3651_v44 = vpop.eup %3650 }
 0x834   :  { %3668 = vrcp.f32 %v2726_v21  ;;  %v2750_v54 = vadd.f32 %v2742_v15, %v2654_v17  ;;  %v2655_v49 = vmul.f32 %v3651_v44, %v5068_v48  ;;  %v2757_v26 = vmul.f32 0.5, %v2749_v53 }
 0x835   :  { %v3653_v31 = vpop.eup %3652  ;;  %3670 = vrcp.f32 %v2644_v25 }
 0x836   :  { %v2743_v23 = vmul.f32 %v3653_v31, %v5108_v4  ;;  %v2732_v30 = vpop.xlane.xlu0 %2731  ;;  %v3655_v27 = vpop.eup %3654  ;;  %v2758_v59 = vmul.f32 0.5, %v2750_v54 }
 0x837   :  { %3672 = vrcp.f32 %v2732_v30  ;;  %v3657_v51 = vpop.eup %3656  ;;  %v2656_v3 = vmul.f32 %v3655_v27, %v5070_v52  ;;  %v3383_v13 = vpop.permute.xlu1 %3382 }
 0x838   :  { %v2751_v57 = vadd.f32 %v2743_v23, %v2655_v49  ;;  %v2765_v40 = vpack.c.bf16 %v2758_v59, %v2757_v26  ;;  %v2657_v10 = vmul.f32 %v3657_v51, %v5081_v46  ;;  %v3384_v16 = vunpack.i.l.bf16 %v3383_v13 }
 0x839   :  { %v3659_v28 = vpop.eup %3658 }
 0x83a   :  { %v3661_v45 = vpop.eup %3660  ;;  %v3378_v60 = vpop.permute.xlu0 %3377  ;;  %v2745_v32 = vmul.f32 %v3659_v28, %v5116_v33  ;;  %3307 = vmatmul.mubr.msk.bf16.vlgmr.msra.gmra.mrb[48].mxu1 %vm312_vm1, %v2765_v40  ;;  %v2759_v34 = vmul.f32 0.5, %v2751_v57  ;;  %v1800_v57 = vmul.f32 0.25, %v4985_v18 }
 0x83b   :  { %v3663_v29 = vpop.eup %3662  ;;  %v2744_v4 = vmul.f32 %v3661_v45, %v5119_v47  ;;  %v3380_v5 = vunpack.i.h.bf16 %v3378_v60  ;;  %v3379_v37 = vunpack.i.l.bf16 %v3378_v60  ;;  %3318 = vmatprep.mubr.msk.bf16.mxu1 %vm3845_vm2, %v5306_v1  ;;  %v3385_v47 = vunpack.i.h.bf16 %v3383_v13 }
 0x83c   :  { %v3665_v42 = vpop.eup %3664  ;;  %v2658_v25 = vmul.f32 %v3663_v29, %v5086_v56  ;;  %v2753_v6 = vadd.f32 %v2745_v32, %v2657_v10  ;;  %vm1818_vm5 = vcmp.gt.f32.partialorder %v1800_v57, 0.75 }
 0x83d   :  { %v3667_v48 = vpop.eup %3666  ;;  %v2752_v11 = vadd.f32 %v2744_v4, %v2656_v3  ;;  %v2771_v36 = vpack.c.bf16 %v3380_v5, %v3379_v37  ;;  %v2659_v46 = vmul.f32 %v3665_v42, %v5095_v58  ;;  %v2772_v56 = vpack.c.bf16 %v3385_v47, %v3384_v16 }
 0x83e   :  { %v3669_v52 = vpop.eup %3668  ;;  %v2747_v33 = vmul.f32 %v3667_v48, %v5125_v7  ;;  %v2761_v15 = vmul.f32 0.5, %v2753_v6 }
 0x83f   :  { %v3671_v39 = vpop.eup %3670  ;;  %v2746_v35 = vmul.f32 %v3669_v52, %v5127_v62  ;;  %3317 = vmatpush3.bf16.msra.mxu1 %v2771_v36  ;;  %v2760_v2 = vmul.f32 0.5, %v2752_v11 }
 0x840   :  { %v2660_v21 = vmul.f32 %v3671_v39, %v5110_v41  ;;  %v2755_v17 = vadd.f32 %v2747_v33, %v2659_v46 }
 0x841   :  { %v3673_v12 = vpop.eup %3672  ;;  %v2754_v50 = vadd.f32 %v2746_v35, %v2658_v25  ;;  %v2766_v14 = vpack.c.bf16 %v2760_v2, %v2759_v34 }
 0x842   :  { %v2748_v7 = vmul.f32 %v3673_v12, %v5133_v63  ;;  %v2763_v58 = vmul.f32 0.5, %v2755_v17  ;;  %v3686_v17 = vld [vmem:[#allocation2 + $0x8] sm:$0xff] }
 0x843   :  { %3313 = vmatmul.mubr.msk.bf16.vlgmr.msra.gmra.mrb[52].mxu0 %vm312_vm1, %v2766_v14  ;;  %v2762_v44 = vmul.f32 0.5, %v2754_v50 }
 0x844   :  { %v2756_v53 = vadd.f32 %v2748_v7, %v2660_v21  ;;  %3323 = vmatpush3.bf16.msra.mxu0 %v2772_v56  ;;  %3324 = vmatprep.mubr.msk.bf16.mxu0 %vm3845_vm2, %v5306_v1 }
 0x845   :  { %v2767_v62 = vpack.c.bf16 %v2762_v44, %v2761_v15 }
 0x846   :  { %v2764_v31 = vmul.f32 0.5, %v2756_v53 }
 0x847   :  { %3319 = vmatmul.mubr.msk.bf16.vlgmr.msra.gmra.mrb[52].mxu1 %vm312_vm1, %v2767_v62 }
 0x848   :  { %v2768_v54 = vpack.c.bf16 %v2764_v31, %v2763_v58  ;;  %v3687_v31 = vld [vmem:[#allocation2] sm:$0xff] }
 0x84b   :  { %3325 = vmatmul.mubr.msk.bf16.vlgmr.msra.gmra.mrb[56].mxu0 %vm312_vm1, %v2768_v54 }
 0x867   :  { %v1823_v41 = vpop.xlane.xlu1 %1822 }
 0x868   :  { %v1827_v63 = vsub.f32 %v5142_v24, %v1823_v41  ;;  %v1799_v24 = vmul.f32 0.25, %v4988_v20  ;;  %v1820_v20 = vsel %vm1818_vm5, 1.0, %v5306_v1 }
 0x86a   :  { %v1829_v23 = vmul.f32 1.442695, %v1827_v63  ;;  %vm1817_vm4 = vcmp.gt.f32.partialorder %v1799_v24, 0.75 }
 0x86b   :  { %v1826_v30 = vpop.xlane.xlu0 %1825  ;;  %v1819_v4 = vsel %vm1817_vm4, 1.0, %v5306_v1 }
 0x86c   :  { %3674 = vpow2.f32 %v1829_v23  ;;  %v1828_v27 = vsub.f32 %v5147_v19, %v1826_v30 }
 0x86e   :  { %v1831_v51 = vmul.f32 1.442695, %v1828_v27 }
 0x870   :  { %3676 = vpow2.f32 %v1831_v51 }
 0x876   :  { %v3675_v49 = vpop.eup %3674 }
 0x877   :  { %v1833_v26 = vsel %vm312_vm1, %v3675_v49, 0.0 }
 0x878   :  { %1834 = vadd.xlane.f32.xlu0 %v1833_v26 }
 0x87a   :  { %v3677_v59 = vpop.eup %3676 }
 0x87b   :  { %v1836_v28 = vsel %vm312_vm1, %v3677_v59, 0.0 }
 0x87c   :  { %1837 = vadd.xlane.f32.xlu1 %v1836_v28 }
 0x905   :  { %v1835_v45 = vpop.xlane.xlu0 %1834 }
 0x906   :  { %3678 = vrcp.f32 %v1835_v45 }
 0x909   :  { %v1838_v3 = vpop.xlane.xlu1 %1837 }
 0x90a   :  { %3680 = vrcp.f32 %v1838_v3 }
 0x90d   :  { %v5181_v19 = vpop.f32.mrb[48].mxu1 }
 0x90e   :  { %v3308_v60 = vpop.f32.mrb[49].mxu1 }
 0x90f   :  { %v5183_v29 = vpop.f32.mrb[50].mxu1 }
 0x910   :  { %v3679_v40 = vpop.eup %3678  ;;  %v3309_v13 = vpop.f32.mrb[51].mxu1 }
 0x911   :  { %v1841_v32 = vmul.f32 %v3679_v40, %v3675_v49 }
 0x913   :  { %v1843_v5 = vmul.f32 %v1841_v32, %v1819_v4 }
 0x914   :  { %v3681_v37 = vpop.eup %3680 }
 0x915   :  { %v1845_v42 = vsel %vm312_vm1, %v1843_v5, 0.0  ;;  %v1842_v48 = vmul.f32 %v3681_v37, %v3677_v59 }
 0x916   :  { %v2854_v18 = vpop.f32.mrb[52].mxu0  ;;  %1846 = vadd.xlane.f32.xlu0 %v1845_v42 }
 0x917   :  { %v3314_v10 = vpop.f32.mrb[53].mxu0  ;;  %v1844_v11 = vmul.f32 %v1842_v48, %v1820_v20 }
 0x918   :  { %v2857_v36 = vpop.f32.mrb[54].mxu0 }
 0x919   :  { %v3315_v52 = vpop.f32.mrb[55].mxu0  ;;  %v1848_v25 = vsel %vm312_vm1, %v1844_v11, 0.0 }
 0x91a   :  { %v2898_v33 = vpop.f32.mrb[52].mxu1  ;;  %1849 = vadd.xlane.f32.xlu1 %v1848_v25 }
 0x91b   :  { %v3320_v47 = vpop.f32.mrb[53].mxu1 }
 0x91c   :  { %v2901_v16 = vpop.f32.mrb[54].mxu1 }
 0x91d   :  { %v3321_v39 = vpop.f32.mrb[55].mxu1 }
 0x91e   :  { %v2942_v6 = vpop.f32.mrb[56].mxu0 }
 0x91f   :  { %v3326_v35 = vpop.f32.mrb[57].mxu0 }
 0x920   :  { %v2945_v34 = vpop.f32.mrb[58].mxu0 }
 0x921   :  { %v3327_v2 = vpop.f32.mrb[59].mxu0 }
 0x92b   :  { %1381 = vrot.lane.b32.xlu1 %v4968_v22, %s3846_s20 }
 0x92c   :  { %1379 = vrot.lane.b32.xlu0 %v4966_v9, %s3846_s20 }
 0x92f   :  { %1387 = vrot.lane.b32.xlu1 %v4970_v61, %s3847_s22 }
 0x930   :  { %1389 = vrot.lane.b32.xlu0 %v4972_v38, %s3847_s22 }
 0x933   :  { %1395 = vrot.lane.b32.xlu1 %v4974_v0, %s3848_s23 }
 0x934   :  { %1397 = vrot.lane.b32.xlu0 %v4976_v8, %s3848_s23 }
 0x937   :  { %2959 = vrot.lane.b32.xlu1 %v2898_v33, %s3847_s22 }
 0x938   :  { %2951 = vrot.lane.b32.xlu0 %v2854_v18, %s3846_s20 }
 0x93b   :  { %2953 = vrot.lane.b32.xlu1 %v2857_v36, %s3846_s20 }
 0x93c   :  { %2961 = vrot.lane.b32.xlu0 %v2901_v16, %s3847_s22 }
 0x93f   :  { %2967 = vrot.lane.b32.xlu1 %v2942_v6, %s3848_s23 }
 0x940   :  { %2969 = vrot.lane.b32.xlu0 %v2945_v34, %s3848_s23 }
 0x9a3   :  { %v1847_v1 = vpop.xlane.xlu0 %1846 }
 0x9a4   :  { %3682 = vrcp.f32 %v1847_v1 }
 0x9a7   :  { %v1850_v22 = vpop.xlane.xlu1 %1849  ;;  %v1380_v9 = vpop.permute.xlu0 %1379 }
 0x9a8   :  { %3684 = vrcp.f32 %v1850_v22 }
 0x9ab   :  { %v1382_v46 = vpop.permute.xlu1 %1381  ;;  %v1390_v61 = vpop.permute.xlu0 %1389 }
 0x9ac   :  { %v1402_v38 = vsel %vm312_vm1, %v4964_v43, %v1382_v46  ;;  %v1401_v43 = vsel %vm312_vm1, %v4962_v55, %v1380_v9 }
 0x9ad   :  { %v1405_v8 = vsel %vm1403_vm6, %v1402_v38, %v1390_v61 }
 0x9ae   :  { %v3683_v0 = vpop.eup %3682 }
 0x9af   :  { %v1388_v12 = vpop.permute.xlu1 %1387  ;;  %v1398_v50 = vpop.permute.xlu0 %1397  ;;  %v1853_v14 = vmul.f32 %v3683_v0, %v1843_v5 }
 0x9b0   :  { %v1408_v21 = vsel %vm1406_vm7, %v1405_v8, %v1398_v50  ;;  %v1404_v15 = vsel %vm1403_vm6, %v1401_v43, %v1388_v12 }
 0x9b1   :  { %v1410_v56 = vadd.f32 %v3686_v17, %v1408_v21  ;;  %1855 = vst.msk [vmem:[#allocation11] sm:$0xff] %vm312_vm1, %v1853_v14 }
 0x9b2   :  { %v3685_v7 = vpop.eup %3684 }
 0x9b3   :  { %1412 = vst.msk [vmem:[#allocation10 + $0x8] sm:$0xff] %vm131_vm0, %v1410_v56  ;;  %v1396_v44 = vpop.permute.xlu1 %1395  ;;  %v2952_v53 = vpop.permute.xlu0 %2951  ;;  %v1854_v62 = vmul.f32 %v3685_v7, %v1844_v11 }
 0x9b4   :  { %v1407_v58 = vsel %vm1406_vm7, %v1404_v15, %v1396_v44 }
 0x9b5   :  { %v1409_v54 = vadd.f32 %v3687_v31, %v1407_v58  ;;  %1856 = vst.msk [vmem:[#allocation11 + $0x8] sm:$0xff] %vm312_vm1, %v1854_v62 }
 0x9b6   :  { %3789 = shalt.err (!%p3786_p8)
}
 0x9b7   :  { %s3790_s29 = scalar_lea.hbm %s5252_s5, 256 }
 0x9b8   :  { %p3791_p9 = scmp.ne.s32.totalorder %s5252_s5, %s3790_s29  ;;  %p3794_p10 = scmp.lt.u32.totalorder %s3790_s29, %s5252_s5 }
 0x9ba   :  { %p3796_p11 = pnand %p3794_p10, %p3791_p9 }
 0x9bc   :  { %3799 = shalt.err (!%p3796_p11)
}
 0x9bd   :  { %3006 = dma.vmem_to_hbm [thread:$0]  %s3001_s25, 256, %s5252_s5, [#allocation12], %s3834_s30, %s3834_s30, %s3835_s6   ;;  %1411 = vst.msk [vmem:[#allocation10] sm:$0xff] %vm131_vm0, %v1409_v54  ;;  %v2960_v55 = vpop.permute.xlu1 %2959  ;;  %v2962_v41 = vpop.permute.xlu0 %2961  ;;  %v2973_v51 = vsel %vm312_vm1, %v5181_v19, %v2952_v53  ;;  %v3688_v59 = vld [vmem:[#allocation2 + $0x18] sm:$0xff]  ;;  %v3689_v24 = vld [vmem:[#allocation2 + $0x10] sm:$0xff] }
 0x9be   :  { %s3850_s11 = smov [#allocation10]   ;;  %v2975_v26 = vsel %vm1403_vm6, %v2973_v51, %v2960_v55 }
 0x9bf   :  { %s2988_s12 = sshll.u32 %s3850_s11, 4  ;;  %s2989_s12 = int_to_ptr.vmem [resolvable:$true] %s2988_s12 }
 0x9c0   :  { %s3800_s5 = scalar_lea.vmem %s2989_s12, 512  ;;  %p3805_p13 = scmp.lt.s32.totalorder %s2989_s12, %s2989_s12 }
 0x9c1   :  { %v2954_v63 = vpop.permute.xlu1 %2953  ;;  %v2970_v27 = vpop.permute.xlu0 %2969  ;;  %p3801_p12 = scmp.ne.s32.totalorder %s2989_s12, %s3800_s5  ;;  %p3806_p0 = scmp.lt.s32.totalorder %s3800_s5, %s3800_s5 }
 0x9c2   :  { %v2974_v23 = vsel %vm312_vm1, %v5183_v29, %v2954_v63 }
 0x9c3   :  { %v2976_v30 = vsel %vm1403_vm6, %v2974_v23, %v2962_v41  ;;  %p3807_p1 = por %p3806_p0, %p3805_p13 }
 0x9c4   :  { %v2978_v49 = vsel %vm1406_vm7, %v2976_v30, %v2970_v27 }
 0x9c5   :  { %v2980_v28 = vadd.f32 %v3688_v59, %v2978_v49  ;;  %v2968_v45 = vpop.permute.xlu1 %2967  ;;  %p3808_p2 = pnand %p3807_p1, %p3801_p12 }
 0x9c6   :  { %v2977_v3 = vsel %vm1406_vm7, %v2975_v26, %v2968_v45 }
 0x9c7   :  { %2982 = vst.msk [vmem:[#allocation10 + $0x18] sm:$0xff] %vm131_vm0, %v2980_v28  ;;  %v2979_v57 = vadd.f32 %v3689_v24, %v2977_v3 }
 0x9c9   :  { %2981 = vst.msk [vmem:[#allocation10 + $0x10] sm:$0xff] %vm131_vm0, %v2979_v57 }
 0x9ca   :  { %3811 = shalt.err (!%p3808_p2)
}
 0x9cb   :  { %s3812_s15 = scalar_lea.hbm %s5251_s4, 512 }
 0x9cc   :  { %p3813_p3 = scmp.ne.s32.totalorder %s5251_s4, %s3812_s15  ;;  %p3816_p4 = scmp.lt.u32.totalorder %s3812_s15, %s5251_s4 }
 0x9ce   :  { %p3818_p5 = pnand %p3816_p4, %p3813_p3 }
 0x9d0   :  { %3821 = shalt.err (!%p3818_p5)
}
 0x9d1   :  { %2994 = dma.vmem_to_hbm [thread:$0]  %s2989_s12, 512, %s5251_s4, [#allocation4], %s3834_s30, %s3834_s30, %s3835_s6  }
 0x9d2   :  { %3828 = dma.done.wait [#allocation4], 512  }
 0x9d3   :  { %3829 = vsyncadd [#allocation4], 4294966784 }
 0x9d4   :  { %3830 = dma.done.wait [#allocation12], 256  }
 0x9d5   :  { %3831 = vsyncadd [#allocation12], 4294967040 }
 0x9d6   :  { %3013 = vsyncpa [#allocation3], 1 }
 0x9d7   :  { %3014 = vsyncpa [#allocation6], 1 }
 0x9d8   :  { %3015 = vsyncpa [#allocation9], 1 }
 0x9d9   :  { %3016 = vsyncpa [#allocation4], 1 }
 0x9da   :  { %3017 = vsyncpa [#allocation12], 1 }

</bundles_post_ra>
